<compile_context>
chip_gen: v6e
topology: v6e:2x2x1
jax: 0.10.0
libtpu: 0.0.40
codegen_flags: <defaults>
</compile_context>

<pallas_src>
import functools

import jax
import jax.numpy as jnp
import numpy as np
from jax.experimental import pallas as pl
from jax.experimental.pallas import tpu as pltpu

LANES = 128
_SMALL_BYTES = 1 << 20       # below this, skip Pallas entirely
_MIN_TILE_BYTES = 1 << 20    # never shrink tiles below ~1 MiB when splitting


def _round_up(v, m):
    return ((v + m - 1) // m) * m


def _cdiv(a, b):
    return -(-a // b)


def _chip_kind():
    try:
        return jax.devices()[0].device_kind.lower()
    except Exception:
        return ""


def _plain_scale(x, const):
    # f32 compute then cast back; used for the small / awkward-shape fast paths.
    return (x.astype(jnp.float32) * jnp.float32(const)).astype(x.dtype)


def _scale_kernel(x_ref, o_ref, *, const):
    # Pure elementwise multiply on the VPU; f32 accumulate, cast on store.
    xf = x_ref[...].astype(jnp.float32)
    o_ref[...] = (xf * jnp.float32(const)).astype(o_ref.dtype)


def weight_scaling(x, fan_in, gain, *, donate_input=False):
    """Equivalent of Weight_Scaling(fan_in, gain)(x)."""
    const = float(gain) / float(np.sqrt(fan_in))

    orig_shape = x.shape
    dtype = x.dtype
    n = int(x.size)
    itemsize = int(jnp.dtype(dtype).itemsize)
    total_bytes = n * itemsize

    # ---- fast path: tiny tensors (fixed kernel overhead dominates) ----------
    if n == 0 or total_bytes < _SMALL_BYTES:
        return _plain_scale(x, const)

    # ---- per-chip tuning -----------------------------------------------------
    kind = _chip_kind()
    is_v7 = ("v7" in kind) or ("7x" in kind)
    if is_v7:
        # 64 MiB VMEM per TC: 4 MiB blocks, double-buffered in+out ~= 16 MiB.
        target_block_bytes = 4 * 1024 * 1024
        vmem_limit = 32 * 1024 * 1024
        multi_core = True
    else:
        # v5e / v6e: 128 MiB physical VMEM, single TC -> bigger tiles, fewer steps.
        target_block_bytes = 8 * 1024 * 1024
        vmem_limit = 64 * 1024 * 1024
        multi_core = False

    # Sublane packing: 8 rows for 32-bit, 16 for 16-bit, 32 for 8-bit dtypes.
    packing = 8 * max(1, 4 // itemsize)

    # ---- choose a lane-dense 2-D view (always a FREE contiguous reshape) ----
    cols = None
    for c in (16 * LANES, 8 * LANES, 4 * LANES, 2 * LANES, LANES):
        if n % c == 0:
            cols = c
            break
    if cols is None:
        # n % 128 != 0: collapse trailing dims until the product is >= 512 so
        # at most one masked lane-group per row (>= 80% lane-dense stores).
        prod = 1
        for d in reversed(orig_shape):
            prod *= int(d)
            if prod >= 512:
                cols = prod
                break
        if cols is None:
            cols = n  # degenerate; handled by the fallbacks below

    rows = n // cols
    if rows < 1 or (rows < packing and rows != n // cols):
        return _plain_scale(x, const)
    if rows == 1 and cols == n and n % LANES != 0:
        # Fully-collapsed 1-row view would be lane/sublane inefficient.
        return _plain_scale(x, const)

    x2d = jnp.reshape(x, (rows, cols))

    # ---- tile sizing ---------------------------------------------------------
    rows_from_bytes = max(
        packing, (target_block_bytes // max(1, cols * itemsize)) // packing * packing
    )

    if rows <= packing:
        row_tile = rows  # full-extent block along the sublane axis is legal
    else:
        rows_aligned_down = max(packing, (rows // packing) * packing)
        row_tile = min(rows_from_bytes, rows_aligned_down)
        if multi_core:
            # v7x: ensure an even number of grid steps >= 2 so both TensorCores
            # get balanced halves of this mem-bound loop (but never shrink a
            # tile below ~1 MiB).
            steps = _cdiv(rows, row_tile)
            if steps < 2 or (steps % 2 == 1):
                tgt_steps = steps + 1 if steps % 2 == 1 else 2
                cand = _round_up(_cdiv(rows, tgt_steps), packing)
                if cand * cols * itemsize >= _MIN_TILE_BYTES:
                    row_tile = min(row_tile, cand)
        row_tile = max(packing, row_tile)

    # VMEM safety: in + out, double-buffered.
    block_bytes = row_tile * cols * itemsize
    if 4 * block_bytes > vmem_limit:
        return _plain_scale(x, const)

    grid = (pl.cdiv(rows, row_tile),)
    kernel = functools.partial(_scale_kernel, const=const)

    y2d = pl.pallas_call(
        kernel,
        out_shape=jax.ShapeDtypeStruct((rows, cols), dtype),
        grid_spec=pltpu.PrefetchScalarGridSpec(
            num_scalar_prefetch=0,
            grid=grid,
            in_specs=[pl.BlockSpec((row_tile, cols), lambda i: (i, 0))],
            out_specs=pl.BlockSpec((row_tile, cols), lambda i: (i, 0)),
        ),
        compiler_params=pltpu.CompilerParams(
            dimension_semantics=("parallel",),
            vmem_limit_bytes=vmem_limit,
        ),
        cost_estimate=pl.CostEstimate(
            flops=n, transcendentals=0, bytes_accessed=2 * n * itemsize
        ),
        input_output_aliases={0: 0} if donate_input else {},
    )(x2d)

    return jnp.reshape(y2d, orig_shape)


if __name__ == "__main__":
    key = jax.random.PRNGKey(0)
    k1, k2, k3 = jax.random.split(key, 3)

    fan_in = 4 * 3 * 3          # e.g. in_channels * kH * kW of a following conv
    gain = float(np.sqrt(2.0))  # typical LeakyReLU/ReLU gain
    kaiming_const = float(gain / np.sqrt(fan_in))

    # (1) Small NCHW input consistent with a conv-style feature map (fast path).
    x_small = jax.random.normal(k1, (2, 4, 16, 16), dtype=jnp.float32)
    # (2) Large lane-dense tensor -> exercises the main Pallas kernel path.
    x_big = jax.random.normal(k2, (512, 2048), dtype=jnp.float32)
    # (3) Large tensor whose size is NOT a multiple of 128 -> trailing-dim
    #     collapse path (lane-sparse fix), still through the Pallas kernel.
    x_odd = jax.random.normal(k3, (600, 1031), dtype=jnp.float32)

    for x in (x_small, x_big, x_odd):
        y = weight_scaling(x, fan_in, gain)
        jax.block_until_ready(y)
        y_ref = kaiming_const * np.asarray(x)
        np.testing.assert_allclose(np.asarray(y), y_ref, rtol=1e-6, atol=1e-6)

    print("KERNEL_OK")
</pallas_src>

<mosaic_0001>
module attributes {stable_mosaic.version = 11 : i64} {
  func.func @_scale_kernel(%arg0: i32, %arg1: memref<512x2048xf32, #tpu.memory_space<vmem>>, %arg2: memref<512x2048xf32, #tpu.memory_space<vmem>>) attributes {dimension_semantics = [#tpu.dimension_semantics<parallel>], iteration_bounds = array<i64: 1>, scalar_prefetch = 0 : i64, scratch_operands = 0 : i64, tpu.core_type = #tpu.core_type<tc>, window_params = [{transform_indices = @transform_0, window_bounds = array<i64: 512, 2048>}, {transform_indices = @transform_1, window_bounds = array<i64: 512, 2048>}]} {
    %c0 = arith.constant 0 : index
    %c0_0 = arith.constant 0 : index
    %0 = vector.load %arg1[%c0, %c0_0] : memref<512x2048xf32, #tpu.memory_space<vmem>>, vector<512x2048xf32>
    %cst = arith.constant 0.235702261 : f32
    %1 = vector.broadcast %cst : f32 to vector<512x2048xf32>
    %2 = arith.mulf %0, %1 : vector<512x2048xf32>
    %c0_1 = arith.constant 0 : index
    %c0_2 = arith.constant 0 : index
    %3 = vector.load %arg2[%c0_1, %c0_2] : memref<512x2048xf32, #tpu.memory_space<vmem>>, vector<512x2048xf32>
    tpu.vector_store %arg2[%c0_1, %c0_2], %2 {strides = array<i32>} : memref<512x2048xf32, #tpu.memory_space<vmem>>, vector<512x2048xf32>,
    return
  }
  func.func @transform_0(%arg0: i32) -> (i32, i32) {
    %c0_i32 = arith.constant 0 : i32
    %c0_i32_0 = arith.constant 0 : i32
    return %arg0, %c0_i32 : i32, i32
  }
  func.func @transform_1(%arg0: i32) -> (i32, i32) {
    %c0_i32 = arith.constant 0 : i32
    %c0_i32_0 = arith.constant 0 : i32
    return %arg0, %c0_i32 : i32, i32
  }
}

</mosaic_0001>

<bundles_post_ra>
// kernel: tpu_custom_call.1
= control target key start
LH: loop header
LB: loop body
LE: loop exit
PB: predicated region body
PF: predicated region fallthrough
CT: control target
= control target key end

     0   :  { %6 = vsyncpa [#allocation3], 0  ;;  %s3186_s0 = inlined_call_operand.hbm [shape: f32[512,2048], index: 0, kind: input, shape index: {}]   ;;  %s3187_s1 = inlined_call_operand.hbm [shape: f32[512,2048], index: 1, kind: output, shape index: {}]  }
   0x1   :  { %7 = vsyncpa [#allocation4], 0  ;;  %s3160_s6 = smov [#allocation2]  }
   0x2   :  { %s13_s7 = sshll.u32 %s3160_s6, 4  ;;  %s14_s7 = int_to_ptr.vmem [resolvable:$true] %s13_s7 }
   0x3   :  { %s3124_s8 = scalar_lea.vmem %s14_s7, 131072  ;;  %p3129_p1 = scmp.lt.s32.totalorder %s14_s7, %s14_s7 }
   0x4   :  { %p3125_p0 = scmp.ne.s32.totalorder %s14_s7, %s3124_s8  ;;  %p3130_p2 = scmp.lt.s32.totalorder %s3124_s8, %s3124_s8 }
   0x6   :  { %p3131_p3 = por %p3130_p2, %p3129_p1 }
   0x8   :  { %p3132_p4 = pnand %p3131_p3, %p3125_p0 }
   0xa   :  { %3135 = shalt.err (!%p3132_p4)
}
   0xb   :  { %s3161_s9 = smov 2048   ;;  %s3162_s10 = smov 128  }
   0xc   :  { %19 = dma.hbm_to_vmem [thread:$0]  %s3186_s0, 131072, %s14_s7, [#allocation3], %s3161_s9, %s3161_s9, %s3162_s10  }
   0xd   :  { %3156 = dma.done.wait [#allocation3], 131072  }
   0xe   :  { %3157 = vsyncadd [#allocation3], 4294836224  ;;  %v23_v0 = vld [vmem:[#allocation2] sm:$0xff]  ;;  %v24_v1 = vld [vmem:[#allocation2 + $0x8] sm:$0xff]  ;;  %s3163_s0 = smov [#allocation5]  }
   0xf   :  { %v25_v2 = vld [vmem:[#allocation2 + $0x10] sm:$0xff]  ;;  %v1047_v3 = vmul.f32 0.23570226, %v23_v0  ;;  %v1048_v4 = vmul.f32 0.23570226, %v24_v1  ;;  %v26_v6 = vld [vmem:[#allocation2 + $0x18] sm:$0xff] }
  0x10   :  { %v1049_v5 = vmul.f32 0.23570226, %v25_v2  ;;  %v27_v7 = vld [vmem:[#allocation2 + $0x20] sm:$0xff]  ;;  %v28_v8 = vld [vmem:[#allocation2 + $0x28] sm:$0xff]  ;;  %v1050_v9 = vmul.f32 0.23570226, %v26_v6 }
  0x11   :  { %2071 = vst [vmem:[#allocation5] sm:$0xff] %v1047_v3  ;;  %2072 = vst [vmem:[#allocation5 + $0x8] sm:$0xff] %v1048_v4  ;;  %v1051_v10 = vmul.f32 0.23570226, %v27_v7  ;;  %v1052_v11 = vmul.f32 0.23570226, %v28_v8 }
  0x12   :  { %2073 = vst [vmem:[#allocation5 + $0x10] sm:$0xff] %v1049_v5  ;;  %v29_v12 = vld [vmem:[#allocation2 + $0x30] sm:$0xff]  ;;  %v30_v13 = vld [vmem:[#allocation2 + $0x38] sm:$0xff]  ;;  %v31_v14 = vld [vmem:[#allocation2 + $0x40] sm:$0xff]  ;;  %s3100_s13 = sshll.u32 %s3163_s0, 4  ;;  %s3101_s13 = int_to_ptr.vmem [resolvable:$true] %s3100_s13 }
  0x13   :  { %2074 = vst [vmem:[#allocation5 + $0x18] sm:$0xff] %v1050_v9  ;;  %2075 = vst [vmem:[#allocation5 + $0x20] sm:$0xff] %v1051_v10  ;;  %v1053_v15 = vmul.f32 0.23570226, %v29_v12  ;;  %v1054_v16 = vmul.f32 0.23570226, %v30_v13  ;;  %p3141_p6 = scmp.lt.s32.totalorder %s3101_s13, %s3101_s13 }
  0x14   :  { %2076 = vst [vmem:[#allocation5 + $0x28] sm:$0xff] %v1052_v11  ;;  %v1055_v17 = vmul.f32 0.23570226, %v31_v14  ;;  %v32_v18 = vld [vmem:[#allocation2 + $0x48] sm:$0xff]  ;;  %v33_v19 = vld [vmem:[#allocation2 + $0x50] sm:$0xff]  ;;  %v34_v20 = vld [vmem:[#allocation2 + $0x58] sm:$0xff] }
  0x15   :  { %2077 = vst [vmem:[#allocation5 + $0x30] sm:$0xff] %v1053_v15  ;;  %2078 = vst [vmem:[#allocation5 + $0x38] sm:$0xff] %v1054_v16  ;;  %v1056_v21 = vmul.f32 0.23570226, %v32_v18  ;;  %v1057_v22 = vmul.f32 0.23570226, %v33_v19 }
  0x16   :  { %2079 = vst [vmem:[#allocation5 + $0x40] sm:$0xff] %v1055_v17  ;;  %v1058_v23 = vmul.f32 0.23570226, %v34_v20  ;;  %v35_v24 = vld [vmem:[#allocation2 + $0x60] sm:$0xff]  ;;  %v36_v25 = vld [vmem:[#allocation2 + $0x68] sm:$0xff]  ;;  %v37_v26 = vld [vmem:[#allocation2 + $0x70] sm:$0xff] }
  0x17   :  { %2080 = vst [vmem:[#allocation5 + $0x48] sm:$0xff] %v1056_v21  ;;  %2081 = vst [vmem:[#allocation5 + $0x50] sm:$0xff] %v1057_v22  ;;  %v1059_v27 = vmul.f32 0.23570226, %v35_v24  ;;  %v1060_v28 = vmul.f32 0.23570226, %v36_v25 }
  0x18   :  { %2082 = vst [vmem:[#allocation5 + $0x58] sm:$0xff] %v1058_v23  ;;  %v1061_v29 = vmul.f32 0.23570226, %v37_v26  ;;  %v38_v30 = vld [vmem:[#allocation2 + $0x78] sm:$0xff]  ;;  %v39_v31 = vld [vmem:[#allocation2 + $0x80] sm:$0xff]  ;;  %v40_v32 = vld [vmem:[#allocation2 + $0x88] sm:$0xff] }
  0x19   :  { %2083 = vst [vmem:[#allocation5 + $0x60] sm:$0xff] %v1059_v27  ;;  %2084 = vst [vmem:[#allocation5 + $0x68] sm:$0xff] %v1060_v28  ;;  %v1062_v33 = vmul.f32 0.23570226, %v38_v30  ;;  %v1063_v34 = vmul.f32 0.23570226, %v39_v31 }
  0x1a   :  { %2085 = vst [vmem:[#allocation5 + $0x70] sm:$0xff] %v1061_v29  ;;  %v1064_v35 = vmul.f32 0.23570226, %v40_v32  ;;  %v41_v36 = vld [vmem:[#allocation2 + $0x90] sm:$0xff]  ;;  %v42_v37 = vld [vmem:[#allocation2 + $0x98] sm:$0xff]  ;;  %v43_v38 = vld [vmem:[#allocation2 + $0xa0] sm:$0xff] }
  0x1b   :  { %2086 = vst [vmem:[#allocation5 + $0x78] sm:$0xff] %v1062_v33  ;;  %2087 = vst [vmem:[#allocation5 + $0x80] sm:$0xff] %v1063_v34  ;;  %v1065_v39 = vmul.f32 0.23570226, %v41_v36  ;;  %v1066_v40 = vmul.f32 0.23570226, %v42_v37 }
  0x1c   :  { %2088 = vst [vmem:[#allocation5 + $0x88] sm:$0xff] %v1064_v35  ;;  %v1067_v41 = vmul.f32 0.23570226, %v43_v38  ;;  %v44_v42 = vld [vmem:[#allocation2 + $0xa8] sm:$0xff]  ;;  %v45_v43 = vld [vmem:[#allocation2 + $0xb0] sm:$0xff]  ;;  %v46_v44 = vld [vmem:[#allocation2 + $0xb8] sm:$0xff] }
  0x1d   :  { %2089 = vst [vmem:[#allocation5 + $0x90] sm:$0xff] %v1065_v39  ;;  %2090 = vst [vmem:[#allocation5 + $0x98] sm:$0xff] %v1066_v40  ;;  %v1068_v45 = vmul.f32 0.23570226, %v44_v42  ;;  %v1069_v46 = vmul.f32 0.23570226, %v45_v43 }
  0x1e   :  { %2091 = vst [vmem:[#allocation5 + $0xa0] sm:$0xff] %v1067_v41  ;;  %v1070_v47 = vmul.f32 0.23570226, %v46_v44  ;;  %v47_v48 = vld [vmem:[#allocation2 + $0xc0] sm:$0xff]  ;;  %v48_v49 = vld [vmem:[#allocation2 + $0xc8] sm:$0xff]  ;;  %v49_v50 = vld [vmem:[#allocation2 + $0xd0] sm:$0xff] }
  0x1f   :  { %2092 = vst [vmem:[#allocation5 + $0xa8] sm:$0xff] %v1068_v45  ;;  %2093 = vst [vmem:[#allocation5 + $0xb0] sm:$0xff] %v1069_v46  ;;  %v1071_v51 = vmul.f32 0.23570226, %v47_v48  ;;  %v1072_v52 = vmul.f32 0.23570226, %v48_v49 }
  0x20   :  { %2094 = vst [vmem:[#allocation5 + $0xb8] sm:$0xff] %v1070_v47  ;;  %v1073_v53 = vmul.f32 0.23570226, %v49_v50  ;;  %v50_v54 = vld [vmem:[#allocation2 + $0xd8] sm:$0xff]  ;;  %v51_v55 = vld [vmem:[#allocation2 + $0xe0] sm:$0xff]  ;;  %v52_v56 = vld [vmem:[#allocation2 + $0xe8] sm:$0xff] }
  0x21   :  { %2095 = vst [vmem:[#allocation5 + $0xc0] sm:$0xff] %v1071_v51  ;;  %2096 = vst [vmem:[#allocation5 + $0xc8] sm:$0xff] %v1072_v52  ;;  %v1074_v57 = vmul.f32 0.23570226, %v50_v54  ;;  %v1075_v58 = vmul.f32 0.23570226, %v51_v55 }
  0x22   :  { %2097 = vst [vmem:[#allocation5 + $0xd0] sm:$0xff] %v1073_v53  ;;  %v1076_v59 = vmul.f32 0.23570226, %v52_v56  ;;  %v53_v60 = vld [vmem:[#allocation2 + $0xf0] sm:$0xff]  ;;  %v54_v61 = vld [vmem:[#allocation2 + $0xf8] sm:$0xff]  ;;  %v55_v62 = vld [vmem:[#allocation2 + $0x100] sm:$0xff] }
  0x23   :  { %2098 = vst [vmem:[#allocation5 + $0xd8] sm:$0xff] %v1074_v57  ;;  %2099 = vst [vmem:[#allocation5 + $0xe0] sm:$0xff] %v1075_v58  ;;  %v1077_v63 = vmul.f32 0.23570226, %v53_v60  ;;  %v1078_v0 = vmul.f32 0.23570226, %v54_v61 }
  0x24   :  { %2100 = vst [vmem:[#allocation5 + $0xe8] sm:$0xff] %v1076_v59  ;;  %v1079_v1 = vmul.f32 0.23570226, %v55_v62  ;;  %v56_v2 = vld [vmem:[#allocation2 + $0x108] sm:$0xff]  ;;  %v57_v3 = vld [vmem:[#allocation2 + $0x110] sm:$0xff]  ;;  %v58_v4 = vld [vmem:[#allocation2 + $0x118] sm:$0xff] }
  0x25   :  { %2101 = vst [vmem:[#allocation5 + $0xf0] sm:$0xff] %v1077_v63  ;;  %2102 = vst [vmem:[#allocation5 + $0xf8] sm:$0xff] %v1078_v0  ;;  %v1080_v5 = vmul.f32 0.23570226, %v56_v2  ;;  %v1081_v6 = vmul.f32 0.23570226, %v57_v3 }
  0x26   :  { %2103 = vst [vmem:[#allocation5 + $0x100] sm:$0xff] %v1079_v1  ;;  %v1082_v7 = vmul.f32 0.23570226, %v58_v4  ;;  %v59_v8 = vld [vmem:[#allocation2 + $0x120] sm:$0xff]  ;;  %v60_v9 = vld [vmem:[#allocation2 + $0x128] sm:$0xff]  ;;  %v61_v10 = vld [vmem:[#allocation2 + $0x130] sm:$0xff] }
  0x27   :  { %2104 = vst [vmem:[#allocation5 + $0x108] sm:$0xff] %v1080_v5  ;;  %2105 = vst [vmem:[#allocation5 + $0x110] sm:$0xff] %v1081_v6  ;;  %v1083_v11 = vmul.f32 0.23570226, %v59_v8  ;;  %v1084_v12 = vmul.f32 0.23570226, %v60_v9 }
  0x28   :  { %2106 = vst [vmem:[#allocation5 + $0x118] sm:$0xff] %v1082_v7  ;;  %v1085_v13 = vmul.f32 0.23570226, %v61_v10  ;;  %v62_v14 = vld [vmem:[#allocation2 + $0x138] sm:$0xff]  ;;  %v63_v15 = vld [vmem:[#allocation2 + $0x140] sm:$0xff]  ;;  %v64_v16 = vld [vmem:[#allocation2 + $0x148] sm:$0xff] }
  0x29   :  { %2107 = vst [vmem:[#allocation5 + $0x120] sm:$0xff] %v1083_v11  ;;  %2108 = vst [vmem:[#allocation5 + $0x128] sm:$0xff] %v1084_v12  ;;  %v1086_v17 = vmul.f32 0.23570226, %v62_v14  ;;  %v1087_v18 = vmul.f32 0.23570226, %v63_v15 }
  0x2a   :  { %2109 = vst [vmem:[#allocation5 + $0x130] sm:$0xff] %v1085_v13  ;;  %v1088_v19 = vmul.f32 0.23570226, %v64_v16  ;;  %v65_v20 = vld [vmem:[#allocation2 + $0x150] sm:$0xff]  ;;  %v66_v21 = vld [vmem:[#allocation2 + $0x158] sm:$0xff]  ;;  %v67_v22 = vld [vmem:[#allocation2 + $0x160] sm:$0xff] }
  0x2b   :  { %2110 = vst [vmem:[#allocation5 + $0x138] sm:$0xff] %v1086_v17  ;;  %2111 = vst [vmem:[#allocation5 + $0x140] sm:$0xff] %v1087_v18  ;;  %v1089_v23 = vmul.f32 0.23570226, %v65_v20  ;;  %v1090_v24 = vmul.f32 0.23570226, %v66_v21 }
  0x2c   :  { %2112 = vst [vmem:[#allocation5 + $0x148] sm:$0xff] %v1088_v19  ;;  %v1091_v25 = vmul.f32 0.23570226, %v67_v22  ;;  %v68_v26 = vld [vmem:[#allocation2 + $0x168] sm:$0xff]  ;;  %v69_v27 = vld [vmem:[#allocation2 + $0x170] sm:$0xff]  ;;  %v70_v28 = vld [vmem:[#allocation2 + $0x178] sm:$0xff] }
  0x2d   :  { %2113 = vst [vmem:[#allocation5 + $0x150] sm:$0xff] %v1089_v23  ;;  %2114 = vst [vmem:[#allocation5 + $0x158] sm:$0xff] %v1090_v24  ;;  %v1092_v29 = vmul.f32 0.23570226, %v68_v26  ;;  %v1093_v30 = vmul.f32 0.23570226, %v69_v27 }
  0x2e   :  { %2115 = vst [vmem:[#allocation5 + $0x160] sm:$0xff] %v1091_v25  ;;  %v1094_v31 = vmul.f32 0.23570226, %v70_v28  ;;  %v71_v32 = vld [vmem:[#allocation2 + $0x180] sm:$0xff]  ;;  %v72_v33 = vld [vmem:[#allocation2 + $0x188] sm:$0xff]  ;;  %v73_v34 = vld [vmem:[#allocation2 + $0x190] sm:$0xff] }
  0x2f   :  { %2116 = vst [vmem:[#allocation5 + $0x168] sm:$0xff] %v1092_v29  ;;  %2117 = vst [vmem:[#allocation5 + $0x170] sm:$0xff] %v1093_v30  ;;  %v1095_v35 = vmul.f32 0.23570226, %v71_v32  ;;  %v1096_v36 = vmul.f32 0.23570226, %v72_v33 }
  0x30   :  { %2118 = vst [vmem:[#allocation5 + $0x178] sm:$0xff] %v1094_v31  ;;  %v1097_v37 = vmul.f32 0.23570226, %v73_v34  ;;  %v74_v38 = vld [vmem:[#allocation2 + $0x198] sm:$0xff]  ;;  %v75_v39 = vld [vmem:[#allocation2 + $0x1a0] sm:$0xff]  ;;  %v76_v40 = vld [vmem:[#allocation2 + $0x1a8] sm:$0xff] }
  0x31   :  { %2119 = vst [vmem:[#allocation5 + $0x180] sm:$0xff] %v1095_v35  ;;  %2120 = vst [vmem:[#allocation5 + $0x188] sm:$0xff] %v1096_v36  ;;  %v1098_v41 = vmul.f32 0.23570226, %v74_v38  ;;  %v1099_v42 = vmul.f32 0.23570226, %v75_v39 }
  0x32   :  { %2121 = vst [vmem:[#allocation5 + $0x190] sm:$0xff] %v1097_v37  ;;  %v1100_v43 = vmul.f32 0.23570226, %v76_v40  ;;  %v77_v44 = vld [vmem:[#allocation2 + $0x1b0] sm:$0xff]  ;;  %v78_v45 = vld [vmem:[#allocation2 + $0x1b8] sm:$0xff]  ;;  %v79_v46 = vld [vmem:[#allocation2 + $0x1c0] sm:$0xff] }
  0x33   :  { %2122 = vst [vmem:[#allocation5 + $0x198] sm:$0xff] %v1098_v41  ;;  %2123 = vst [vmem:[#allocation5 + $0x1a0] sm:$0xff] %v1099_v42  ;;  %v1101_v47 = vmul.f32 0.23570226, %v77_v44  ;;  %v1102_v48 = vmul.f32 0.23570226, %v78_v45 }
  0x34   :  { %2124 = vst [vmem:[#allocation5 + $0x1a8] sm:$0xff] %v1100_v43  ;;  %v1103_v49 = vmul.f32 0.23570226, %v79_v46  ;;  %v80_v50 = vld [vmem:[#allocation2 + $0x1c8] sm:$0xff]  ;;  %v81_v51 = vld [vmem:[#allocation2 + $0x1d0] sm:$0xff]  ;;  %v82_v52 = vld [vmem:[#allocation2 + $0x1d8] sm:$0xff] }
  0x35   :  { %2125 = vst [vmem:[#allocation5 + $0x1b0] sm:$0xff] %v1101_v47  ;;  %2126 = vst [vmem:[#allocation5 + $0x1b8] sm:$0xff] %v1102_v48  ;;  %v1104_v53 = vmul.f32 0.23570226, %v80_v50  ;;  %v1105_v54 = vmul.f32 0.23570226, %v81_v51 }
  0x36   :  { %2127 = vst [vmem:[#allocation5 + $0x1c0] sm:$0xff] %v1103_v49  ;;  %v1106_v55 = vmul.f32 0.23570226, %v82_v52  ;;  %v83_v56 = vld [vmem:[#allocation2 + $0x1e0] sm:$0xff]  ;;  %v84_v57 = vld [vmem:[#allocation2 + $0x1e8] sm:$0xff]  ;;  %v85_v58 = vld [vmem:[#allocation2 + $0x1f0] sm:$0xff] }
  0x37   :  { %2128 = vst [vmem:[#allocation5 + $0x1c8] sm:$0xff] %v1104_v53  ;;  %2129 = vst [vmem:[#allocation5 + $0x1d0] sm:$0xff] %v1105_v54  ;;  %v1107_v59 = vmul.f32 0.23570226, %v83_v56  ;;  %v1108_v60 = vmul.f32 0.23570226, %v84_v57 }
  0x38   :  { %2130 = vst [vmem:[#allocation5 + $0x1d8] sm:$0xff] %v1106_v55  ;;  %v1109_v61 = vmul.f32 0.23570226, %v85_v58  ;;  %v86_v62 = vld [vmem:[#allocation2 + $0x1f8] sm:$0xff]  ;;  %v87_v63 = vld [vmem:[#allocation2 + $0x200] sm:$0xff]  ;;  %v88_v0 = vld [vmem:[#allocation2 + $0x208] sm:$0xff] }
  0x39   :  { %2131 = vst [vmem:[#allocation5 + $0x1e0] sm:$0xff] %v1107_v59  ;;  %2132 = vst [vmem:[#allocation5 + $0x1e8] sm:$0xff] %v1108_v60  ;;  %v1110_v1 = vmul.f32 0.23570226, %v86_v62  ;;  %v1111_v2 = vmul.f32 0.23570226, %v87_v63 }
  0x3a   :  { %2133 = vst [vmem:[#allocation5 + $0x1f0] sm:$0xff] %v1109_v61  ;;  %v1112_v3 = vmul.f32 0.23570226, %v88_v0  ;;  %v89_v4 = vld [vmem:[#allocation2 + $0x210] sm:$0xff]  ;;  %v90_v5 = vld [vmem:[#allocation2 + $0x218] sm:$0xff]  ;;  %v91_v6 = vld [vmem:[#allocation2 + $0x220] sm:$0xff] }
  0x3b   :  { %2134 = vst [vmem:[#allocation5 + $0x1f8] sm:$0xff] %v1110_v1  ;;  %2135 = vst [vmem:[#allocation5 + $0x200] sm:$0xff] %v1111_v2  ;;  %v1113_v7 = vmul.f32 0.23570226, %v89_v4  ;;  %v1114_v8 = vmul.f32 0.23570226, %v90_v5 }
  0x3c   :  { %2136 = vst [vmem:[#allocation5 + $0x208] sm:$0xff] %v1112_v3  ;;  %v1115_v9 = vmul.f32 0.23570226, %v91_v6  ;;  %v92_v10 = vld [vmem:[#allocation2 + $0x228] sm:$0xff]  ;;  %v93_v11 = vld [vmem:[#allocation2 + $0x230] sm:$0xff]  ;;  %v94_v12 = vld [vmem:[#allocation2 + $0x238] sm:$0xff] }
  0x3d   :  { %2137 = vst [vmem:[#allocation5 + $0x210] sm:$0xff] %v1113_v7  ;;  %2138 = vst [vmem:[#allocation5 + $0x218] sm:$0xff] %v1114_v8  ;;  %v1116_v13 = vmul.f32 0.23570226, %v92_v10  ;;  %v1117_v14 = vmul.f32 0.23570226, %v93_v11 }
  0x3e   :  { %2139 = vst [vmem:[#allocation5 + $0x220] sm:$0xff] %v1115_v9  ;;  %v1118_v15 = vmul.f32 0.23570226, %v94_v12  ;;  %v95_v16 = vld [vmem:[#allocation2 + $0x240] sm:$0xff]  ;;  %v96_v17 = vld [vmem:[#allocation2 + $0x248] sm:$0xff]  ;;  %v97_v18 = vld [vmem:[#allocation2 + $0x250] sm:$0xff] }
  0x3f   :  { %2140 = vst [vmem:[#allocation5 + $0x228] sm:$0xff] %v1116_v13  ;;  %2141 = vst [vmem:[#allocation5 + $0x230] sm:$0xff] %v1117_v14  ;;  %v1119_v19 = vmul.f32 0.23570226, %v95_v16  ;;  %v1120_v20 = vmul.f32 0.23570226, %v96_v17 }
  0x40   :  { %2142 = vst [vmem:[#allocation5 + $0x238] sm:$0xff] %v1118_v15  ;;  %v1121_v21 = vmul.f32 0.23570226, %v97_v18  ;;  %v98_v22 = vld [vmem:[#allocation2 + $0x258] sm:$0xff]  ;;  %v99_v23 = vld [vmem:[#allocation2 + $0x260] sm:$0xff]  ;;  %v100_v24 = vld [vmem:[#allocation2 + $0x268] sm:$0xff] }
  0x41   :  { %2143 = vst [vmem:[#allocation5 + $0x240] sm:$0xff] %v1119_v19  ;;  %2144 = vst [vmem:[#allocation5 + $0x248] sm:$0xff] %v1120_v20  ;;  %v1122_v25 = vmul.f32 0.23570226, %v98_v22  ;;  %v1123_v26 = vmul.f32 0.23570226, %v99_v23 }
  0x42   :  { %2145 = vst [vmem:[#allocation5 + $0x250] sm:$0xff] %v1121_v21  ;;  %v1124_v27 = vmul.f32 0.23570226, %v100_v24  ;;  %v101_v28 = vld [vmem:[#allocation2 + $0x270] sm:$0xff]  ;;  %v102_v29 = vld [vmem:[#allocation2 + $0x278] sm:$0xff]  ;;  %v103_v30 = vld [vmem:[#allocation2 + $0x280] sm:$0xff] }
  0x43   :  { %2146 = vst [vmem:[#allocation5 + $0x258] sm:$0xff] %v1122_v25  ;;  %2147 = vst [vmem:[#allocation5 + $0x260] sm:$0xff] %v1123_v26  ;;  %v1125_v31 = vmul.f32 0.23570226, %v101_v28  ;;  %v1126_v32 = vmul.f32 0.23570226, %v102_v29 }
  0x44   :  { %2148 = vst [vmem:[#allocation5 + $0x268] sm:$0xff] %v1124_v27  ;;  %v1127_v33 = vmul.f32 0.23570226, %v103_v30  ;;  %v104_v34 = vld [vmem:[#allocation2 + $0x288] sm:$0xff]  ;;  %v105_v35 = vld [vmem:[#allocation2 + $0x290] sm:$0xff]  ;;  %v106_v36 = vld [vmem:[#allocation2 + $0x298] sm:$0xff] }
  0x45   :  { %2149 = vst [vmem:[#allocation5 + $0x270] sm:$0xff] %v1125_v31  ;;  %2150 = vst [vmem:[#allocation5 + $0x278] sm:$0xff] %v1126_v32  ;;  %v1128_v37 = vmul.f32 0.23570226, %v104_v34  ;;  %v1129_v38 = vmul.f32 0.23570226, %v105_v35 }
  0x46   :  { %2151 = vst [vmem:[#allocation5 + $0x280] sm:$0xff] %v1127_v33  ;;  %v1130_v39 = vmul.f32 0.23570226, %v106_v36  ;;  %v107_v40 = vld [vmem:[#allocation2 + $0x2a0] sm:$0xff]  ;;  %v108_v41 = vld [vmem:[#allocation2 + $0x2a8] sm:$0xff]  ;;  %v109_v42 = vld [vmem:[#allocation2 + $0x2b0] sm:$0xff] }
  0x47   :  { %2152 = vst [vmem:[#allocation5 + $0x288] sm:$0xff] %v1128_v37  ;;  %2153 = vst [vmem:[#allocation5 + $0x290] sm:$0xff] %v1129_v38  ;;  %v1131_v43 = vmul.f32 0.23570226, %v107_v40  ;;  %v1132_v44 = vmul.f32 0.23570226, %v108_v41 }
  0x48   :  { %2154 = vst [vmem:[#allocation5 + $0x298] sm:$0xff] %v1130_v39  ;;  %v1133_v45 = vmul.f32 0.23570226, %v109_v42  ;;  %v110_v46 = vld [vmem:[#allocation2 + $0x2b8] sm:$0xff]  ;;  %v111_v47 = vld [vmem:[#allocation2 + $0x2c0] sm:$0xff]  ;;  %v112_v48 = vld [vmem:[#allocation2 + $0x2c8] sm:$0xff] }
  0x49   :  { %2155 = vst [vmem:[#allocation5 + $0x2a0] sm:$0xff] %v1131_v43  ;;  %2156 = vst [vmem:[#allocation5 + $0x2a8] sm:$0xff] %v1132_v44  ;;  %v1134_v49 = vmul.f32 0.23570226, %v110_v46  ;;  %v1135_v50 = vmul.f32 0.23570226, %v111_v47 }
  0x4a   :  { %2157 = vst [vmem:[#allocation5 + $0x2b0] sm:$0xff] %v1133_v45  ;;  %v1136_v51 = vmul.f32 0.23570226, %v112_v48  ;;  %v113_v52 = vld [vmem:[#allocation2 + $0x2d0] sm:$0xff]  ;;  %v114_v53 = vld [vmem:[#allocation2 + $0x2d8] sm:$0xff]  ;;  %v115_v54 = vld [vmem:[#allocation2 + $0x2e0] sm:$0xff] }
  0x4b   :  { %2158 = vst [vmem:[#allocation5 + $0x2b8] sm:$0xff] %v1134_v49  ;;  %2159 = vst [vmem:[#allocation5 + $0x2c0] sm:$0xff] %v1135_v50  ;;  %v1137_v55 = vmul.f32 0.23570226, %v113_v52  ;;  %v1138_v56 = vmul.f32 0.23570226, %v114_v53 }
  0x4c   :  { %2160 = vst [vmem:[#allocation5 + $0x2c8] sm:$0xff] %v1136_v51  ;;  %v1139_v57 = vmul.f32 0.23570226, %v115_v54  ;;  %v116_v58 = vld [vmem:[#allocation2 + $0x2e8] sm:$0xff]  ;;  %v117_v59 = vld [vmem:[#allocation2 + $0x2f0] sm:$0xff]  ;;  %v118_v60 = vld [vmem:[#allocation2 + $0x2f8] sm:$0xff] }
  0x4d   :  { %2161 = vst [vmem:[#allocation5 + $0x2d0] sm:$0xff] %v1137_v55  ;;  %2162 = vst [vmem:[#allocation5 + $0x2d8] sm:$0xff] %v1138_v56  ;;  %v1140_v61 = vmul.f32 0.23570226, %v116_v58  ;;  %v1141_v62 = vmul.f32 0.23570226, %v117_v59 }
  0x4e   :  { %2163 = vst [vmem:[#allocation5 + $0x2e0] sm:$0xff] %v1139_v57  ;;  %v1142_v63 = vmul.f32 0.23570226, %v118_v60  ;;  %v119_v0 = vld [vmem:[#allocation2 + $0x300] sm:$0xff]  ;;  %v120_v1 = vld [vmem:[#allocation2 + $0x308] sm:$0xff]  ;;  %v121_v2 = vld [vmem:[#allocation2 + $0x310] sm:$0xff] }
  0x4f   :  { %2164 = vst [vmem:[#allocation5 + $0x2e8] sm:$0xff] %v1140_v61  ;;  %2165 = vst [vmem:[#allocation5 + $0x2f0] sm:$0xff] %v1141_v62  ;;  %v1143_v3 = vmul.f32 0.23570226, %v119_v0  ;;  %v1144_v4 = vmul.f32 0.23570226, %v120_v1 }
  0x50   :  { %2166 = vst [vmem:[#allocation5 + $0x2f8] sm:$0xff] %v1142_v63  ;;  %v1145_v5 = vmul.f32 0.23570226, %v121_v2  ;;  %v122_v6 = vld [vmem:[#allocation2 + $0x318] sm:$0xff]  ;;  %v123_v7 = vld [vmem:[#allocation2 + $0x320] sm:$0xff]  ;;  %v124_v8 = vld [vmem:[#allocation2 + $0x328] sm:$0xff] }
  0x51   :  { %2167 = vst [vmem:[#allocation5 + $0x300] sm:$0xff] %v1143_v3  ;;  %2168 = vst [vmem:[#allocation5 + $0x308] sm:$0xff] %v1144_v4  ;;  %v1146_v9 = vmul.f32 0.23570226, %v122_v6  ;;  %v1147_v10 = vmul.f32 0.23570226, %v123_v7 }
  0x52   :  { %2169 = vst [vmem:[#allocation5 + $0x310] sm:$0xff] %v1145_v5  ;;  %v1148_v11 = vmul.f32 0.23570226, %v124_v8  ;;  %v125_v12 = vld [vmem:[#allocation2 + $0x330] sm:$0xff]  ;;  %v126_v13 = vld [vmem:[#allocation2 + $0x338] sm:$0xff]  ;;  %v127_v14 = vld [vmem:[#allocation2 + $0x340] sm:$0xff] }
  0x53   :  { %2170 = vst [vmem:[#allocation5 + $0x318] sm:$0xff] %v1146_v9  ;;  %2171 = vst [vmem:[#allocation5 + $0x320] sm:$0xff] %v1147_v10  ;;  %v1149_v15 = vmul.f32 0.23570226, %v125_v12  ;;  %v1150_v16 = vmul.f32 0.23570226, %v126_v13 }
  0x54   :  { %2172 = vst [vmem:[#allocation5 + $0x328] sm:$0xff] %v1148_v11  ;;  %v1151_v17 = vmul.f32 0.23570226, %v127_v14  ;;  %v128_v18 = vld [vmem:[#allocation2 + $0x348] sm:$0xff]  ;;  %v129_v19 = vld [vmem:[#allocation2 + $0x350] sm:$0xff]  ;;  %v130_v20 = vld [vmem:[#allocation2 + $0x358] sm:$0xff] }
  0x55   :  { %2173 = vst [vmem:[#allocation5 + $0x330] sm:$0xff] %v1149_v15  ;;  %2174 = vst [vmem:[#allocation5 + $0x338] sm:$0xff] %v1150_v16  ;;  %v1152_v21 = vmul.f32 0.23570226, %v128_v18  ;;  %v1153_v22 = vmul.f32 0.23570226, %v129_v19 }
  0x56   :  { %2175 = vst [vmem:[#allocation5 + $0x340] sm:$0xff] %v1151_v17  ;;  %v1154_v23 = vmul.f32 0.23570226, %v130_v20  ;;  %v131_v24 = vld [vmem:[#allocation2 + $0x360] sm:$0xff]  ;;  %v132_v25 = vld [vmem:[#allocation2 + $0x368] sm:$0xff]  ;;  %v133_v26 = vld [vmem:[#allocation2 + $0x370] sm:$0xff] }
  0x57   :  { %2176 = vst [vmem:[#allocation5 + $0x348] sm:$0xff] %v1152_v21  ;;  %2177 = vst [vmem:[#allocation5 + $0x350] sm:$0xff] %v1153_v22  ;;  %v1155_v27 = vmul.f32 0.23570226, %v131_v24  ;;  %v1156_v28 = vmul.f32 0.23570226, %v132_v25 }
  0x58   :  { %2178 = vst [vmem:[#allocation5 + $0x358] sm:$0xff] %v1154_v23  ;;  %v1157_v29 = vmul.f32 0.23570226, %v133_v26  ;;  %v134_v30 = vld [vmem:[#allocation2 + $0x378] sm:$0xff]  ;;  %v135_v31 = vld [vmem:[#allocation2 + $0x380] sm:$0xff]  ;;  %v136_v32 = vld [vmem:[#allocation2 + $0x388] sm:$0xff] }
  0x59   :  { %2179 = vst [vmem:[#allocation5 + $0x360] sm:$0xff] %v1155_v27  ;;  %2180 = vst [vmem:[#allocation5 + $0x368] sm:$0xff] %v1156_v28  ;;  %v1158_v33 = vmul.f32 0.23570226, %v134_v30  ;;  %v1159_v34 = vmul.f32 0.23570226, %v135_v31 }
  0x5a   :  { %2181 = vst [vmem:[#allocation5 + $0x370] sm:$0xff] %v1157_v29  ;;  %v1160_v35 = vmul.f32 0.23570226, %v136_v32  ;;  %v137_v36 = vld [vmem:[#allocation2 + $0x390] sm:$0xff]  ;;  %v138_v37 = vld [vmem:[#allocation2 + $0x398] sm:$0xff]  ;;  %v139_v38 = vld [vmem:[#allocation2 + $0x3a0] sm:$0xff] }
  0x5b   :  { %2182 = vst [vmem:[#allocation5 + $0x378] sm:$0xff] %v1158_v33  ;;  %2183 = vst [vmem:[#allocation5 + $0x380] sm:$0xff] %v1159_v34  ;;  %v1161_v39 = vmul.f32 0.23570226, %v137_v36  ;;  %v1162_v40 = vmul.f32 0.23570226, %v138_v37 }
  0x5c   :  { %2184 = vst [vmem:[#allocation5 + $0x388] sm:$0xff] %v1160_v35  ;;  %v1163_v41 = vmul.f32 0.23570226, %v139_v38  ;;  %v140_v42 = vld [vmem:[#allocation2 + $0x3a8] sm:$0xff]  ;;  %v141_v43 = vld [vmem:[#allocation2 + $0x3b0] sm:$0xff]  ;;  %v142_v44 = vld [vmem:[#allocation2 + $0x3b8] sm:$0xff] }
  0x5d   :  { %2185 = vst [vmem:[#allocation5 + $0x390] sm:$0xff] %v1161_v39  ;;  %2186 = vst [vmem:[#allocation5 + $0x398] sm:$0xff] %v1162_v40  ;;  %v1164_v45 = vmul.f32 0.23570226, %v140_v42  ;;  %v1165_v46 = vmul.f32 0.23570226, %v141_v43 }
  0x5e   :  { %2187 = vst [vmem:[#allocation5 + $0x3a0] sm:$0xff] %v1163_v41  ;;  %v1166_v47 = vmul.f32 0.23570226, %v142_v44  ;;  %v143_v48 = vld [vmem:[#allocation2 + $0x3c0] sm:$0xff]  ;;  %v144_v49 = vld [vmem:[#allocation2 + $0x3c8] sm:$0xff]  ;;  %v145_v50 = vld [vmem:[#allocation2 + $0x3d0] sm:$0xff] }
  0x5f   :  { %2188 = vst [vmem:[#allocation5 + $0x3a8] sm:$0xff] %v1164_v45  ;;  %2189 = vst [vmem:[#allocation5 + $0x3b0] sm:$0xff] %v1165_v46  ;;  %v1167_v51 = vmul.f32 0.23570226, %v143_v48  ;;  %v1168_v52 = vmul.f32 0.23570226, %v144_v49 }
  0x60   :  { %2190 = vst [vmem:[#allocation5 + $0x3b8] sm:$0xff] %v1166_v47  ;;  %v1169_v53 = vmul.f32 0.23570226, %v145_v50  ;;  %v146_v54 = vld [vmem:[#allocation2 + $0x3d8] sm:$0xff]  ;;  %v147_v55 = vld [vmem:[#allocation2 + $0x3e0] sm:$0xff]  ;;  %v148_v56 = vld [vmem:[#allocation2 + $0x3e8] sm:$0xff] }
  0x61   :  { %2191 = vst [vmem:[#allocation5 + $0x3c0] sm:$0xff] %v1167_v51  ;;  %2192 = vst [vmem:[#allocation5 + $0x3c8] sm:$0xff] %v1168_v52  ;;  %v1170_v57 = vmul.f32 0.23570226, %v146_v54  ;;  %v1171_v58 = vmul.f32 0.23570226, %v147_v55 }
  0x62   :  { %2193 = vst [vmem:[#allocation5 + $0x3d0] sm:$0xff] %v1169_v53  ;;  %v1172_v59 = vmul.f32 0.23570226, %v148_v56  ;;  %v149_v60 = vld [vmem:[#allocation2 + $0x3f0] sm:$0xff]  ;;  %v150_v61 = vld [vmem:[#allocation2 + $0x3f8] sm:$0xff]  ;;  %v151_v62 = vld [vmem:[#allocation2 + $0x400] sm:$0xff] }
  0x63   :  { %2194 = vst [vmem:[#allocation5 + $0x3d8] sm:$0xff] %v1170_v57  ;;  %2195 = vst [vmem:[#allocation5 + $0x3e0] sm:$0xff] %v1171_v58  ;;  %v1173_v63 = vmul.f32 0.23570226, %v149_v60  ;;  %v1174_v0 = vmul.f32 0.23570226, %v150_v61 }
  0x64   :  { %2196 = vst [vmem:[#allocation5 + $0x3e8] sm:$0xff] %v1172_v59  ;;  %v1175_v1 = vmul.f32 0.23570226, %v151_v62  ;;  %v152_v2 = vld [vmem:[#allocation2 + $0x408] sm:$0xff]  ;;  %v153_v3 = vld [vmem:[#allocation2 + $0x410] sm:$0xff]  ;;  %v154_v4 = vld [vmem:[#allocation2 + $0x418] sm:$0xff] }
  0x65   :  { %2197 = vst [vmem:[#allocation5 + $0x3f0] sm:$0xff] %v1173_v63  ;;  %2198 = vst [vmem:[#allocation5 + $0x3f8] sm:$0xff] %v1174_v0  ;;  %v1176_v5 = vmul.f32 0.23570226, %v152_v2  ;;  %v1177_v6 = vmul.f32 0.23570226, %v153_v3 }
  0x66   :  { %2199 = vst [vmem:[#allocation5 + $0x400] sm:$0xff] %v1175_v1  ;;  %v1178_v7 = vmul.f32 0.23570226, %v154_v4  ;;  %v155_v8 = vld [vmem:[#allocation2 + $0x420] sm:$0xff]  ;;  %v156_v9 = vld [vmem:[#allocation2 + $0x428] sm:$0xff]  ;;  %v157_v10 = vld [vmem:[#allocation2 + $0x430] sm:$0xff] }
  0x67   :  { %2200 = vst [vmem:[#allocation5 + $0x408] sm:$0xff] %v1176_v5  ;;  %2201 = vst [vmem:[#allocation5 + $0x410] sm:$0xff] %v1177_v6  ;;  %v1179_v11 = vmul.f32 0.23570226, %v155_v8  ;;  %v1180_v12 = vmul.f32 0.23570226, %v156_v9 }
  0x68   :  { %2202 = vst [vmem:[#allocation5 + $0x418] sm:$0xff] %v1178_v7  ;;  %v1181_v13 = vmul.f32 0.23570226, %v157_v10  ;;  %v158_v14 = vld [vmem:[#allocation2 + $0x438] sm:$0xff]  ;;  %v159_v15 = vld [vmem:[#allocation2 + $0x440] sm:$0xff]  ;;  %v160_v16 = vld [vmem:[#allocation2 + $0x448] sm:$0xff] }
  0x69   :  { %2203 = vst [vmem:[#allocation5 + $0x420] sm:$0xff] %v1179_v11  ;;  %2204 = vst [vmem:[#allocation5 + $0x428] sm:$0xff] %v1180_v12  ;;  %v1182_v17 = vmul.f32 0.23570226, %v158_v14  ;;  %v1183_v18 = vmul.f32 0.23570226, %v159_v15 }
  0x6a   :  { %2205 = vst [vmem:[#allocation5 + $0x430] sm:$0xff] %v1181_v13  ;;  %v1184_v19 = vmul.f32 0.23570226, %v160_v16  ;;  %v161_v20 = vld [vmem:[#allocation2 + $0x450] sm:$0xff]  ;;  %v162_v21 = vld [vmem:[#allocation2 + $0x458] sm:$0xff]  ;;  %v163_v22 = vld [vmem:[#allocation2 + $0x460] sm:$0xff] }
  0x6b   :  { %2206 = vst [vmem:[#allocation5 + $0x438] sm:$0xff] %v1182_v17  ;;  %2207 = vst [vmem:[#allocation5 + $0x440] sm:$0xff] %v1183_v18  ;;  %v1185_v23 = vmul.f32 0.23570226, %v161_v20  ;;  %v1186_v24 = vmul.f32 0.23570226, %v162_v21 }
  0x6c   :  { %2208 = vst [vmem:[#allocation5 + $0x448] sm:$0xff] %v1184_v19  ;;  %v1187_v25 = vmul.f32 0.23570226, %v163_v22  ;;  %v164_v26 = vld [vmem:[#allocation2 + $0x468] sm:$0xff]  ;;  %v165_v27 = vld [vmem:[#allocation2 + $0x470] sm:$0xff]  ;;  %v166_v28 = vld [vmem:[#allocation2 + $0x478] sm:$0xff] }
  0x6d   :  { %2209 = vst [vmem:[#allocation5 + $0x450] sm:$0xff] %v1185_v23  ;;  %2210 = vst [vmem:[#allocation5 + $0x458] sm:$0xff] %v1186_v24  ;;  %v1188_v29 = vmul.f32 0.23570226, %v164_v26  ;;  %v1189_v30 = vmul.f32 0.23570226, %v165_v27 }
  0x6e   :  { %2211 = vst [vmem:[#allocation5 + $0x460] sm:$0xff] %v1187_v25  ;;  %v1190_v31 = vmul.f32 0.23570226, %v166_v28  ;;  %v167_v32 = vld [vmem:[#allocation2 + $0x480] sm:$0xff]  ;;  %v168_v33 = vld [vmem:[#allocation2 + $0x488] sm:$0xff]  ;;  %v169_v34 = vld [vmem:[#allocation2 + $0x490] sm:$0xff] }
  0x6f   :  { %2212 = vst [vmem:[#allocation5 + $0x468] sm:$0xff] %v1188_v29  ;;  %2213 = vst [vmem:[#allocation5 + $0x470] sm:$0xff] %v1189_v30  ;;  %v1191_v35 = vmul.f32 0.23570226, %v167_v32  ;;  %v1192_v36 = vmul.f32 0.23570226, %v168_v33 }
  0x70   :  { %2214 = vst [vmem:[#allocation5 + $0x478] sm:$0xff] %v1190_v31  ;;  %v1193_v37 = vmul.f32 0.23570226, %v169_v34  ;;  %v170_v38 = vld [vmem:[#allocation2 + $0x498] sm:$0xff]  ;;  %v171_v39 = vld [vmem:[#allocation2 + $0x4a0] sm:$0xff]  ;;  %v172_v40 = vld [vmem:[#allocation2 + $0x4a8] sm:$0xff] }
  0x71   :  { %2215 = vst [vmem:[#allocation5 + $0x480] sm:$0xff] %v1191_v35  ;;  %2216 = vst [vmem:[#allocation5 + $0x488] sm:$0xff] %v1192_v36  ;;  %v1194_v41 = vmul.f32 0.23570226, %v170_v38  ;;  %v1195_v42 = vmul.f32 0.23570226, %v171_v39 }
  0x72   :  { %2217 = vst [vmem:[#allocation5 + $0x490] sm:$0xff] %v1193_v37  ;;  %v1196_v43 = vmul.f32 0.23570226, %v172_v40  ;;  %v173_v44 = vld [vmem:[#allocation2 + $0x4b0] sm:$0xff]  ;;  %v174_v45 = vld [vmem:[#allocation2 + $0x4b8] sm:$0xff]  ;;  %v175_v46 = vld [vmem:[#allocation2 + $0x4c0] sm:$0xff] }
  0x73   :  { %2218 = vst [vmem:[#allocation5 + $0x498] sm:$0xff] %v1194_v41  ;;  %2219 = vst [vmem:[#allocation5 + $0x4a0] sm:$0xff] %v1195_v42  ;;  %v1197_v47 = vmul.f32 0.23570226, %v173_v44  ;;  %v1198_v48 = vmul.f32 0.23570226, %v174_v45 }
  0x74   :  { %2220 = vst [vmem:[#allocation5 + $0x4a8] sm:$0xff] %v1196_v43  ;;  %v1199_v49 = vmul.f32 0.23570226, %v175_v46  ;;  %v176_v50 = vld [vmem:[#allocation2 + $0x4c8] sm:$0xff]  ;;  %v177_v51 = vld [vmem:[#allocation2 + $0x4d0] sm:$0xff]  ;;  %v178_v52 = vld [vmem:[#allocation2 + $0x4d8] sm:$0xff] }
  0x75   :  { %2221 = vst [vmem:[#allocation5 + $0x4b0] sm:$0xff] %v1197_v47  ;;  %2222 = vst [vmem:[#allocation5 + $0x4b8] sm:$0xff] %v1198_v48  ;;  %v1200_v53 = vmul.f32 0.23570226, %v176_v50  ;;  %v1201_v54 = vmul.f32 0.23570226, %v177_v51 }
  0x76   :  { %2223 = vst [vmem:[#allocation5 + $0x4c0] sm:$0xff] %v1199_v49  ;;  %v1202_v55 = vmul.f32 0.23570226, %v178_v52  ;;  %v179_v56 = vld [vmem:[#allocation2 + $0x4e0] sm:$0xff]  ;;  %v180_v57 = vld [vmem:[#allocation2 + $0x4e8] sm:$0xff]  ;;  %v181_v58 = vld [vmem:[#allocation2 + $0x4f0] sm:$0xff] }
  0x77   :  { %2224 = vst [vmem:[#allocation5 + $0x4c8] sm:$0xff] %v1200_v53  ;;  %2225 = vst [vmem:[#allocation5 + $0x4d0] sm:$0xff] %v1201_v54  ;;  %v1203_v59 = vmul.f32 0.23570226, %v179_v56  ;;  %v1204_v60 = vmul.f32 0.23570226, %v180_v57 }
  0x78   :  { %2226 = vst [vmem:[#allocation5 + $0x4d8] sm:$0xff] %v1202_v55  ;;  %v1205_v61 = vmul.f32 0.23570226, %v181_v58  ;;  %v182_v62 = vld [vmem:[#allocation2 + $0x4f8] sm:$0xff]  ;;  %v183_v63 = vld [vmem:[#allocation2 + $0x500] sm:$0xff]  ;;  %v184_v0 = vld [vmem:[#allocation2 + $0x508] sm:$0xff] }
  0x79   :  { %2227 = vst [vmem:[#allocation5 + $0x4e0] sm:$0xff] %v1203_v59  ;;  %2228 = vst [vmem:[#allocation5 + $0x4e8] sm:$0xff] %v1204_v60  ;;  %v1206_v1 = vmul.f32 0.23570226, %v182_v62  ;;  %v1207_v2 = vmul.f32 0.23570226, %v183_v63 }
  0x7a   :  { %2229 = vst [vmem:[#allocation5 + $0x4f0] sm:$0xff] %v1205_v61  ;;  %v1208_v3 = vmul.f32 0.23570226, %v184_v0  ;;  %v185_v4 = vld [vmem:[#allocation2 + $0x510] sm:$0xff]  ;;  %v186_v5 = vld [vmem:[#allocation2 + $0x518] sm:$0xff]  ;;  %v187_v6 = vld [vmem:[#allocation2 + $0x520] sm:$0xff] }
  0x7b   :  { %2230 = vst [vmem:[#allocation5 + $0x4f8] sm:$0xff] %v1206_v1  ;;  %2231 = vst [vmem:[#allocation5 + $0x500] sm:$0xff] %v1207_v2  ;;  %v1209_v7 = vmul.f32 0.23570226, %v185_v4  ;;  %v1210_v8 = vmul.f32 0.23570226, %v186_v5 }
  0x7c   :  { %2232 = vst [vmem:[#allocation5 + $0x508] sm:$0xff] %v1208_v3  ;;  %v1211_v9 = vmul.f32 0.23570226, %v187_v6  ;;  %v188_v10 = vld [vmem:[#allocation2 + $0x528] sm:$0xff]  ;;  %v189_v11 = vld [vmem:[#allocation2 + $0x530] sm:$0xff]  ;;  %v190_v12 = vld [vmem:[#allocation2 + $0x538] sm:$0xff] }
  0x7d   :  { %2233 = vst [vmem:[#allocation5 + $0x510] sm:$0xff] %v1209_v7  ;;  %2234 = vst [vmem:[#allocation5 + $0x518] sm:$0xff] %v1210_v8  ;;  %v1212_v13 = vmul.f32 0.23570226, %v188_v10  ;;  %v1213_v14 = vmul.f32 0.23570226, %v189_v11 }
  0x7e   :  { %2235 = vst [vmem:[#allocation5 + $0x520] sm:$0xff] %v1211_v9  ;;  %v1214_v15 = vmul.f32 0.23570226, %v190_v12  ;;  %v191_v16 = vld [vmem:[#allocation2 + $0x540] sm:$0xff]  ;;  %v192_v17 = vld [vmem:[#allocation2 + $0x548] sm:$0xff]  ;;  %v193_v18 = vld [vmem:[#allocation2 + $0x550] sm:$0xff] }
  0x7f   :  { %2236 = vst [vmem:[#allocation5 + $0x528] sm:$0xff] %v1212_v13  ;;  %2237 = vst [vmem:[#allocation5 + $0x530] sm:$0xff] %v1213_v14  ;;  %v1215_v19 = vmul.f32 0.23570226, %v191_v16  ;;  %v1216_v20 = vmul.f32 0.23570226, %v192_v17 }
  0x80   :  { %2238 = vst [vmem:[#allocation5 + $0x538] sm:$0xff] %v1214_v15  ;;  %v1217_v21 = vmul.f32 0.23570226, %v193_v18  ;;  %v194_v22 = vld [vmem:[#allocation2 + $0x558] sm:$0xff]  ;;  %v195_v23 = vld [vmem:[#allocation2 + $0x560] sm:$0xff]  ;;  %v196_v24 = vld [vmem:[#allocation2 + $0x568] sm:$0xff] }
  0x81   :  { %2239 = vst [vmem:[#allocation5 + $0x540] sm:$0xff] %v1215_v19  ;;  %2240 = vst [vmem:[#allocation5 + $0x548] sm:$0xff] %v1216_v20  ;;  %v1218_v25 = vmul.f32 0.23570226, %v194_v22  ;;  %v1219_v26 = vmul.f32 0.23570226, %v195_v23 }
  0x82   :  { %2241 = vst [vmem:[#allocation5 + $0x550] sm:$0xff] %v1217_v21  ;;  %v1220_v27 = vmul.f32 0.23570226, %v196_v24  ;;  %v197_v28 = vld [vmem:[#allocation2 + $0x570] sm:$0xff]  ;;  %v198_v29 = vld [vmem:[#allocation2 + $0x578] sm:$0xff]  ;;  %v199_v30 = vld [vmem:[#allocation2 + $0x580] sm:$0xff] }
  0x83   :  { %2242 = vst [vmem:[#allocation5 + $0x558] sm:$0xff] %v1218_v25  ;;  %2243 = vst [vmem:[#allocation5 + $0x560] sm:$0xff] %v1219_v26  ;;  %v1221_v31 = vmul.f32 0.23570226, %v197_v28  ;;  %v1222_v32 = vmul.f32 0.23570226, %v198_v29 }
  0x84   :  { %2244 = vst [vmem:[#allocation5 + $0x568] sm:$0xff] %v1220_v27  ;;  %v1223_v33 = vmul.f32 0.23570226, %v199_v30  ;;  %v200_v34 = vld [vmem:[#allocation2 + $0x588] sm:$0xff]  ;;  %v201_v35 = vld [vmem:[#allocation2 + $0x590] sm:$0xff]  ;;  %v202_v36 = vld [vmem:[#allocation2 + $0x598] sm:$0xff] }
  0x85   :  { %2245 = vst [vmem:[#allocation5 + $0x570] sm:$0xff] %v1221_v31  ;;  %2246 = vst [vmem:[#allocation5 + $0x578] sm:$0xff] %v1222_v32  ;;  %v1224_v37 = vmul.f32 0.23570226, %v200_v34  ;;  %v1225_v38 = vmul.f32 0.23570226, %v201_v35 }
  0x86   :  { %2247 = vst [vmem:[#allocation5 + $0x580] sm:$0xff] %v1223_v33  ;;  %v1226_v39 = vmul.f32 0.23570226, %v202_v36  ;;  %v203_v40 = vld [vmem:[#allocation2 + $0x5a0] sm:$0xff]  ;;  %v204_v41 = vld [vmem:[#allocation2 + $0x5a8] sm:$0xff]  ;;  %v205_v42 = vld [vmem:[#allocation2 + $0x5b0] sm:$0xff] }
  0x87   :  { %2248 = vst [vmem:[#allocation5 + $0x588] sm:$0xff] %v1224_v37  ;;  %2249 = vst [vmem:[#allocation5 + $0x590] sm:$0xff] %v1225_v38  ;;  %v1227_v43 = vmul.f32 0.23570226, %v203_v40  ;;  %v1228_v44 = vmul.f32 0.23570226, %v204_v41 }
  0x88   :  { %2250 = vst [vmem:[#allocation5 + $0x598] sm:$0xff] %v1226_v39  ;;  %v1229_v45 = vmul.f32 0.23570226, %v205_v42  ;;  %v206_v46 = vld [vmem:[#allocation2 + $0x5b8] sm:$0xff]  ;;  %v207_v47 = vld [vmem:[#allocation2 + $0x5c0] sm:$0xff]  ;;  %v208_v48 = vld [vmem:[#allocation2 + $0x5c8] sm:$0xff] }
  0x89   :  { %2251 = vst [vmem:[#allocation5 + $0x5a0] sm:$0xff] %v1227_v43  ;;  %2252 = vst [vmem:[#allocation5 + $0x5a8] sm:$0xff] %v1228_v44  ;;  %v1230_v49 = vmul.f32 0.23570226, %v206_v46  ;;  %v1231_v50 = vmul.f32 0.23570226, %v207_v47 }
  0x8a   :  { %2253 = vst [vmem:[#allocation5 + $0x5b0] sm:$0xff] %v1229_v45  ;;  %v1232_v51 = vmul.f32 0.23570226, %v208_v48  ;;  %v209_v52 = vld [vmem:[#allocation2 + $0x5d0] sm:$0xff]  ;;  %v210_v53 = vld [vmem:[#allocation2 + $0x5d8] sm:$0xff]  ;;  %v211_v54 = vld [vmem:[#allocation2 + $0x5e0] sm:$0xff] }
  0x8b   :  { %2254 = vst [vmem:[#allocation5 + $0x5b8] sm:$0xff] %v1230_v49  ;;  %2255 = vst [vmem:[#allocation5 + $0x5c0] sm:$0xff] %v1231_v50  ;;  %v1233_v55 = vmul.f32 0.23570226, %v209_v52  ;;  %v1234_v56 = vmul.f32 0.23570226, %v210_v53 }
  0x8c   :  { %2256 = vst [vmem:[#allocation5 + $0x5c8] sm:$0xff] %v1232_v51  ;;  %v1235_v57 = vmul.f32 0.23570226, %v211_v54  ;;  %v212_v58 = vld [vmem:[#allocation2 + $0x5e8] sm:$0xff]  ;;  %v213_v59 = vld [vmem:[#allocation2 + $0x5f0] sm:$0xff]  ;;  %v214_v60 = vld [vmem:[#allocation2 + $0x5f8] sm:$0xff] }
  0x8d   :  { %2257 = vst [vmem:[#allocation5 + $0x5d0] sm:$0xff] %v1233_v55  ;;  %2258 = vst [vmem:[#allocation5 + $0x5d8] sm:$0xff] %v1234_v56  ;;  %v1236_v61 = vmul.f32 0.23570226, %v212_v58  ;;  %v1237_v62 = vmul.f32 0.23570226, %v213_v59 }
  0x8e   :  { %2259 = vst [vmem:[#allocation5 + $0x5e0] sm:$0xff] %v1235_v57  ;;  %v1238_v63 = vmul.f32 0.23570226, %v214_v60  ;;  %v215_v0 = vld [vmem:[#allocation2 + $0x600] sm:$0xff]  ;;  %v216_v1 = vld [vmem:[#allocation2 + $0x608] sm:$0xff]  ;;  %v217_v2 = vld [vmem:[#allocation2 + $0x610] sm:$0xff] }
  0x8f   :  { %2260 = vst [vmem:[#allocation5 + $0x5e8] sm:$0xff] %v1236_v61  ;;  %2261 = vst [vmem:[#allocation5 + $0x5f0] sm:$0xff] %v1237_v62  ;;  %v1239_v3 = vmul.f32 0.23570226, %v215_v0  ;;  %v1240_v4 = vmul.f32 0.23570226, %v216_v1 }
  0x90   :  { %2262 = vst [vmem:[#allocation5 + $0x5f8] sm:$0xff] %v1238_v63  ;;  %v1241_v5 = vmul.f32 0.23570226, %v217_v2  ;;  %v218_v6 = vld [vmem:[#allocation2 + $0x618] sm:$0xff]  ;;  %v219_v7 = vld [vmem:[#allocation2 + $0x620] sm:$0xff]  ;;  %v220_v8 = vld [vmem:[#allocation2 + $0x628] sm:$0xff] }
  0x91   :  { %2263 = vst [vmem:[#allocation5 + $0x600] sm:$0xff] %v1239_v3  ;;  %2264 = vst [vmem:[#allocation5 + $0x608] sm:$0xff] %v1240_v4  ;;  %v1242_v9 = vmul.f32 0.23570226, %v218_v6  ;;  %v1243_v10 = vmul.f32 0.23570226, %v219_v7 }
  0x92   :  { %2265 = vst [vmem:[#allocation5 + $0x610] sm:$0xff] %v1241_v5  ;;  %v1244_v11 = vmul.f32 0.23570226, %v220_v8  ;;  %v221_v12 = vld [vmem:[#allocation2 + $0x630] sm:$0xff]  ;;  %v222_v13 = vld [vmem:[#allocation2 + $0x638] sm:$0xff]  ;;  %v223_v14 = vld [vmem:[#allocation2 + $0x640] sm:$0xff] }
  0x93   :  { %2266 = vst [vmem:[#allocation5 + $0x618] sm:$0xff] %v1242_v9  ;;  %2267 = vst [vmem:[#allocation5 + $0x620] sm:$0xff] %v1243_v10  ;;  %v1245_v15 = vmul.f32 0.23570226, %v221_v12  ;;  %v1246_v16 = vmul.f32 0.23570226, %v222_v13 }
  0x94   :  { %2268 = vst [vmem:[#allocation5 + $0x628] sm:$0xff] %v1244_v11  ;;  %v1247_v17 = vmul.f32 0.23570226, %v223_v14  ;;  %v224_v18 = vld [vmem:[#allocation2 + $0x648] sm:$0xff]  ;;  %v225_v19 = vld [vmem:[#allocation2 + $0x650] sm:$0xff]  ;;  %v226_v20 = vld [vmem:[#allocation2 + $0x658] sm:$0xff] }
  0x95   :  { %2269 = vst [vmem:[#allocation5 + $0x630] sm:$0xff] %v1245_v15  ;;  %2270 = vst [vmem:[#allocation5 + $0x638] sm:$0xff] %v1246_v16  ;;  %v1248_v21 = vmul.f32 0.23570226, %v224_v18  ;;  %v1249_v22 = vmul.f32 0.23570226, %v225_v19 }
  0x96   :  { %2271 = vst [vmem:[#allocation5 + $0x640] sm:$0xff] %v1247_v17  ;;  %v1250_v23 = vmul.f32 0.23570226, %v226_v20  ;;  %v227_v24 = vld [vmem:[#allocation2 + $0x660] sm:$0xff]  ;;  %v228_v25 = vld [vmem:[#allocation2 + $0x668] sm:$0xff]  ;;  %v229_v26 = vld [vmem:[#allocation2 + $0x670] sm:$0xff] }
  0x97   :  { %2272 = vst [vmem:[#allocation5 + $0x648] sm:$0xff] %v1248_v21  ;;  %2273 = vst [vmem:[#allocation5 + $0x650] sm:$0xff] %v1249_v22  ;;  %v1251_v27 = vmul.f32 0.23570226, %v227_v24  ;;  %v1252_v28 = vmul.f32 0.23570226, %v228_v25 }
  0x98   :  { %2274 = vst [vmem:[#allocation5 + $0x658] sm:$0xff] %v1250_v23  ;;  %v1253_v29 = vmul.f32 0.23570226, %v229_v26  ;;  %v230_v30 = vld [vmem:[#allocation2 + $0x678] sm:$0xff]  ;;  %v231_v31 = vld [vmem:[#allocation2 + $0x680] sm:$0xff]  ;;  %v232_v32 = vld [vmem:[#allocation2 + $0x688] sm:$0xff] }
  0x99   :  { %2275 = vst [vmem:[#allocation5 + $0x660] sm:$0xff] %v1251_v27  ;;  %2276 = vst [vmem:[#allocation5 + $0x668] sm:$0xff] %v1252_v28  ;;  %v1254_v33 = vmul.f32 0.23570226, %v230_v30  ;;  %v1255_v34 = vmul.f32 0.23570226, %v231_v31 }
  0x9a   :  { %2277 = vst [vmem:[#allocation5 + $0x670] sm:$0xff] %v1253_v29  ;;  %v1256_v35 = vmul.f32 0.23570226, %v232_v32  ;;  %v233_v36 = vld [vmem:[#allocation2 + $0x690] sm:$0xff]  ;;  %v234_v37 = vld [vmem:[#allocation2 + $0x698] sm:$0xff]  ;;  %v235_v38 = vld [vmem:[#allocation2 + $0x6a0] sm:$0xff] }
  0x9b   :  { %2278 = vst [vmem:[#allocation5 + $0x678] sm:$0xff] %v1254_v33  ;;  %2279 = vst [vmem:[#allocation5 + $0x680] sm:$0xff] %v1255_v34  ;;  %v1257_v39 = vmul.f32 0.23570226, %v233_v36  ;;  %v1258_v40 = vmul.f32 0.23570226, %v234_v37 }
  0x9c   :  { %2280 = vst [vmem:[#allocation5 + $0x688] sm:$0xff] %v1256_v35  ;;  %v1259_v41 = vmul.f32 0.23570226, %v235_v38  ;;  %v236_v42 = vld [vmem:[#allocation2 + $0x6a8] sm:$0xff]  ;;  %v237_v43 = vld [vmem:[#allocation2 + $0x6b0] sm:$0xff]  ;;  %v238_v44 = vld [vmem:[#allocation2 + $0x6b8] sm:$0xff] }
  0x9d   :  { %2281 = vst [vmem:[#allocation5 + $0x690] sm:$0xff] %v1257_v39  ;;  %2282 = vst [vmem:[#allocation5 + $0x698] sm:$0xff] %v1258_v40  ;;  %v1260_v45 = vmul.f32 0.23570226, %v236_v42  ;;  %v1261_v46 = vmul.f32 0.23570226, %v237_v43 }
  0x9e   :  { %2283 = vst [vmem:[#allocation5 + $0x6a0] sm:$0xff] %v1259_v41  ;;  %v1262_v47 = vmul.f32 0.23570226, %v238_v44  ;;  %v239_v48 = vld [vmem:[#allocation2 + $0x6c0] sm:$0xff]  ;;  %v240_v49 = vld [vmem:[#allocation2 + $0x6c8] sm:$0xff]  ;;  %v241_v50 = vld [vmem:[#allocation2 + $0x6d0] sm:$0xff] }
  0x9f   :  { %2284 = vst [vmem:[#allocation5 + $0x6a8] sm:$0xff] %v1260_v45  ;;  %2285 = vst [vmem:[#allocation5 + $0x6b0] sm:$0xff] %v1261_v46  ;;  %v1263_v51 = vmul.f32 0.23570226, %v239_v48  ;;  %v1264_v52 = vmul.f32 0.23570226, %v240_v49 }
  0xa0   :  { %2286 = vst [vmem:[#allocation5 + $0x6b8] sm:$0xff] %v1262_v47  ;;  %v1265_v53 = vmul.f32 0.23570226, %v241_v50  ;;  %v242_v54 = vld [vmem:[#allocation2 + $0x6d8] sm:$0xff]  ;;  %v243_v55 = vld [vmem:[#allocation2 + $0x6e0] sm:$0xff]  ;;  %v244_v56 = vld [vmem:[#allocation2 + $0x6e8] sm:$0xff] }
  0xa1   :  { %2287 = vst [vmem:[#allocation5 + $0x6c0] sm:$0xff] %v1263_v51  ;;  %2288 = vst [vmem:[#allocation5 + $0x6c8] sm:$0xff] %v1264_v52  ;;  %v1266_v57 = vmul.f32 0.23570226, %v242_v54  ;;  %v1267_v58 = vmul.f32 0.23570226, %v243_v55 }
  0xa2   :  { %2289 = vst [vmem:[#allocation5 + $0x6d0] sm:$0xff] %v1265_v53  ;;  %v1268_v59 = vmul.f32 0.23570226, %v244_v56  ;;  %v245_v60 = vld [vmem:[#allocation2 + $0x6f0] sm:$0xff]  ;;  %v246_v61 = vld [vmem:[#allocation2 + $0x6f8] sm:$0xff]  ;;  %v247_v62 = vld [vmem:[#allocation2 + $0x700] sm:$0xff] }
  0xa3   :  { %2290 = vst [vmem:[#allocation5 + $0x6d8] sm:$0xff] %v1266_v57  ;;  %2291 = vst [vmem:[#allocation5 + $0x6e0] sm:$0xff] %v1267_v58  ;;  %v1269_v63 = vmul.f32 0.23570226, %v245_v60  ;;  %v1270_v0 = vmul.f32 0.23570226, %v246_v61 }
  0xa4   :  { %2292 = vst [vmem:[#allocation5 + $0x6e8] sm:$0xff] %v1268_v59  ;;  %v1271_v1 = vmul.f32 0.23570226, %v247_v62  ;;  %v248_v2 = vld [vmem:[#allocation2 + $0x708] sm:$0xff]  ;;  %v249_v3 = vld [vmem:[#allocation2 + $0x710] sm:$0xff]  ;;  %v250_v4 = vld [vmem:[#allocation2 + $0x718] sm:$0xff] }
  0xa5   :  { %2293 = vst [vmem:[#allocation5 + $0x6f0] sm:$0xff] %v1269_v63  ;;  %2294 = vst [vmem:[#allocation5 + $0x6f8] sm:$0xff] %v1270_v0  ;;  %v1272_v5 = vmul.f32 0.23570226, %v248_v2  ;;  %v1273_v6 = vmul.f32 0.23570226, %v249_v3 }
  0xa6   :  { %2295 = vst [vmem:[#allocation5 + $0x700] sm:$0xff] %v1271_v1  ;;  %v1274_v7 = vmul.f32 0.23570226, %v250_v4  ;;  %v251_v8 = vld [vmem:[#allocation2 + $0x720] sm:$0xff]  ;;  %v252_v9 = vld [vmem:[#allocation2 + $0x728] sm:$0xff]  ;;  %v253_v10 = vld [vmem:[#allocation2 + $0x730] sm:$0xff] }
  0xa7   :  { %2296 = vst [vmem:[#allocation5 + $0x708] sm:$0xff] %v1272_v5  ;;  %2297 = vst [vmem:[#allocation5 + $0x710] sm:$0xff] %v1273_v6  ;;  %v1275_v11 = vmul.f32 0.23570226, %v251_v8  ;;  %v1276_v12 = vmul.f32 0.23570226, %v252_v9 }
  0xa8   :  { %2298 = vst [vmem:[#allocation5 + $0x718] sm:$0xff] %v1274_v7  ;;  %v1277_v13 = vmul.f32 0.23570226, %v253_v10  ;;  %v254_v14 = vld [vmem:[#allocation2 + $0x738] sm:$0xff]  ;;  %v255_v15 = vld [vmem:[#allocation2 + $0x740] sm:$0xff]  ;;  %v256_v16 = vld [vmem:[#allocation2 + $0x748] sm:$0xff] }
  0xa9   :  { %2299 = vst [vmem:[#allocation5 + $0x720] sm:$0xff] %v1275_v11  ;;  %2300 = vst [vmem:[#allocation5 + $0x728] sm:$0xff] %v1276_v12  ;;  %v1278_v17 = vmul.f32 0.23570226, %v254_v14  ;;  %v1279_v18 = vmul.f32 0.23570226, %v255_v15 }
  0xaa   :  { %2301 = vst [vmem:[#allocation5 + $0x730] sm:$0xff] %v1277_v13  ;;  %v1280_v19 = vmul.f32 0.23570226, %v256_v16  ;;  %v257_v20 = vld [vmem:[#allocation2 + $0x750] sm:$0xff]  ;;  %v258_v21 = vld [vmem:[#allocation2 + $0x758] sm:$0xff]  ;;  %v259_v22 = vld [vmem:[#allocation2 + $0x760] sm:$0xff] }
  0xab   :  { %2302 = vst [vmem:[#allocation5 + $0x738] sm:$0xff] %v1278_v17  ;;  %2303 = vst [vmem:[#allocation5 + $0x740] sm:$0xff] %v1279_v18  ;;  %v1281_v23 = vmul.f32 0.23570226, %v257_v20  ;;  %v1282_v24 = vmul.f32 0.23570226, %v258_v21 }
  0xac   :  { %2304 = vst [vmem:[#allocation5 + $0x748] sm:$0xff] %v1280_v19  ;;  %v1283_v25 = vmul.f32 0.23570226, %v259_v22  ;;  %v260_v26 = vld [vmem:[#allocation2 + $0x768] sm:$0xff]  ;;  %v261_v27 = vld [vmem:[#allocation2 + $0x770] sm:$0xff]  ;;  %v262_v28 = vld [vmem:[#allocation2 + $0x778] sm:$0xff] }
  0xad   :  { %2305 = vst [vmem:[#allocation5 + $0x750] sm:$0xff] %v1281_v23  ;;  %2306 = vst [vmem:[#allocation5 + $0x758] sm:$0xff] %v1282_v24  ;;  %v1284_v29 = vmul.f32 0.23570226, %v260_v26  ;;  %v1285_v30 = vmul.f32 0.23570226, %v261_v27 }
  0xae   :  { %2307 = vst [vmem:[#allocation5 + $0x760] sm:$0xff] %v1283_v25  ;;  %v1286_v31 = vmul.f32 0.23570226, %v262_v28  ;;  %v263_v32 = vld [vmem:[#allocation2 + $0x780] sm:$0xff]  ;;  %v264_v33 = vld [vmem:[#allocation2 + $0x788] sm:$0xff]  ;;  %v265_v34 = vld [vmem:[#allocation2 + $0x790] sm:$0xff] }
  0xaf   :  { %2308 = vst [vmem:[#allocation5 + $0x768] sm:$0xff] %v1284_v29  ;;  %2309 = vst [vmem:[#allocation5 + $0x770] sm:$0xff] %v1285_v30  ;;  %v1287_v35 = vmul.f32 0.23570226, %v263_v32  ;;  %v1288_v36 = vmul.f32 0.23570226, %v264_v33 }
  0xb0   :  { %2310 = vst [vmem:[#allocation5 + $0x778] sm:$0xff] %v1286_v31  ;;  %v1289_v37 = vmul.f32 0.23570226, %v265_v34  ;;  %v266_v38 = vld [vmem:[#allocation2 + $0x798] sm:$0xff]  ;;  %v267_v39 = vld [vmem:[#allocation2 + $0x7a0] sm:$0xff]  ;;  %v268_v40 = vld [vmem:[#allocation2 + $0x7a8] sm:$0xff] }
  0xb1   :  { %2311 = vst [vmem:[#allocation5 + $0x780] sm:$0xff] %v1287_v35  ;;  %2312 = vst [vmem:[#allocation5 + $0x788] sm:$0xff] %v1288_v36  ;;  %v1290_v41 = vmul.f32 0.23570226, %v266_v38  ;;  %v1291_v42 = vmul.f32 0.23570226, %v267_v39 }
  0xb2   :  { %2313 = vst [vmem:[#allocation5 + $0x790] sm:$0xff] %v1289_v37  ;;  %v1292_v43 = vmul.f32 0.23570226, %v268_v40  ;;  %v269_v44 = vld [vmem:[#allocation2 + $0x7b0] sm:$0xff]  ;;  %v270_v45 = vld [vmem:[#allocation2 + $0x7b8] sm:$0xff]  ;;  %v271_v46 = vld [vmem:[#allocation2 + $0x7c0] sm:$0xff] }
  0xb3   :  { %2314 = vst [vmem:[#allocation5 + $0x798] sm:$0xff] %v1290_v41  ;;  %2315 = vst [vmem:[#allocation5 + $0x7a0] sm:$0xff] %v1291_v42  ;;  %v1293_v47 = vmul.f32 0.23570226, %v269_v44  ;;  %v1294_v48 = vmul.f32 0.23570226, %v270_v45 }
  0xb4   :  { %2316 = vst [vmem:[#allocation5 + $0x7a8] sm:$0xff] %v1292_v43  ;;  %v1295_v49 = vmul.f32 0.23570226, %v271_v46  ;;  %v272_v50 = vld [vmem:[#allocation2 + $0x7c8] sm:$0xff]  ;;  %v273_v51 = vld [vmem:[#allocation2 + $0x7d0] sm:$0xff]  ;;  %v274_v52 = vld [vmem:[#allocation2 + $0x7d8] sm:$0xff] }
  0xb5   :  { %2317 = vst [vmem:[#allocation5 + $0x7b0] sm:$0xff] %v1293_v47  ;;  %2318 = vst [vmem:[#allocation5 + $0x7b8] sm:$0xff] %v1294_v48  ;;  %v1296_v53 = vmul.f32 0.23570226, %v272_v50  ;;  %v1297_v54 = vmul.f32 0.23570226, %v273_v51 }
  0xb6   :  { %2319 = vst [vmem:[#allocation5 + $0x7c0] sm:$0xff] %v1295_v49  ;;  %v1298_v55 = vmul.f32 0.23570226, %v274_v52  ;;  %v275_v56 = vld [vmem:[#allocation2 + $0x7e0] sm:$0xff]  ;;  %v276_v57 = vld [vmem:[#allocation2 + $0x7e8] sm:$0xff]  ;;  %v277_v58 = vld [vmem:[#allocation2 + $0x7f0] sm:$0xff] }
  0xb7   :  { %2320 = vst [vmem:[#allocation5 + $0x7c8] sm:$0xff] %v1296_v53  ;;  %2321 = vst [vmem:[#allocation5 + $0x7d0] sm:$0xff] %v1297_v54  ;;  %v1299_v59 = vmul.f32 0.23570226, %v275_v56  ;;  %v1300_v60 = vmul.f32 0.23570226, %v276_v57 }
  0xb8   :  { %2322 = vst [vmem:[#allocation5 + $0x7d8] sm:$0xff] %v1298_v55  ;;  %v1301_v61 = vmul.f32 0.23570226, %v277_v58  ;;  %v278_v62 = vld [vmem:[#allocation2 + $0x7f8] sm:$0xff]  ;;  %v279_v63 = vld [vmem:[#allocation2 + $0x800] sm:$0xff]  ;;  %v280_v0 = vld [vmem:[#allocation2 + $0x808] sm:$0xff] }
  0xb9   :  { %2323 = vst [vmem:[#allocation5 + $0x7e0] sm:$0xff] %v1299_v59  ;;  %2324 = vst [vmem:[#allocation5 + $0x7e8] sm:$0xff] %v1300_v60  ;;  %v1302_v1 = vmul.f32 0.23570226, %v278_v62  ;;  %v1303_v2 = vmul.f32 0.23570226, %v279_v63 }
  0xba   :  { %2325 = vst [vmem:[#allocation5 + $0x7f0] sm:$0xff] %v1301_v61  ;;  %v1304_v3 = vmul.f32 0.23570226, %v280_v0  ;;  %v281_v4 = vld [vmem:[#allocation2 + $0x810] sm:$0xff]  ;;  %v282_v5 = vld [vmem:[#allocation2 + $0x818] sm:$0xff]  ;;  %v283_v6 = vld [vmem:[#allocation2 + $0x820] sm:$0xff] }
  0xbb   :  { %2326 = vst [vmem:[#allocation5 + $0x7f8] sm:$0xff] %v1302_v1  ;;  %2327 = vst [vmem:[#allocation5 + $0x800] sm:$0xff] %v1303_v2  ;;  %v1305_v7 = vmul.f32 0.23570226, %v281_v4  ;;  %v1306_v8 = vmul.f32 0.23570226, %v282_v5 }
  0xbc   :  { %2328 = vst [vmem:[#allocation5 + $0x808] sm:$0xff] %v1304_v3  ;;  %v1307_v9 = vmul.f32 0.23570226, %v283_v6  ;;  %v284_v10 = vld [vmem:[#allocation2 + $0x828] sm:$0xff]  ;;  %v285_v11 = vld [vmem:[#allocation2 + $0x830] sm:$0xff]  ;;  %v286_v12 = vld [vmem:[#allocation2 + $0x838] sm:$0xff] }
  0xbd   :  { %2329 = vst [vmem:[#allocation5 + $0x810] sm:$0xff] %v1305_v7  ;;  %2330 = vst [vmem:[#allocation5 + $0x818] sm:$0xff] %v1306_v8  ;;  %v1308_v13 = vmul.f32 0.23570226, %v284_v10  ;;  %v1309_v14 = vmul.f32 0.23570226, %v285_v11 }
  0xbe   :  { %2331 = vst [vmem:[#allocation5 + $0x820] sm:$0xff] %v1307_v9  ;;  %v1310_v15 = vmul.f32 0.23570226, %v286_v12  ;;  %v287_v16 = vld [vmem:[#allocation2 + $0x840] sm:$0xff]  ;;  %v288_v17 = vld [vmem:[#allocation2 + $0x848] sm:$0xff]  ;;  %v289_v18 = vld [vmem:[#allocation2 + $0x850] sm:$0xff] }
  0xbf   :  { %2332 = vst [vmem:[#allocation5 + $0x828] sm:$0xff] %v1308_v13  ;;  %2333 = vst [vmem:[#allocation5 + $0x830] sm:$0xff] %v1309_v14  ;;  %v1311_v19 = vmul.f32 0.23570226, %v287_v16  ;;  %v1312_v20 = vmul.f32 0.23570226, %v288_v17 }
  0xc0   :  { %2334 = vst [vmem:[#allocation5 + $0x838] sm:$0xff] %v1310_v15  ;;  %v1313_v21 = vmul.f32 0.23570226, %v289_v18  ;;  %v290_v22 = vld [vmem:[#allocation2 + $0x858] sm:$0xff]  ;;  %v291_v23 = vld [vmem:[#allocation2 + $0x860] sm:$0xff]  ;;  %v292_v24 = vld [vmem:[#allocation2 + $0x868] sm:$0xff] }
  0xc1   :  { %2335 = vst [vmem:[#allocation5 + $0x840] sm:$0xff] %v1311_v19  ;;  %2336 = vst [vmem:[#allocation5 + $0x848] sm:$0xff] %v1312_v20  ;;  %v1314_v25 = vmul.f32 0.23570226, %v290_v22  ;;  %v1315_v26 = vmul.f32 0.23570226, %v291_v23 }
  0xc2   :  { %2337 = vst [vmem:[#allocation5 + $0x850] sm:$0xff] %v1313_v21  ;;  %v1316_v27 = vmul.f32 0.23570226, %v292_v24  ;;  %v293_v28 = vld [vmem:[#allocation2 + $0x870] sm:$0xff]  ;;  %v294_v29 = vld [vmem:[#allocation2 + $0x878] sm:$0xff]  ;;  %v295_v30 = vld [vmem:[#allocation2 + $0x880] sm:$0xff] }
  0xc3   :  { %2338 = vst [vmem:[#allocation5 + $0x858] sm:$0xff] %v1314_v25  ;;  %2339 = vst [vmem:[#allocation5 + $0x860] sm:$0xff] %v1315_v26  ;;  %v1317_v31 = vmul.f32 0.23570226, %v293_v28  ;;  %v1318_v32 = vmul.f32 0.23570226, %v294_v29 }
  0xc4   :  { %2340 = vst [vmem:[#allocation5 + $0x868] sm:$0xff] %v1316_v27  ;;  %v1319_v33 = vmul.f32 0.23570226, %v295_v30  ;;  %v296_v34 = vld [vmem:[#allocation2 + $0x888] sm:$0xff]  ;;  %v297_v35 = vld [vmem:[#allocation2 + $0x890] sm:$0xff]  ;;  %v298_v36 = vld [vmem:[#allocation2 + $0x898] sm:$0xff] }
  0xc5   :  { %2341 = vst [vmem:[#allocation5 + $0x870] sm:$0xff] %v1317_v31  ;;  %2342 = vst [vmem:[#allocation5 + $0x878] sm:$0xff] %v1318_v32  ;;  %v1320_v37 = vmul.f32 0.23570226, %v296_v34  ;;  %v1321_v38 = vmul.f32 0.23570226, %v297_v35 }
  0xc6   :  { %2343 = vst [vmem:[#allocation5 + $0x880] sm:$0xff] %v1319_v33  ;;  %v1322_v39 = vmul.f32 0.23570226, %v298_v36  ;;  %v299_v40 = vld [vmem:[#allocation2 + $0x8a0] sm:$0xff]  ;;  %v300_v41 = vld [vmem:[#allocation2 + $0x8a8] sm:$0xff]  ;;  %v301_v42 = vld [vmem:[#allocation2 + $0x8b0] sm:$0xff] }
  0xc7   :  { %2344 = vst [vmem:[#allocation5 + $0x888] sm:$0xff] %v1320_v37  ;;  %2345 = vst [vmem:[#allocation5 + $0x890] sm:$0xff] %v1321_v38  ;;  %v1323_v43 = vmul.f32 0.23570226, %v299_v40  ;;  %v1324_v44 = vmul.f32 0.23570226, %v300_v41 }
  0xc8   :  { %2346 = vst [vmem:[#allocation5 + $0x898] sm:$0xff] %v1322_v39  ;;  %v1325_v45 = vmul.f32 0.23570226, %v301_v42  ;;  %v302_v46 = vld [vmem:[#allocation2 + $0x8b8] sm:$0xff]  ;;  %v303_v47 = vld [vmem:[#allocation2 + $0x8c0] sm:$0xff]  ;;  %v304_v48 = vld [vmem:[#allocation2 + $0x8c8] sm:$0xff] }
  0xc9   :  { %2347 = vst [vmem:[#allocation5 + $0x8a0] sm:$0xff] %v1323_v43  ;;  %2348 = vst [vmem:[#allocation5 + $0x8a8] sm:$0xff] %v1324_v44  ;;  %v1326_v49 = vmul.f32 0.23570226, %v302_v46  ;;  %v1327_v50 = vmul.f32 0.23570226, %v303_v47 }
  0xca   :  { %2349 = vst [vmem:[#allocation5 + $0x8b0] sm:$0xff] %v1325_v45  ;;  %v1328_v51 = vmul.f32 0.23570226, %v304_v48  ;;  %v305_v52 = vld [vmem:[#allocation2 + $0x8d0] sm:$0xff]  ;;  %v306_v53 = vld [vmem:[#allocation2 + $0x8d8] sm:$0xff]  ;;  %v307_v54 = vld [vmem:[#allocation2 + $0x8e0] sm:$0xff] }
  0xcb   :  { %2350 = vst [vmem:[#allocation5 + $0x8b8] sm:$0xff] %v1326_v49  ;;  %2351 = vst [vmem:[#allocation5 + $0x8c0] sm:$0xff] %v1327_v50  ;;  %v1329_v55 = vmul.f32 0.23570226, %v305_v52  ;;  %v1330_v56 = vmul.f32 0.23570226, %v306_v53 }
  0xcc   :  { %2352 = vst [vmem:[#allocation5 + $0x8c8] sm:$0xff] %v1328_v51  ;;  %v1331_v57 = vmul.f32 0.23570226, %v307_v54  ;;  %v308_v58 = vld [vmem:[#allocation2 + $0x8e8] sm:$0xff]  ;;  %v309_v59 = vld [vmem:[#allocation2 + $0x8f0] sm:$0xff]  ;;  %v310_v60 = vld [vmem:[#allocation2 + $0x8f8] sm:$0xff] }
  0xcd   :  { %2353 = vst [vmem:[#allocation5 + $0x8d0] sm:$0xff] %v1329_v55  ;;  %2354 = vst [vmem:[#allocation5 + $0x8d8] sm:$0xff] %v1330_v56  ;;  %v1332_v61 = vmul.f32 0.23570226, %v308_v58  ;;  %v1333_v62 = vmul.f32 0.23570226, %v309_v59 }
  0xce   :  { %2355 = vst [vmem:[#allocation5 + $0x8e0] sm:$0xff] %v1331_v57  ;;  %v1334_v63 = vmul.f32 0.23570226, %v310_v60  ;;  %v311_v0 = vld [vmem:[#allocation2 + $0x900] sm:$0xff]  ;;  %v312_v1 = vld [vmem:[#allocation2 + $0x908] sm:$0xff]  ;;  %v313_v2 = vld [vmem:[#allocation2 + $0x910] sm:$0xff] }
  0xcf   :  { %2356 = vst [vmem:[#allocation5 + $0x8e8] sm:$0xff] %v1332_v61  ;;  %2357 = vst [vmem:[#allocation5 + $0x8f0] sm:$0xff] %v1333_v62  ;;  %v1335_v3 = vmul.f32 0.23570226, %v311_v0  ;;  %v1336_v4 = vmul.f32 0.23570226, %v312_v1 }
  0xd0   :  { %2358 = vst [vmem:[#allocation5 + $0x8f8] sm:$0xff] %v1334_v63  ;;  %v1337_v5 = vmul.f32 0.23570226, %v313_v2  ;;  %v314_v6 = vld [vmem:[#allocation2 + $0x918] sm:$0xff]  ;;  %v315_v7 = vld [vmem:[#allocation2 + $0x920] sm:$0xff]  ;;  %v316_v8 = vld [vmem:[#allocation2 + $0x928] sm:$0xff] }
  0xd1   :  { %2359 = vst [vmem:[#allocation5 + $0x900] sm:$0xff] %v1335_v3  ;;  %2360 = vst [vmem:[#allocation5 + $0x908] sm:$0xff] %v1336_v4  ;;  %v1338_v9 = vmul.f32 0.23570226, %v314_v6  ;;  %v1339_v10 = vmul.f32 0.23570226, %v315_v7 }
  0xd2   :  { %2361 = vst [vmem:[#allocation5 + $0x910] sm:$0xff] %v1337_v5  ;;  %v1340_v11 = vmul.f32 0.23570226, %v316_v8  ;;  %v317_v12 = vld [vmem:[#allocation2 + $0x930] sm:$0xff]  ;;  %v318_v13 = vld [vmem:[#allocation2 + $0x938] sm:$0xff]  ;;  %v319_v14 = vld [vmem:[#allocation2 + $0x940] sm:$0xff] }
  0xd3   :  { %2362 = vst [vmem:[#allocation5 + $0x918] sm:$0xff] %v1338_v9  ;;  %2363 = vst [vmem:[#allocation5 + $0x920] sm:$0xff] %v1339_v10  ;;  %v1341_v15 = vmul.f32 0.23570226, %v317_v12  ;;  %v1342_v16 = vmul.f32 0.23570226, %v318_v13 }
  0xd4   :  { %2364 = vst [vmem:[#allocation5 + $0x928] sm:$0xff] %v1340_v11  ;;  %v1343_v17 = vmul.f32 0.23570226, %v319_v14  ;;  %v320_v18 = vld [vmem:[#allocation2 + $0x948] sm:$0xff]  ;;  %v321_v19 = vld [vmem:[#allocation2 + $0x950] sm:$0xff]  ;;  %v322_v20 = vld [vmem:[#allocation2 + $0x958] sm:$0xff] }
  0xd5   :  { %2365 = vst [vmem:[#allocation5 + $0x930] sm:$0xff] %v1341_v15  ;;  %2366 = vst [vmem:[#allocation5 + $0x938] sm:$0xff] %v1342_v16  ;;  %v1344_v21 = vmul.f32 0.23570226, %v320_v18  ;;  %v1345_v22 = vmul.f32 0.23570226, %v321_v19 }
  0xd6   :  { %2367 = vst [vmem:[#allocation5 + $0x940] sm:$0xff] %v1343_v17  ;;  %v1346_v23 = vmul.f32 0.23570226, %v322_v20  ;;  %v323_v24 = vld [vmem:[#allocation2 + $0x960] sm:$0xff]  ;;  %v324_v25 = vld [vmem:[#allocation2 + $0x968] sm:$0xff]  ;;  %v325_v26 = vld [vmem:[#allocation2 + $0x970] sm:$0xff] }
  0xd7   :  { %2368 = vst [vmem:[#allocation5 + $0x948] sm:$0xff] %v1344_v21  ;;  %2369 = vst [vmem:[#allocation5 + $0x950] sm:$0xff] %v1345_v22  ;;  %v1347_v27 = vmul.f32 0.23570226, %v323_v24  ;;  %v1348_v28 = vmul.f32 0.23570226, %v324_v25 }
  0xd8   :  { %2370 = vst [vmem:[#allocation5 + $0x958] sm:$0xff] %v1346_v23  ;;  %v1349_v29 = vmul.f32 0.23570226, %v325_v26  ;;  %v326_v30 = vld [vmem:[#allocation2 + $0x978] sm:$0xff]  ;;  %v327_v31 = vld [vmem:[#allocation2 + $0x980] sm:$0xff]  ;;  %v328_v32 = vld [vmem:[#allocation2 + $0x988] sm:$0xff] }
  0xd9   :  { %2371 = vst [vmem:[#allocation5 + $0x960] sm:$0xff] %v1347_v27  ;;  %2372 = vst [vmem:[#allocation5 + $0x968] sm:$0xff] %v1348_v28  ;;  %v1350_v33 = vmul.f32 0.23570226, %v326_v30  ;;  %v1351_v34 = vmul.f32 0.23570226, %v327_v31 }
  0xda   :  { %2373 = vst [vmem:[#allocation5 + $0x970] sm:$0xff] %v1349_v29  ;;  %v1352_v35 = vmul.f32 0.23570226, %v328_v32  ;;  %v329_v36 = vld [vmem:[#allocation2 + $0x990] sm:$0xff]  ;;  %v330_v37 = vld [vmem:[#allocation2 + $0x998] sm:$0xff]  ;;  %v331_v38 = vld [vmem:[#allocation2 + $0x9a0] sm:$0xff] }
  0xdb   :  { %2374 = vst [vmem:[#allocation5 + $0x978] sm:$0xff] %v1350_v33  ;;  %2375 = vst [vmem:[#allocation5 + $0x980] sm:$0xff] %v1351_v34  ;;  %v1353_v39 = vmul.f32 0.23570226, %v329_v36  ;;  %v1354_v40 = vmul.f32 0.23570226, %v330_v37 }
  0xdc   :  { %2376 = vst [vmem:[#allocation5 + $0x988] sm:$0xff] %v1352_v35  ;;  %v1355_v41 = vmul.f32 0.23570226, %v331_v38  ;;  %v332_v42 = vld [vmem:[#allocation2 + $0x9a8] sm:$0xff]  ;;  %v333_v43 = vld [vmem:[#allocation2 + $0x9b0] sm:$0xff]  ;;  %v334_v44 = vld [vmem:[#allocation2 + $0x9b8] sm:$0xff] }
  0xdd   :  { %2377 = vst [vmem:[#allocation5 + $0x990] sm:$0xff] %v1353_v39  ;;  %2378 = vst [vmem:[#allocation5 + $0x998] sm:$0xff] %v1354_v40  ;;  %v1356_v45 = vmul.f32 0.23570226, %v332_v42  ;;  %v1357_v46 = vmul.f32 0.23570226, %v333_v43 }
  0xde   :  { %2379 = vst [vmem:[#allocation5 + $0x9a0] sm:$0xff] %v1355_v41  ;;  %v1358_v47 = vmul.f32 0.23570226, %v334_v44  ;;  %v335_v48 = vld [vmem:[#allocation2 + $0x9c0] sm:$0xff]  ;;  %v336_v49 = vld [vmem:[#allocation2 + $0x9c8] sm:$0xff]  ;;  %v337_v50 = vld [vmem:[#allocation2 + $0x9d0] sm:$0xff] }
  0xdf   :  { %2380 = vst [vmem:[#allocation5 + $0x9a8] sm:$0xff] %v1356_v45  ;;  %2381 = vst [vmem:[#allocation5 + $0x9b0] sm:$0xff] %v1357_v46  ;;  %v1359_v51 = vmul.f32 0.23570226, %v335_v48  ;;  %v1360_v52 = vmul.f32 0.23570226, %v336_v49 }
  0xe0   :  { %2382 = vst [vmem:[#allocation5 + $0x9b8] sm:$0xff] %v1358_v47  ;;  %v1361_v53 = vmul.f32 0.23570226, %v337_v50  ;;  %v338_v54 = vld [vmem:[#allocation2 + $0x9d8] sm:$0xff]  ;;  %v339_v55 = vld [vmem:[#allocation2 + $0x9e0] sm:$0xff]  ;;  %v340_v56 = vld [vmem:[#allocation2 + $0x9e8] sm:$0xff] }
  0xe1   :  { %2383 = vst [vmem:[#allocation5 + $0x9c0] sm:$0xff] %v1359_v51  ;;  %2384 = vst [vmem:[#allocation5 + $0x9c8] sm:$0xff] %v1360_v52  ;;  %v1362_v57 = vmul.f32 0.23570226, %v338_v54  ;;  %v1363_v58 = vmul.f32 0.23570226, %v339_v55 }
  0xe2   :  { %2385 = vst [vmem:[#allocation5 + $0x9d0] sm:$0xff] %v1361_v53  ;;  %v1364_v59 = vmul.f32 0.23570226, %v340_v56  ;;  %v341_v60 = vld [vmem:[#allocation2 + $0x9f0] sm:$0xff]  ;;  %v342_v61 = vld [vmem:[#allocation2 + $0x9f8] sm:$0xff]  ;;  %v343_v62 = vld [vmem:[#allocation2 + $0xa00] sm:$0xff] }
  0xe3   :  { %2386 = vst [vmem:[#allocation5 + $0x9d8] sm:$0xff] %v1362_v57  ;;  %2387 = vst [vmem:[#allocation5 + $0x9e0] sm:$0xff] %v1363_v58  ;;  %v1365_v63 = vmul.f32 0.23570226, %v341_v60  ;;  %v1366_v0 = vmul.f32 0.23570226, %v342_v61 }
  0xe4   :  { %2388 = vst [vmem:[#allocation5 + $0x9e8] sm:$0xff] %v1364_v59  ;;  %v1367_v1 = vmul.f32 0.23570226, %v343_v62  ;;  %v344_v2 = vld [vmem:[#allocation2 + $0xa08] sm:$0xff]  ;;  %v345_v3 = vld [vmem:[#allocation2 + $0xa10] sm:$0xff]  ;;  %v346_v4 = vld [vmem:[#allocation2 + $0xa18] sm:$0xff] }
  0xe5   :  { %2389 = vst [vmem:[#allocation5 + $0x9f0] sm:$0xff] %v1365_v63  ;;  %2390 = vst [vmem:[#allocation5 + $0x9f8] sm:$0xff] %v1366_v0  ;;  %v1368_v5 = vmul.f32 0.23570226, %v344_v2  ;;  %v1369_v6 = vmul.f32 0.23570226, %v345_v3 }
  0xe6   :  { %2391 = vst [vmem:[#allocation5 + $0xa00] sm:$0xff] %v1367_v1  ;;  %v1370_v7 = vmul.f32 0.23570226, %v346_v4  ;;  %v347_v8 = vld [vmem:[#allocation2 + $0xa20] sm:$0xff]  ;;  %v348_v9 = vld [vmem:[#allocation2 + $0xa28] sm:$0xff]  ;;  %v349_v10 = vld [vmem:[#allocation2 + $0xa30] sm:$0xff] }
  0xe7   :  { %2392 = vst [vmem:[#allocation5 + $0xa08] sm:$0xff] %v1368_v5  ;;  %2393 = vst [vmem:[#allocation5 + $0xa10] sm:$0xff] %v1369_v6  ;;  %v1371_v11 = vmul.f32 0.23570226, %v347_v8  ;;  %v1372_v12 = vmul.f32 0.23570226, %v348_v9 }
  0xe8   :  { %2394 = vst [vmem:[#allocation5 + $0xa18] sm:$0xff] %v1370_v7  ;;  %v1373_v13 = vmul.f32 0.23570226, %v349_v10  ;;  %v350_v14 = vld [vmem:[#allocation2 + $0xa38] sm:$0xff]  ;;  %v351_v15 = vld [vmem:[#allocation2 + $0xa40] sm:$0xff]  ;;  %v352_v16 = vld [vmem:[#allocation2 + $0xa48] sm:$0xff] }
  0xe9   :  { %2395 = vst [vmem:[#allocation5 + $0xa20] sm:$0xff] %v1371_v11  ;;  %2396 = vst [vmem:[#allocation5 + $0xa28] sm:$0xff] %v1372_v12  ;;  %v1374_v17 = vmul.f32 0.23570226, %v350_v14  ;;  %v1375_v18 = vmul.f32 0.23570226, %v351_v15 }
  0xea   :  { %2397 = vst [vmem:[#allocation5 + $0xa30] sm:$0xff] %v1373_v13  ;;  %v1376_v19 = vmul.f32 0.23570226, %v352_v16  ;;  %v353_v20 = vld [vmem:[#allocation2 + $0xa50] sm:$0xff]  ;;  %v354_v21 = vld [vmem:[#allocation2 + $0xa58] sm:$0xff]  ;;  %v355_v22 = vld [vmem:[#allocation2 + $0xa60] sm:$0xff] }
  0xeb   :  { %2398 = vst [vmem:[#allocation5 + $0xa38] sm:$0xff] %v1374_v17  ;;  %2399 = vst [vmem:[#allocation5 + $0xa40] sm:$0xff] %v1375_v18  ;;  %v1377_v23 = vmul.f32 0.23570226, %v353_v20  ;;  %v1378_v24 = vmul.f32 0.23570226, %v354_v21 }
  0xec   :  { %2400 = vst [vmem:[#allocation5 + $0xa48] sm:$0xff] %v1376_v19  ;;  %v1379_v25 = vmul.f32 0.23570226, %v355_v22  ;;  %v356_v26 = vld [vmem:[#allocation2 + $0xa68] sm:$0xff]  ;;  %v357_v27 = vld [vmem:[#allocation2 + $0xa70] sm:$0xff]  ;;  %v358_v28 = vld [vmem:[#allocation2 + $0xa78] sm:$0xff] }
  0xed   :  { %2401 = vst [vmem:[#allocation5 + $0xa50] sm:$0xff] %v1377_v23  ;;  %2402 = vst [vmem:[#allocation5 + $0xa58] sm:$0xff] %v1378_v24  ;;  %v1380_v29 = vmul.f32 0.23570226, %v356_v26  ;;  %v1381_v30 = vmul.f32 0.23570226, %v357_v27 }
  0xee   :  { %2403 = vst [vmem:[#allocation5 + $0xa60] sm:$0xff] %v1379_v25  ;;  %v1382_v31 = vmul.f32 0.23570226, %v358_v28  ;;  %v359_v32 = vld [vmem:[#allocation2 + $0xa80] sm:$0xff]  ;;  %v360_v33 = vld [vmem:[#allocation2 + $0xa88] sm:$0xff]  ;;  %v361_v34 = vld [vmem:[#allocation2 + $0xa90] sm:$0xff] }
  0xef   :  { %2404 = vst [vmem:[#allocation5 + $0xa68] sm:$0xff] %v1380_v29  ;;  %2405 = vst [vmem:[#allocation5 + $0xa70] sm:$0xff] %v1381_v30  ;;  %v1383_v35 = vmul.f32 0.23570226, %v359_v32  ;;  %v1384_v36 = vmul.f32 0.23570226, %v360_v33 }
  0xf0   :  { %2406 = vst [vmem:[#allocation5 + $0xa78] sm:$0xff] %v1382_v31  ;;  %v1385_v37 = vmul.f32 0.23570226, %v361_v34  ;;  %v362_v38 = vld [vmem:[#allocation2 + $0xa98] sm:$0xff]  ;;  %v363_v39 = vld [vmem:[#allocation2 + $0xaa0] sm:$0xff]  ;;  %v364_v40 = vld [vmem:[#allocation2 + $0xaa8] sm:$0xff] }
  0xf1   :  { %2407 = vst [vmem:[#allocation5 + $0xa80] sm:$0xff] %v1383_v35  ;;  %2408 = vst [vmem:[#allocation5 + $0xa88] sm:$0xff] %v1384_v36  ;;  %v1386_v41 = vmul.f32 0.23570226, %v362_v38  ;;  %v1387_v42 = vmul.f32 0.23570226, %v363_v39 }
  0xf2   :  { %2409 = vst [vmem:[#allocation5 + $0xa90] sm:$0xff] %v1385_v37  ;;  %v1388_v43 = vmul.f32 0.23570226, %v364_v40  ;;  %v365_v44 = vld [vmem:[#allocation2 + $0xab0] sm:$0xff]  ;;  %v366_v45 = vld [vmem:[#allocation2 + $0xab8] sm:$0xff]  ;;  %v367_v46 = vld [vmem:[#allocation2 + $0xac0] sm:$0xff] }
  0xf3   :  { %2410 = vst [vmem:[#allocation5 + $0xa98] sm:$0xff] %v1386_v41  ;;  %2411 = vst [vmem:[#allocation5 + $0xaa0] sm:$0xff] %v1387_v42  ;;  %v1389_v47 = vmul.f32 0.23570226, %v365_v44  ;;  %v1390_v48 = vmul.f32 0.23570226, %v366_v45 }
  0xf4   :  { %2412 = vst [vmem:[#allocation5 + $0xaa8] sm:$0xff] %v1388_v43  ;;  %v1391_v49 = vmul.f32 0.23570226, %v367_v46  ;;  %v368_v50 = vld [vmem:[#allocation2 + $0xac8] sm:$0xff]  ;;  %v369_v51 = vld [vmem:[#allocation2 + $0xad0] sm:$0xff]  ;;  %v370_v52 = vld [vmem:[#allocation2 + $0xad8] sm:$0xff] }
  0xf5   :  { %2413 = vst [vmem:[#allocation5 + $0xab0] sm:$0xff] %v1389_v47  ;;  %2414 = vst [vmem:[#allocation5 + $0xab8] sm:$0xff] %v1390_v48  ;;  %v1392_v53 = vmul.f32 0.23570226, %v368_v50  ;;  %v1393_v54 = vmul.f32 0.23570226, %v369_v51 }
  0xf6   :  { %2415 = vst [vmem:[#allocation5 + $0xac0] sm:$0xff] %v1391_v49  ;;  %v1394_v55 = vmul.f32 0.23570226, %v370_v52  ;;  %v371_v56 = vld [vmem:[#allocation2 + $0xae0] sm:$0xff]  ;;  %v372_v57 = vld [vmem:[#allocation2 + $0xae8] sm:$0xff]  ;;  %v373_v58 = vld [vmem:[#allocation2 + $0xaf0] sm:$0xff] }
  0xf7   :  { %2416 = vst [vmem:[#allocation5 + $0xac8] sm:$0xff] %v1392_v53  ;;  %2417 = vst [vmem:[#allocation5 + $0xad0] sm:$0xff] %v1393_v54  ;;  %v1395_v59 = vmul.f32 0.23570226, %v371_v56  ;;  %v1396_v60 = vmul.f32 0.23570226, %v372_v57 }
  0xf8   :  { %2418 = vst [vmem:[#allocation5 + $0xad8] sm:$0xff] %v1394_v55  ;;  %v1397_v61 = vmul.f32 0.23570226, %v373_v58  ;;  %v374_v62 = vld [vmem:[#allocation2 + $0xaf8] sm:$0xff]  ;;  %v375_v63 = vld [vmem:[#allocation2 + $0xb00] sm:$0xff]  ;;  %v376_v0 = vld [vmem:[#allocation2 + $0xb08] sm:$0xff] }
  0xf9   :  { %2419 = vst [vmem:[#allocation5 + $0xae0] sm:$0xff] %v1395_v59  ;;  %2420 = vst [vmem:[#allocation5 + $0xae8] sm:$0xff] %v1396_v60  ;;  %v1398_v1 = vmul.f32 0.23570226, %v374_v62  ;;  %v1399_v2 = vmul.f32 0.23570226, %v375_v63 }
  0xfa   :  { %2421 = vst [vmem:[#allocation5 + $0xaf0] sm:$0xff] %v1397_v61  ;;  %v1400_v3 = vmul.f32 0.23570226, %v376_v0  ;;  %v377_v4 = vld [vmem:[#allocation2 + $0xb10] sm:$0xff]  ;;  %v378_v5 = vld [vmem:[#allocation2 + $0xb18] sm:$0xff]  ;;  %v379_v6 = vld [vmem:[#allocation2 + $0xb20] sm:$0xff] }
  0xfb   :  { %2422 = vst [vmem:[#allocation5 + $0xaf8] sm:$0xff] %v1398_v1  ;;  %2423 = vst [vmem:[#allocation5 + $0xb00] sm:$0xff] %v1399_v2  ;;  %v1401_v7 = vmul.f32 0.23570226, %v377_v4  ;;  %v1402_v8 = vmul.f32 0.23570226, %v378_v5 }
  0xfc   :  { %2424 = vst [vmem:[#allocation5 + $0xb08] sm:$0xff] %v1400_v3  ;;  %v1403_v9 = vmul.f32 0.23570226, %v379_v6  ;;  %v380_v10 = vld [vmem:[#allocation2 + $0xb28] sm:$0xff]  ;;  %v381_v11 = vld [vmem:[#allocation2 + $0xb30] sm:$0xff]  ;;  %v382_v12 = vld [vmem:[#allocation2 + $0xb38] sm:$0xff] }
  0xfd   :  { %2425 = vst [vmem:[#allocation5 + $0xb10] sm:$0xff] %v1401_v7  ;;  %2426 = vst [vmem:[#allocation5 + $0xb18] sm:$0xff] %v1402_v8  ;;  %v1404_v13 = vmul.f32 0.23570226, %v380_v10  ;;  %v1405_v14 = vmul.f32 0.23570226, %v381_v11 }
  0xfe   :  { %2427 = vst [vmem:[#allocation5 + $0xb20] sm:$0xff] %v1403_v9  ;;  %v1406_v15 = vmul.f32 0.23570226, %v382_v12  ;;  %v383_v16 = vld [vmem:[#allocation2 + $0xb40] sm:$0xff]  ;;  %v384_v17 = vld [vmem:[#allocation2 + $0xb48] sm:$0xff]  ;;  %v385_v18 = vld [vmem:[#allocation2 + $0xb50] sm:$0xff] }
  0xff   :  { %2428 = vst [vmem:[#allocation5 + $0xb28] sm:$0xff] %v1404_v13  ;;  %2429 = vst [vmem:[#allocation5 + $0xb30] sm:$0xff] %v1405_v14  ;;  %v1407_v19 = vmul.f32 0.23570226, %v383_v16  ;;  %v1408_v20 = vmul.f32 0.23570226, %v384_v17 }
 0x100   :  { %2430 = vst [vmem:[#allocation5 + $0xb38] sm:$0xff] %v1406_v15  ;;  %v1409_v21 = vmul.f32 0.23570226, %v385_v18  ;;  %v386_v22 = vld [vmem:[#allocation2 + $0xb58] sm:$0xff]  ;;  %v387_v23 = vld [vmem:[#allocation2 + $0xb60] sm:$0xff]  ;;  %v388_v24 = vld [vmem:[#allocation2 + $0xb68] sm:$0xff] }
 0x101   :  { %2431 = vst [vmem:[#allocation5 + $0xb40] sm:$0xff] %v1407_v19  ;;  %2432 = vst [vmem:[#allocation5 + $0xb48] sm:$0xff] %v1408_v20  ;;  %v1410_v25 = vmul.f32 0.23570226, %v386_v22  ;;  %v1411_v26 = vmul.f32 0.23570226, %v387_v23 }
 0x102   :  { %2433 = vst [vmem:[#allocation5 + $0xb50] sm:$0xff] %v1409_v21  ;;  %v1412_v27 = vmul.f32 0.23570226, %v388_v24  ;;  %v389_v28 = vld [vmem:[#allocation2 + $0xb70] sm:$0xff]  ;;  %v390_v29 = vld [vmem:[#allocation2 + $0xb78] sm:$0xff]  ;;  %v391_v30 = vld [vmem:[#allocation2 + $0xb80] sm:$0xff] }
 0x103   :  { %2434 = vst [vmem:[#allocation5 + $0xb58] sm:$0xff] %v1410_v25  ;;  %2435 = vst [vmem:[#allocation5 + $0xb60] sm:$0xff] %v1411_v26  ;;  %v1413_v31 = vmul.f32 0.23570226, %v389_v28  ;;  %v1414_v32 = vmul.f32 0.23570226, %v390_v29 }
 0x104   :  { %2436 = vst [vmem:[#allocation5 + $0xb68] sm:$0xff] %v1412_v27  ;;  %v1415_v33 = vmul.f32 0.23570226, %v391_v30  ;;  %v392_v34 = vld [vmem:[#allocation2 + $0xb88] sm:$0xff]  ;;  %v393_v35 = vld [vmem:[#allocation2 + $0xb90] sm:$0xff]  ;;  %v394_v36 = vld [vmem:[#allocation2 + $0xb98] sm:$0xff] }
 0x105   :  { %2437 = vst [vmem:[#allocation5 + $0xb70] sm:$0xff] %v1413_v31  ;;  %2438 = vst [vmem:[#allocation5 + $0xb78] sm:$0xff] %v1414_v32  ;;  %v1416_v37 = vmul.f32 0.23570226, %v392_v34  ;;  %v1417_v38 = vmul.f32 0.23570226, %v393_v35 }
 0x106   :  { %2439 = vst [vmem:[#allocation5 + $0xb80] sm:$0xff] %v1415_v33  ;;  %v1418_v39 = vmul.f32 0.23570226, %v394_v36  ;;  %v395_v40 = vld [vmem:[#allocation2 + $0xba0] sm:$0xff]  ;;  %v396_v41 = vld [vmem:[#allocation2 + $0xba8] sm:$0xff]  ;;  %v397_v42 = vld [vmem:[#allocation2 + $0xbb0] sm:$0xff] }
 0x107   :  { %2440 = vst [vmem:[#allocation5 + $0xb88] sm:$0xff] %v1416_v37  ;;  %2441 = vst [vmem:[#allocation5 + $0xb90] sm:$0xff] %v1417_v38  ;;  %v1419_v43 = vmul.f32 0.23570226, %v395_v40  ;;  %v1420_v44 = vmul.f32 0.23570226, %v396_v41 }
 0x108   :  { %2442 = vst [vmem:[#allocation5 + $0xb98] sm:$0xff] %v1418_v39  ;;  %v1421_v45 = vmul.f32 0.23570226, %v397_v42  ;;  %v398_v46 = vld [vmem:[#allocation2 + $0xbb8] sm:$0xff]  ;;  %v399_v47 = vld [vmem:[#allocation2 + $0xbc0] sm:$0xff]  ;;  %v400_v48 = vld [vmem:[#allocation2 + $0xbc8] sm:$0xff] }
 0x109   :  { %2443 = vst [vmem:[#allocation5 + $0xba0] sm:$0xff] %v1419_v43  ;;  %2444 = vst [vmem:[#allocation5 + $0xba8] sm:$0xff] %v1420_v44  ;;  %v1422_v49 = vmul.f32 0.23570226, %v398_v46  ;;  %v1423_v50 = vmul.f32 0.23570226, %v399_v47 }
 0x10a   :  { %2445 = vst [vmem:[#allocation5 + $0xbb0] sm:$0xff] %v1421_v45  ;;  %v1424_v51 = vmul.f32 0.23570226, %v400_v48  ;;  %v401_v52 = vld [vmem:[#allocation2 + $0xbd0] sm:$0xff]  ;;  %v402_v53 = vld [vmem:[#allocation2 + $0xbd8] sm:$0xff]  ;;  %v403_v54 = vld [vmem:[#allocation2 + $0xbe0] sm:$0xff] }
 0x10b   :  { %2446 = vst [vmem:[#allocation5 + $0xbb8] sm:$0xff] %v1422_v49  ;;  %2447 = vst [vmem:[#allocation5 + $0xbc0] sm:$0xff] %v1423_v50  ;;  %v1425_v55 = vmul.f32 0.23570226, %v401_v52  ;;  %v1426_v56 = vmul.f32 0.23570226, %v402_v53 }
 0x10c   :  { %2448 = vst [vmem:[#allocation5 + $0xbc8] sm:$0xff] %v1424_v51  ;;  %v1427_v57 = vmul.f32 0.23570226, %v403_v54  ;;  %v404_v58 = vld [vmem:[#allocation2 + $0xbe8] sm:$0xff]  ;;  %v405_v59 = vld [vmem:[#allocation2 + $0xbf0] sm:$0xff]  ;;  %v406_v60 = vld [vmem:[#allocation2 + $0xbf8] sm:$0xff] }
 0x10d   :  { %2449 = vst [vmem:[#allocation5 + $0xbd0] sm:$0xff] %v1425_v55  ;;  %2450 = vst [vmem:[#allocation5 + $0xbd8] sm:$0xff] %v1426_v56  ;;  %v1428_v61 = vmul.f32 0.23570226, %v404_v58  ;;  %v1429_v62 = vmul.f32 0.23570226, %v405_v59 }
 0x10e   :  { %2451 = vst [vmem:[#allocation5 + $0xbe0] sm:$0xff] %v1427_v57  ;;  %v1430_v63 = vmul.f32 0.23570226, %v406_v60  ;;  %v407_v0 = vld [vmem:[#allocation2 + $0xc00] sm:$0xff]  ;;  %v408_v1 = vld [vmem:[#allocation2 + $0xc08] sm:$0xff]  ;;  %v409_v2 = vld [vmem:[#allocation2 + $0xc10] sm:$0xff] }
 0x10f   :  { %2452 = vst [vmem:[#allocation5 + $0xbe8] sm:$0xff] %v1428_v61  ;;  %2453 = vst [vmem:[#allocation5 + $0xbf0] sm:$0xff] %v1429_v62  ;;  %v1431_v3 = vmul.f32 0.23570226, %v407_v0  ;;  %v1432_v4 = vmul.f32 0.23570226, %v408_v1 }
 0x110   :  { %2454 = vst [vmem:[#allocation5 + $0xbf8] sm:$0xff] %v1430_v63  ;;  %v1433_v5 = vmul.f32 0.23570226, %v409_v2  ;;  %v410_v6 = vld [vmem:[#allocation2 + $0xc18] sm:$0xff]  ;;  %v411_v7 = vld [vmem:[#allocation2 + $0xc20] sm:$0xff]  ;;  %v412_v8 = vld [vmem:[#allocation2 + $0xc28] sm:$0xff] }
 0x111   :  { %2455 = vst [vmem:[#allocation5 + $0xc00] sm:$0xff] %v1431_v3  ;;  %2456 = vst [vmem:[#allocation5 + $0xc08] sm:$0xff] %v1432_v4  ;;  %v1434_v9 = vmul.f32 0.23570226, %v410_v6  ;;  %v1435_v10 = vmul.f32 0.23570226, %v411_v7 }
 0x112   :  { %2457 = vst [vmem:[#allocation5 + $0xc10] sm:$0xff] %v1433_v5  ;;  %v1436_v11 = vmul.f32 0.23570226, %v412_v8  ;;  %v413_v12 = vld [vmem:[#allocation2 + $0xc30] sm:$0xff]  ;;  %v414_v13 = vld [vmem:[#allocation2 + $0xc38] sm:$0xff]  ;;  %v415_v14 = vld [vmem:[#allocation2 + $0xc40] sm:$0xff] }
 0x113   :  { %2458 = vst [vmem:[#allocation5 + $0xc18] sm:$0xff] %v1434_v9  ;;  %2459 = vst [vmem:[#allocation5 + $0xc20] sm:$0xff] %v1435_v10  ;;  %v1437_v15 = vmul.f32 0.23570226, %v413_v12  ;;  %v1438_v16 = vmul.f32 0.23570226, %v414_v13 }
 0x114   :  { %2460 = vst [vmem:[#allocation5 + $0xc28] sm:$0xff] %v1436_v11  ;;  %v1439_v17 = vmul.f32 0.23570226, %v415_v14  ;;  %v416_v18 = vld [vmem:[#allocation2 + $0xc48] sm:$0xff]  ;;  %v417_v19 = vld [vmem:[#allocation2 + $0xc50] sm:$0xff]  ;;  %v418_v20 = vld [vmem:[#allocation2 + $0xc58] sm:$0xff] }
 0x115   :  { %2461 = vst [vmem:[#allocation5 + $0xc30] sm:$0xff] %v1437_v15  ;;  %2462 = vst [vmem:[#allocation5 + $0xc38] sm:$0xff] %v1438_v16  ;;  %v1440_v21 = vmul.f32 0.23570226, %v416_v18  ;;  %v1441_v22 = vmul.f32 0.23570226, %v417_v19 }
 0x116   :  { %2463 = vst [vmem:[#allocation5 + $0xc40] sm:$0xff] %v1439_v17  ;;  %v1442_v23 = vmul.f32 0.23570226, %v418_v20  ;;  %v419_v24 = vld [vmem:[#allocation2 + $0xc60] sm:$0xff]  ;;  %v420_v25 = vld [vmem:[#allocation2 + $0xc68] sm:$0xff]  ;;  %v421_v26 = vld [vmem:[#allocation2 + $0xc70] sm:$0xff] }
 0x117   :  { %2464 = vst [vmem:[#allocation5 + $0xc48] sm:$0xff] %v1440_v21  ;;  %2465 = vst [vmem:[#allocation5 + $0xc50] sm:$0xff] %v1441_v22  ;;  %v1443_v27 = vmul.f32 0.23570226, %v419_v24  ;;  %v1444_v28 = vmul.f32 0.23570226, %v420_v25 }
 0x118   :  { %2466 = vst [vmem:[#allocation5 + $0xc58] sm:$0xff] %v1442_v23  ;;  %v1445_v29 = vmul.f32 0.23570226, %v421_v26  ;;  %v422_v30 = vld [vmem:[#allocation2 + $0xc78] sm:$0xff]  ;;  %v423_v31 = vld [vmem:[#allocation2 + $0xc80] sm:$0xff]  ;;  %v424_v32 = vld [vmem:[#allocation2 + $0xc88] sm:$0xff] }
 0x119   :  { %2467 = vst [vmem:[#allocation5 + $0xc60] sm:$0xff] %v1443_v27  ;;  %2468 = vst [vmem:[#allocation5 + $0xc68] sm:$0xff] %v1444_v28  ;;  %v1446_v33 = vmul.f32 0.23570226, %v422_v30  ;;  %v1447_v34 = vmul.f32 0.23570226, %v423_v31 }
 0x11a   :  { %2469 = vst [vmem:[#allocation5 + $0xc70] sm:$0xff] %v1445_v29  ;;  %v1448_v35 = vmul.f32 0.23570226, %v424_v32  ;;  %v425_v36 = vld [vmem:[#allocation2 + $0xc90] sm:$0xff]  ;;  %v426_v37 = vld [vmem:[#allocation2 + $0xc98] sm:$0xff]  ;;  %v427_v38 = vld [vmem:[#allocation2 + $0xca0] sm:$0xff] }
 0x11b   :  { %2470 = vst [vmem:[#allocation5 + $0xc78] sm:$0xff] %v1446_v33  ;;  %2471 = vst [vmem:[#allocation5 + $0xc80] sm:$0xff] %v1447_v34  ;;  %v1449_v39 = vmul.f32 0.23570226, %v425_v36  ;;  %v1450_v40 = vmul.f32 0.23570226, %v426_v37 }
 0x11c   :  { %2472 = vst [vmem:[#allocation5 + $0xc88] sm:$0xff] %v1448_v35  ;;  %v1451_v41 = vmul.f32 0.23570226, %v427_v38  ;;  %v428_v42 = vld [vmem:[#allocation2 + $0xca8] sm:$0xff]  ;;  %v429_v43 = vld [vmem:[#allocation2 + $0xcb0] sm:$0xff]  ;;  %v430_v44 = vld [vmem:[#allocation2 + $0xcb8] sm:$0xff] }
 0x11d   :  { %2473 = vst [vmem:[#allocation5 + $0xc90] sm:$0xff] %v1449_v39  ;;  %2474 = vst [vmem:[#allocation5 + $0xc98] sm:$0xff] %v1450_v40  ;;  %v1452_v45 = vmul.f32 0.23570226, %v428_v42  ;;  %v1453_v46 = vmul.f32 0.23570226, %v429_v43 }
 0x11e   :  { %2475 = vst [vmem:[#allocation5 + $0xca0] sm:$0xff] %v1451_v41  ;;  %v1454_v47 = vmul.f32 0.23570226, %v430_v44  ;;  %v431_v48 = vld [vmem:[#allocation2 + $0xcc0] sm:$0xff]  ;;  %v432_v49 = vld [vmem:[#allocation2 + $0xcc8] sm:$0xff]  ;;  %v433_v50 = vld [vmem:[#allocation2 + $0xcd0] sm:$0xff] }
 0x11f   :  { %2476 = vst [vmem:[#allocation5 + $0xca8] sm:$0xff] %v1452_v45  ;;  %2477 = vst [vmem:[#allocation5 + $0xcb0] sm:$0xff] %v1453_v46  ;;  %v1455_v51 = vmul.f32 0.23570226, %v431_v48  ;;  %v1456_v52 = vmul.f32 0.23570226, %v432_v49 }
 0x120   :  { %2478 = vst [vmem:[#allocation5 + $0xcb8] sm:$0xff] %v1454_v47  ;;  %v1457_v53 = vmul.f32 0.23570226, %v433_v50  ;;  %v434_v54 = vld [vmem:[#allocation2 + $0xcd8] sm:$0xff]  ;;  %v435_v55 = vld [vmem:[#allocation2 + $0xce0] sm:$0xff]  ;;  %v436_v56 = vld [vmem:[#allocation2 + $0xce8] sm:$0xff] }
 0x121   :  { %2479 = vst [vmem:[#allocation5 + $0xcc0] sm:$0xff] %v1455_v51  ;;  %2480 = vst [vmem:[#allocation5 + $0xcc8] sm:$0xff] %v1456_v52  ;;  %v1458_v57 = vmul.f32 0.23570226, %v434_v54  ;;  %v1459_v58 = vmul.f32 0.23570226, %v435_v55 }
 0x122   :  { %2481 = vst [vmem:[#allocation5 + $0xcd0] sm:$0xff] %v1457_v53  ;;  %v1460_v59 = vmul.f32 0.23570226, %v436_v56  ;;  %v437_v60 = vld [vmem:[#allocation2 + $0xcf0] sm:$0xff]  ;;  %v438_v61 = vld [vmem:[#allocation2 + $0xcf8] sm:$0xff]  ;;  %v439_v62 = vld [vmem:[#allocation2 + $0xd00] sm:$0xff] }
 0x123   :  { %2482 = vst [vmem:[#allocation5 + $0xcd8] sm:$0xff] %v1458_v57  ;;  %2483 = vst [vmem:[#allocation5 + $0xce0] sm:$0xff] %v1459_v58  ;;  %v1461_v63 = vmul.f32 0.23570226, %v437_v60  ;;  %v1462_v0 = vmul.f32 0.23570226, %v438_v61 }
 0x124   :  { %2484 = vst [vmem:[#allocation5 + $0xce8] sm:$0xff] %v1460_v59  ;;  %v1463_v1 = vmul.f32 0.23570226, %v439_v62  ;;  %v440_v2 = vld [vmem:[#allocation2 + $0xd08] sm:$0xff]  ;;  %v441_v3 = vld [vmem:[#allocation2 + $0xd10] sm:$0xff]  ;;  %v442_v4 = vld [vmem:[#allocation2 + $0xd18] sm:$0xff] }
 0x125   :  { %2485 = vst [vmem:[#allocation5 + $0xcf0] sm:$0xff] %v1461_v63  ;;  %2486 = vst [vmem:[#allocation5 + $0xcf8] sm:$0xff] %v1462_v0  ;;  %v1464_v5 = vmul.f32 0.23570226, %v440_v2  ;;  %v1465_v6 = vmul.f32 0.23570226, %v441_v3 }
 0x126   :  { %2487 = vst [vmem:[#allocation5 + $0xd00] sm:$0xff] %v1463_v1  ;;  %v1466_v7 = vmul.f32 0.23570226, %v442_v4  ;;  %v443_v8 = vld [vmem:[#allocation2 + $0xd20] sm:$0xff]  ;;  %v444_v9 = vld [vmem:[#allocation2 + $0xd28] sm:$0xff]  ;;  %v445_v10 = vld [vmem:[#allocation2 + $0xd30] sm:$0xff] }
 0x127   :  { %2488 = vst [vmem:[#allocation5 + $0xd08] sm:$0xff] %v1464_v5  ;;  %2489 = vst [vmem:[#allocation5 + $0xd10] sm:$0xff] %v1465_v6  ;;  %v1467_v11 = vmul.f32 0.23570226, %v443_v8  ;;  %v1468_v12 = vmul.f32 0.23570226, %v444_v9 }
 0x128   :  { %2490 = vst [vmem:[#allocation5 + $0xd18] sm:$0xff] %v1466_v7  ;;  %v1469_v13 = vmul.f32 0.23570226, %v445_v10  ;;  %v446_v14 = vld [vmem:[#allocation2 + $0xd38] sm:$0xff]  ;;  %v447_v15 = vld [vmem:[#allocation2 + $0xd40] sm:$0xff]  ;;  %v448_v16 = vld [vmem:[#allocation2 + $0xd48] sm:$0xff] }
 0x129   :  { %2491 = vst [vmem:[#allocation5 + $0xd20] sm:$0xff] %v1467_v11  ;;  %2492 = vst [vmem:[#allocation5 + $0xd28] sm:$0xff] %v1468_v12  ;;  %v1470_v17 = vmul.f32 0.23570226, %v446_v14  ;;  %v1471_v18 = vmul.f32 0.23570226, %v447_v15 }
 0x12a   :  { %2493 = vst [vmem:[#allocation5 + $0xd30] sm:$0xff] %v1469_v13  ;;  %v1472_v19 = vmul.f32 0.23570226, %v448_v16  ;;  %v449_v20 = vld [vmem:[#allocation2 + $0xd50] sm:$0xff]  ;;  %v450_v21 = vld [vmem:[#allocation2 + $0xd58] sm:$0xff]  ;;  %v451_v22 = vld [vmem:[#allocation2 + $0xd60] sm:$0xff] }
 0x12b   :  { %2494 = vst [vmem:[#allocation5 + $0xd38] sm:$0xff] %v1470_v17  ;;  %2495 = vst [vmem:[#allocation5 + $0xd40] sm:$0xff] %v1471_v18  ;;  %v1473_v23 = vmul.f32 0.23570226, %v449_v20  ;;  %v1474_v24 = vmul.f32 0.23570226, %v450_v21 }
 0x12c   :  { %2496 = vst [vmem:[#allocation5 + $0xd48] sm:$0xff] %v1472_v19  ;;  %v1475_v25 = vmul.f32 0.23570226, %v451_v22  ;;  %v452_v26 = vld [vmem:[#allocation2 + $0xd68] sm:$0xff]  ;;  %v453_v27 = vld [vmem:[#allocation2 + $0xd70] sm:$0xff]  ;;  %v454_v28 = vld [vmem:[#allocation2 + $0xd78] sm:$0xff] }
 0x12d   :  { %2497 = vst [vmem:[#allocation5 + $0xd50] sm:$0xff] %v1473_v23  ;;  %2498 = vst [vmem:[#allocation5 + $0xd58] sm:$0xff] %v1474_v24  ;;  %v1476_v29 = vmul.f32 0.23570226, %v452_v26  ;;  %v1477_v30 = vmul.f32 0.23570226, %v453_v27 }
 0x12e   :  { %2499 = vst [vmem:[#allocation5 + $0xd60] sm:$0xff] %v1475_v25  ;;  %v1478_v31 = vmul.f32 0.23570226, %v454_v28  ;;  %v455_v32 = vld [vmem:[#allocation2 + $0xd80] sm:$0xff]  ;;  %v456_v33 = vld [vmem:[#allocation2 + $0xd88] sm:$0xff]  ;;  %v457_v34 = vld [vmem:[#allocation2 + $0xd90] sm:$0xff] }
 0x12f   :  { %2500 = vst [vmem:[#allocation5 + $0xd68] sm:$0xff] %v1476_v29  ;;  %2501 = vst [vmem:[#allocation5 + $0xd70] sm:$0xff] %v1477_v30  ;;  %v1479_v35 = vmul.f32 0.23570226, %v455_v32  ;;  %v1480_v36 = vmul.f32 0.23570226, %v456_v33 }
 0x130   :  { %2502 = vst [vmem:[#allocation5 + $0xd78] sm:$0xff] %v1478_v31  ;;  %v1481_v37 = vmul.f32 0.23570226, %v457_v34  ;;  %v458_v38 = vld [vmem:[#allocation2 + $0xd98] sm:$0xff]  ;;  %v459_v39 = vld [vmem:[#allocation2 + $0xda0] sm:$0xff]  ;;  %v460_v40 = vld [vmem:[#allocation2 + $0xda8] sm:$0xff] }
 0x131   :  { %2503 = vst [vmem:[#allocation5 + $0xd80] sm:$0xff] %v1479_v35  ;;  %2504 = vst [vmem:[#allocation5 + $0xd88] sm:$0xff] %v1480_v36  ;;  %v1482_v41 = vmul.f32 0.23570226, %v458_v38  ;;  %v1483_v42 = vmul.f32 0.23570226, %v459_v39 }
 0x132   :  { %2505 = vst [vmem:[#allocation5 + $0xd90] sm:$0xff] %v1481_v37  ;;  %v1484_v43 = vmul.f32 0.23570226, %v460_v40  ;;  %v461_v44 = vld [vmem:[#allocation2 + $0xdb0] sm:$0xff]  ;;  %v462_v45 = vld [vmem:[#allocation2 + $0xdb8] sm:$0xff]  ;;  %v463_v46 = vld [vmem:[#allocation2 + $0xdc0] sm:$0xff] }
 0x133   :  { %2506 = vst [vmem:[#allocation5 + $0xd98] sm:$0xff] %v1482_v41  ;;  %2507 = vst [vmem:[#allocation5 + $0xda0] sm:$0xff] %v1483_v42  ;;  %v1485_v47 = vmul.f32 0.23570226, %v461_v44  ;;  %v1486_v48 = vmul.f32 0.23570226, %v462_v45 }
 0x134   :  { %2508 = vst [vmem:[#allocation5 + $0xda8] sm:$0xff] %v1484_v43  ;;  %v1487_v49 = vmul.f32 0.23570226, %v463_v46  ;;  %v464_v50 = vld [vmem:[#allocation2 + $0xdc8] sm:$0xff]  ;;  %v465_v51 = vld [vmem:[#allocation2 + $0xdd0] sm:$0xff]  ;;  %v466_v52 = vld [vmem:[#allocation2 + $0xdd8] sm:$0xff] }
 0x135   :  { %2509 = vst [vmem:[#allocation5 + $0xdb0] sm:$0xff] %v1485_v47  ;;  %2510 = vst [vmem:[#allocation5 + $0xdb8] sm:$0xff] %v1486_v48  ;;  %v1488_v53 = vmul.f32 0.23570226, %v464_v50  ;;  %v1489_v54 = vmul.f32 0.23570226, %v465_v51 }
 0x136   :  { %2511 = vst [vmem:[#allocation5 + $0xdc0] sm:$0xff] %v1487_v49  ;;  %v1490_v55 = vmul.f32 0.23570226, %v466_v52  ;;  %v467_v56 = vld [vmem:[#allocation2 + $0xde0] sm:$0xff]  ;;  %v468_v57 = vld [vmem:[#allocation2 + $0xde8] sm:$0xff]  ;;  %v469_v58 = vld [vmem:[#allocation2 + $0xdf0] sm:$0xff] }
 0x137   :  { %2512 = vst [vmem:[#allocation5 + $0xdc8] sm:$0xff] %v1488_v53  ;;  %2513 = vst [vmem:[#allocation5 + $0xdd0] sm:$0xff] %v1489_v54  ;;  %v1491_v59 = vmul.f32 0.23570226, %v467_v56  ;;  %v1492_v60 = vmul.f32 0.23570226, %v468_v57 }
 0x138   :  { %2514 = vst [vmem:[#allocation5 + $0xdd8] sm:$0xff] %v1490_v55  ;;  %v1493_v61 = vmul.f32 0.23570226, %v469_v58  ;;  %v470_v62 = vld [vmem:[#allocation2 + $0xdf8] sm:$0xff]  ;;  %v471_v63 = vld [vmem:[#allocation2 + $0xe00] sm:$0xff]  ;;  %v472_v0 = vld [vmem:[#allocation2 + $0xe08] sm:$0xff] }
 0x139   :  { %2515 = vst [vmem:[#allocation5 + $0xde0] sm:$0xff] %v1491_v59  ;;  %2516 = vst [vmem:[#allocation5 + $0xde8] sm:$0xff] %v1492_v60  ;;  %v1494_v1 = vmul.f32 0.23570226, %v470_v62  ;;  %v1495_v2 = vmul.f32 0.23570226, %v471_v63 }
 0x13a   :  { %2517 = vst [vmem:[#allocation5 + $0xdf0] sm:$0xff] %v1493_v61  ;;  %v1496_v3 = vmul.f32 0.23570226, %v472_v0  ;;  %v473_v4 = vld [vmem:[#allocation2 + $0xe10] sm:$0xff]  ;;  %v474_v5 = vld [vmem:[#allocation2 + $0xe18] sm:$0xff]  ;;  %v475_v6 = vld [vmem:[#allocation2 + $0xe20] sm:$0xff] }
 0x13b   :  { %2518 = vst [vmem:[#allocation5 + $0xdf8] sm:$0xff] %v1494_v1  ;;  %2519 = vst [vmem:[#allocation5 + $0xe00] sm:$0xff] %v1495_v2  ;;  %v1497_v7 = vmul.f32 0.23570226, %v473_v4  ;;  %v1498_v8 = vmul.f32 0.23570226, %v474_v5 }
 0x13c   :  { %2520 = vst [vmem:[#allocation5 + $0xe08] sm:$0xff] %v1496_v3  ;;  %v1499_v9 = vmul.f32 0.23570226, %v475_v6  ;;  %v476_v10 = vld [vmem:[#allocation2 + $0xe28] sm:$0xff]  ;;  %v477_v11 = vld [vmem:[#allocation2 + $0xe30] sm:$0xff]  ;;  %v478_v12 = vld [vmem:[#allocation2 + $0xe38] sm:$0xff] }
 0x13d   :  { %2521 = vst [vmem:[#allocation5 + $0xe10] sm:$0xff] %v1497_v7  ;;  %2522 = vst [vmem:[#allocation5 + $0xe18] sm:$0xff] %v1498_v8  ;;  %v1500_v13 = vmul.f32 0.23570226, %v476_v10  ;;  %v1501_v14 = vmul.f32 0.23570226, %v477_v11 }
 0x13e   :  { %2523 = vst [vmem:[#allocation5 + $0xe20] sm:$0xff] %v1499_v9  ;;  %v1502_v15 = vmul.f32 0.23570226, %v478_v12  ;;  %v479_v16 = vld [vmem:[#allocation2 + $0xe40] sm:$0xff]  ;;  %v480_v17 = vld [vmem:[#allocation2 + $0xe48] sm:$0xff]  ;;  %v481_v18 = vld [vmem:[#allocation2 + $0xe50] sm:$0xff] }
 0x13f   :  { %2524 = vst [vmem:[#allocation5 + $0xe28] sm:$0xff] %v1500_v13  ;;  %2525 = vst [vmem:[#allocation5 + $0xe30] sm:$0xff] %v1501_v14  ;;  %v1503_v19 = vmul.f32 0.23570226, %v479_v16  ;;  %v1504_v20 = vmul.f32 0.23570226, %v480_v17 }
 0x140   :  { %2526 = vst [vmem:[#allocation5 + $0xe38] sm:$0xff] %v1502_v15  ;;  %v1505_v21 = vmul.f32 0.23570226, %v481_v18  ;;  %v482_v22 = vld [vmem:[#allocation2 + $0xe58] sm:$0xff]  ;;  %v483_v23 = vld [vmem:[#allocation2 + $0xe60] sm:$0xff]  ;;  %v484_v24 = vld [vmem:[#allocation2 + $0xe68] sm:$0xff] }
 0x141   :  { %2527 = vst [vmem:[#allocation5 + $0xe40] sm:$0xff] %v1503_v19  ;;  %2528 = vst [vmem:[#allocation5 + $0xe48] sm:$0xff] %v1504_v20  ;;  %v1506_v25 = vmul.f32 0.23570226, %v482_v22  ;;  %v1507_v26 = vmul.f32 0.23570226, %v483_v23 }
 0x142   :  { %2529 = vst [vmem:[#allocation5 + $0xe50] sm:$0xff] %v1505_v21  ;;  %v1508_v27 = vmul.f32 0.23570226, %v484_v24  ;;  %v485_v28 = vld [vmem:[#allocation2 + $0xe70] sm:$0xff]  ;;  %v486_v29 = vld [vmem:[#allocation2 + $0xe78] sm:$0xff]  ;;  %v487_v30 = vld [vmem:[#allocation2 + $0xe80] sm:$0xff] }
 0x143   :  { %2530 = vst [vmem:[#allocation5 + $0xe58] sm:$0xff] %v1506_v25  ;;  %2531 = vst [vmem:[#allocation5 + $0xe60] sm:$0xff] %v1507_v26  ;;  %v1509_v31 = vmul.f32 0.23570226, %v485_v28  ;;  %v1510_v32 = vmul.f32 0.23570226, %v486_v29 }
 0x144   :  { %2532 = vst [vmem:[#allocation5 + $0xe68] sm:$0xff] %v1508_v27  ;;  %v1511_v33 = vmul.f32 0.23570226, %v487_v30  ;;  %v488_v34 = vld [vmem:[#allocation2 + $0xe88] sm:$0xff]  ;;  %v489_v35 = vld [vmem:[#allocation2 + $0xe90] sm:$0xff]  ;;  %v490_v36 = vld [vmem:[#allocation2 + $0xe98] sm:$0xff] }
 0x145   :  { %2533 = vst [vmem:[#allocation5 + $0xe70] sm:$0xff] %v1509_v31  ;;  %2534 = vst [vmem:[#allocation5 + $0xe78] sm:$0xff] %v1510_v32  ;;  %v1512_v37 = vmul.f32 0.23570226, %v488_v34  ;;  %v1513_v38 = vmul.f32 0.23570226, %v489_v35 }
 0x146   :  { %2535 = vst [vmem:[#allocation5 + $0xe80] sm:$0xff] %v1511_v33  ;;  %v1514_v39 = vmul.f32 0.23570226, %v490_v36  ;;  %v491_v40 = vld [vmem:[#allocation2 + $0xea0] sm:$0xff]  ;;  %v492_v41 = vld [vmem:[#allocation2 + $0xea8] sm:$0xff]  ;;  %v493_v42 = vld [vmem:[#allocation2 + $0xeb0] sm:$0xff] }
 0x147   :  { %2536 = vst [vmem:[#allocation5 + $0xe88] sm:$0xff] %v1512_v37  ;;  %2537 = vst [vmem:[#allocation5 + $0xe90] sm:$0xff] %v1513_v38  ;;  %v1515_v43 = vmul.f32 0.23570226, %v491_v40  ;;  %v1516_v44 = vmul.f32 0.23570226, %v492_v41 }
 0x148   :  { %2538 = vst [vmem:[#allocation5 + $0xe98] sm:$0xff] %v1514_v39  ;;  %v1517_v45 = vmul.f32 0.23570226, %v493_v42  ;;  %v494_v46 = vld [vmem:[#allocation2 + $0xeb8] sm:$0xff]  ;;  %v495_v47 = vld [vmem:[#allocation2 + $0xec0] sm:$0xff]  ;;  %v496_v48 = vld [vmem:[#allocation2 + $0xec8] sm:$0xff] }
 0x149   :  { %2539 = vst [vmem:[#allocation5 + $0xea0] sm:$0xff] %v1515_v43  ;;  %2540 = vst [vmem:[#allocation5 + $0xea8] sm:$0xff] %v1516_v44  ;;  %v1518_v49 = vmul.f32 0.23570226, %v494_v46  ;;  %v1519_v50 = vmul.f32 0.23570226, %v495_v47 }
 0x14a   :  { %2541 = vst [vmem:[#allocation5 + $0xeb0] sm:$0xff] %v1517_v45  ;;  %v1520_v51 = vmul.f32 0.23570226, %v496_v48  ;;  %v497_v52 = vld [vmem:[#allocation2 + $0xed0] sm:$0xff]  ;;  %v498_v53 = vld [vmem:[#allocation2 + $0xed8] sm:$0xff]  ;;  %v499_v54 = vld [vmem:[#allocation2 + $0xee0] sm:$0xff] }
 0x14b   :  { %2542 = vst [vmem:[#allocation5 + $0xeb8] sm:$0xff] %v1518_v49  ;;  %2543 = vst [vmem:[#allocation5 + $0xec0] sm:$0xff] %v1519_v50  ;;  %v1521_v55 = vmul.f32 0.23570226, %v497_v52  ;;  %v1522_v56 = vmul.f32 0.23570226, %v498_v53 }
 0x14c   :  { %2544 = vst [vmem:[#allocation5 + $0xec8] sm:$0xff] %v1520_v51  ;;  %v1523_v57 = vmul.f32 0.23570226, %v499_v54  ;;  %v500_v58 = vld [vmem:[#allocation2 + $0xee8] sm:$0xff]  ;;  %v501_v59 = vld [vmem:[#allocation2 + $0xef0] sm:$0xff]  ;;  %v502_v60 = vld [vmem:[#allocation2 + $0xef8] sm:$0xff] }
 0x14d   :  { %2545 = vst [vmem:[#allocation5 + $0xed0] sm:$0xff] %v1521_v55  ;;  %2546 = vst [vmem:[#allocation5 + $0xed8] sm:$0xff] %v1522_v56  ;;  %v1524_v61 = vmul.f32 0.23570226, %v500_v58  ;;  %v1525_v62 = vmul.f32 0.23570226, %v501_v59 }
 0x14e   :  { %2547 = vst [vmem:[#allocation5 + $0xee0] sm:$0xff] %v1523_v57  ;;  %v1526_v63 = vmul.f32 0.23570226, %v502_v60  ;;  %v503_v0 = vld [vmem:[#allocation2 + $0xf00] sm:$0xff]  ;;  %v504_v1 = vld [vmem:[#allocation2 + $0xf08] sm:$0xff]  ;;  %v505_v2 = vld [vmem:[#allocation2 + $0xf10] sm:$0xff] }
 0x14f   :  { %2548 = vst [vmem:[#allocation5 + $0xee8] sm:$0xff] %v1524_v61  ;;  %2549 = vst [vmem:[#allocation5 + $0xef0] sm:$0xff] %v1525_v62  ;;  %v1527_v3 = vmul.f32 0.23570226, %v503_v0  ;;  %v1528_v4 = vmul.f32 0.23570226, %v504_v1 }
 0x150   :  { %2550 = vst [vmem:[#allocation5 + $0xef8] sm:$0xff] %v1526_v63  ;;  %v1529_v5 = vmul.f32 0.23570226, %v505_v2  ;;  %v506_v6 = vld [vmem:[#allocation2 + $0xf18] sm:$0xff]  ;;  %v507_v7 = vld [vmem:[#allocation2 + $0xf20] sm:$0xff]  ;;  %v508_v8 = vld [vmem:[#allocation2 + $0xf28] sm:$0xff] }
 0x151   :  { %2551 = vst [vmem:[#allocation5 + $0xf00] sm:$0xff] %v1527_v3  ;;  %2552 = vst [vmem:[#allocation5 + $0xf08] sm:$0xff] %v1528_v4  ;;  %v1530_v9 = vmul.f32 0.23570226, %v506_v6  ;;  %v1531_v10 = vmul.f32 0.23570226, %v507_v7 }
 0x152   :  { %2553 = vst [vmem:[#allocation5 + $0xf10] sm:$0xff] %v1529_v5  ;;  %v1532_v11 = vmul.f32 0.23570226, %v508_v8  ;;  %v509_v12 = vld [vmem:[#allocation2 + $0xf30] sm:$0xff]  ;;  %v510_v13 = vld [vmem:[#allocation2 + $0xf38] sm:$0xff]  ;;  %v511_v14 = vld [vmem:[#allocation2 + $0xf40] sm:$0xff] }
 0x153   :  { %2554 = vst [vmem:[#allocation5 + $0xf18] sm:$0xff] %v1530_v9  ;;  %2555 = vst [vmem:[#allocation5 + $0xf20] sm:$0xff] %v1531_v10  ;;  %v1533_v15 = vmul.f32 0.23570226, %v509_v12  ;;  %v1534_v16 = vmul.f32 0.23570226, %v510_v13 }
 0x154   :  { %2556 = vst [vmem:[#allocation5 + $0xf28] sm:$0xff] %v1532_v11  ;;  %v1535_v17 = vmul.f32 0.23570226, %v511_v14  ;;  %v512_v18 = vld [vmem:[#allocation2 + $0xf48] sm:$0xff]  ;;  %v513_v19 = vld [vmem:[#allocation2 + $0xf50] sm:$0xff]  ;;  %v514_v20 = vld [vmem:[#allocation2 + $0xf58] sm:$0xff] }
 0x155   :  { %2557 = vst [vmem:[#allocation5 + $0xf30] sm:$0xff] %v1533_v15  ;;  %2558 = vst [vmem:[#allocation5 + $0xf38] sm:$0xff] %v1534_v16  ;;  %v1536_v21 = vmul.f32 0.23570226, %v512_v18  ;;  %v1537_v22 = vmul.f32 0.23570226, %v513_v19 }
 0x156   :  { %2559 = vst [vmem:[#allocation5 + $0xf40] sm:$0xff] %v1535_v17  ;;  %v1538_v23 = vmul.f32 0.23570226, %v514_v20  ;;  %v515_v24 = vld [vmem:[#allocation2 + $0xf60] sm:$0xff]  ;;  %v516_v25 = vld [vmem:[#allocation2 + $0xf68] sm:$0xff]  ;;  %v517_v26 = vld [vmem:[#allocation2 + $0xf70] sm:$0xff] }
 0x157   :  { %2560 = vst [vmem:[#allocation5 + $0xf48] sm:$0xff] %v1536_v21  ;;  %2561 = vst [vmem:[#allocation5 + $0xf50] sm:$0xff] %v1537_v22  ;;  %v1539_v27 = vmul.f32 0.23570226, %v515_v24  ;;  %v1540_v28 = vmul.f32 0.23570226, %v516_v25 }
 0x158   :  { %2562 = vst [vmem:[#allocation5 + $0xf58] sm:$0xff] %v1538_v23  ;;  %v1541_v29 = vmul.f32 0.23570226, %v517_v26  ;;  %v518_v30 = vld [vmem:[#allocation2 + $0xf78] sm:$0xff]  ;;  %v519_v31 = vld [vmem:[#allocation2 + $0xf80] sm:$0xff]  ;;  %v520_v32 = vld [vmem:[#allocation2 + $0xf88] sm:$0xff] }
 0x159   :  { %2563 = vst [vmem:[#allocation5 + $0xf60] sm:$0xff] %v1539_v27  ;;  %2564 = vst [vmem:[#allocation5 + $0xf68] sm:$0xff] %v1540_v28  ;;  %v1542_v33 = vmul.f32 0.23570226, %v518_v30  ;;  %v1543_v34 = vmul.f32 0.23570226, %v519_v31 }
 0x15a   :  { %2565 = vst [vmem:[#allocation5 + $0xf70] sm:$0xff] %v1541_v29  ;;  %v1544_v35 = vmul.f32 0.23570226, %v520_v32  ;;  %v521_v36 = vld [vmem:[#allocation2 + $0xf90] sm:$0xff]  ;;  %v522_v37 = vld [vmem:[#allocation2 + $0xf98] sm:$0xff]  ;;  %v523_v38 = vld [vmem:[#allocation2 + $0xfa0] sm:$0xff] }
 0x15b   :  { %2566 = vst [vmem:[#allocation5 + $0xf78] sm:$0xff] %v1542_v33  ;;  %2567 = vst [vmem:[#allocation5 + $0xf80] sm:$0xff] %v1543_v34  ;;  %v1545_v39 = vmul.f32 0.23570226, %v521_v36  ;;  %v1546_v40 = vmul.f32 0.23570226, %v522_v37 }
 0x15c   :  { %2568 = vst [vmem:[#allocation5 + $0xf88] sm:$0xff] %v1544_v35  ;;  %v1547_v41 = vmul.f32 0.23570226, %v523_v38  ;;  %v524_v42 = vld [vmem:[#allocation2 + $0xfa8] sm:$0xff]  ;;  %v525_v43 = vld [vmem:[#allocation2 + $0xfb0] sm:$0xff]  ;;  %v526_v44 = vld [vmem:[#allocation2 + $0xfb8] sm:$0xff] }
 0x15d   :  { %2569 = vst [vmem:[#allocation5 + $0xf90] sm:$0xff] %v1545_v39  ;;  %2570 = vst [vmem:[#allocation5 + $0xf98] sm:$0xff] %v1546_v40  ;;  %v1548_v45 = vmul.f32 0.23570226, %v524_v42  ;;  %v1549_v46 = vmul.f32 0.23570226, %v525_v43 }
 0x15e   :  { %2571 = vst [vmem:[#allocation5 + $0xfa0] sm:$0xff] %v1547_v41  ;;  %v1550_v47 = vmul.f32 0.23570226, %v526_v44  ;;  %v527_v48 = vld [vmem:[#allocation2 + $0xfc0] sm:$0xff]  ;;  %v528_v49 = vld [vmem:[#allocation2 + $0xfc8] sm:$0xff]  ;;  %v529_v50 = vld [vmem:[#allocation2 + $0xfd0] sm:$0xff] }
 0x15f   :  { %2572 = vst [vmem:[#allocation5 + $0xfa8] sm:$0xff] %v1548_v45  ;;  %2573 = vst [vmem:[#allocation5 + $0xfb0] sm:$0xff] %v1549_v46  ;;  %v1551_v51 = vmul.f32 0.23570226, %v527_v48  ;;  %v1552_v52 = vmul.f32 0.23570226, %v528_v49 }
 0x160   :  { %2574 = vst [vmem:[#allocation5 + $0xfb8] sm:$0xff] %v1550_v47  ;;  %v1553_v53 = vmul.f32 0.23570226, %v529_v50  ;;  %v530_v54 = vld [vmem:[#allocation2 + $0xfd8] sm:$0xff]  ;;  %v531_v55 = vld [vmem:[#allocation2 + $0xfe0] sm:$0xff]  ;;  %v532_v56 = vld [vmem:[#allocation2 + $0xfe8] sm:$0xff] }
 0x161   :  { %2575 = vst [vmem:[#allocation5 + $0xfc0] sm:$0xff] %v1551_v51  ;;  %2576 = vst [vmem:[#allocation5 + $0xfc8] sm:$0xff] %v1552_v52  ;;  %v1554_v57 = vmul.f32 0.23570226, %v530_v54  ;;  %v1555_v58 = vmul.f32 0.23570226, %v531_v55 }
 0x162   :  { %2577 = vst [vmem:[#allocation5 + $0xfd0] sm:$0xff] %v1553_v53  ;;  %v1556_v59 = vmul.f32 0.23570226, %v532_v56  ;;  %v533_v60 = vld [vmem:[#allocation2 + $0xff0] sm:$0xff]  ;;  %v534_v61 = vld [vmem:[#allocation2 + $0xff8] sm:$0xff]  ;;  %v535_v62 = vld [vmem:[#allocation2 + $0x1000] sm:$0xff] }
 0x163   :  { %2578 = vst [vmem:[#allocation5 + $0xfd8] sm:$0xff] %v1554_v57  ;;  %2579 = vst [vmem:[#allocation5 + $0xfe0] sm:$0xff] %v1555_v58  ;;  %v1557_v63 = vmul.f32 0.23570226, %v533_v60  ;;  %v1558_v0 = vmul.f32 0.23570226, %v534_v61 }
 0x164   :  { %2580 = vst [vmem:[#allocation5 + $0xfe8] sm:$0xff] %v1556_v59  ;;  %v1559_v1 = vmul.f32 0.23570226, %v535_v62  ;;  %v536_v2 = vld [vmem:[#allocation2 + $0x1008] sm:$0xff]  ;;  %v537_v3 = vld [vmem:[#allocation2 + $0x1010] sm:$0xff]  ;;  %v538_v4 = vld [vmem:[#allocation2 + $0x1018] sm:$0xff] }
 0x165   :  { %2581 = vst [vmem:[#allocation5 + $0xff0] sm:$0xff] %v1557_v63  ;;  %2582 = vst [vmem:[#allocation5 + $0xff8] sm:$0xff] %v1558_v0  ;;  %v1560_v5 = vmul.f32 0.23570226, %v536_v2  ;;  %v1561_v6 = vmul.f32 0.23570226, %v537_v3 }
 0x166   :  { %2583 = vst [vmem:[#allocation5 + $0x1000] sm:$0xff] %v1559_v1  ;;  %v1562_v7 = vmul.f32 0.23570226, %v538_v4  ;;  %v539_v8 = vld [vmem:[#allocation2 + $0x1020] sm:$0xff]  ;;  %v540_v9 = vld [vmem:[#allocation2 + $0x1028] sm:$0xff]  ;;  %v541_v10 = vld [vmem:[#allocation2 + $0x1030] sm:$0xff] }
 0x167   :  { %2584 = vst [vmem:[#allocation5 + $0x1008] sm:$0xff] %v1560_v5  ;;  %2585 = vst [vmem:[#allocation5 + $0x1010] sm:$0xff] %v1561_v6  ;;  %v1563_v11 = vmul.f32 0.23570226, %v539_v8  ;;  %v1564_v12 = vmul.f32 0.23570226, %v540_v9 }
 0x168   :  { %2586 = vst [vmem:[#allocation5 + $0x1018] sm:$0xff] %v1562_v7  ;;  %v1565_v13 = vmul.f32 0.23570226, %v541_v10  ;;  %v542_v14 = vld [vmem:[#allocation2 + $0x1038] sm:$0xff]  ;;  %v543_v15 = vld [vmem:[#allocation2 + $0x1040] sm:$0xff]  ;;  %v544_v16 = vld [vmem:[#allocation2 + $0x1048] sm:$0xff] }
 0x169   :  { %2587 = vst [vmem:[#allocation5 + $0x1020] sm:$0xff] %v1563_v11  ;;  %2588 = vst [vmem:[#allocation5 + $0x1028] sm:$0xff] %v1564_v12  ;;  %v1566_v17 = vmul.f32 0.23570226, %v542_v14  ;;  %v1567_v18 = vmul.f32 0.23570226, %v543_v15 }
 0x16a   :  { %2589 = vst [vmem:[#allocation5 + $0x1030] sm:$0xff] %v1565_v13  ;;  %v1568_v19 = vmul.f32 0.23570226, %v544_v16  ;;  %v545_v20 = vld [vmem:[#allocation2 + $0x1050] sm:$0xff]  ;;  %v546_v21 = vld [vmem:[#allocation2 + $0x1058] sm:$0xff]  ;;  %v547_v22 = vld [vmem:[#allocation2 + $0x1060] sm:$0xff] }
 0x16b   :  { %2590 = vst [vmem:[#allocation5 + $0x1038] sm:$0xff] %v1566_v17  ;;  %2591 = vst [vmem:[#allocation5 + $0x1040] sm:$0xff] %v1567_v18  ;;  %v1569_v23 = vmul.f32 0.23570226, %v545_v20  ;;  %v1570_v24 = vmul.f32 0.23570226, %v546_v21 }
 0x16c   :  { %2592 = vst [vmem:[#allocation5 + $0x1048] sm:$0xff] %v1568_v19  ;;  %v1571_v25 = vmul.f32 0.23570226, %v547_v22  ;;  %v548_v26 = vld [vmem:[#allocation2 + $0x1068] sm:$0xff]  ;;  %v549_v27 = vld [vmem:[#allocation2 + $0x1070] sm:$0xff]  ;;  %v550_v28 = vld [vmem:[#allocation2 + $0x1078] sm:$0xff] }
 0x16d   :  { %2593 = vst [vmem:[#allocation5 + $0x1050] sm:$0xff] %v1569_v23  ;;  %2594 = vst [vmem:[#allocation5 + $0x1058] sm:$0xff] %v1570_v24  ;;  %v1572_v29 = vmul.f32 0.23570226, %v548_v26  ;;  %v1573_v30 = vmul.f32 0.23570226, %v549_v27 }
 0x16e   :  { %2595 = vst [vmem:[#allocation5 + $0x1060] sm:$0xff] %v1571_v25  ;;  %v1574_v31 = vmul.f32 0.23570226, %v550_v28  ;;  %v551_v32 = vld [vmem:[#allocation2 + $0x1080] sm:$0xff]  ;;  %v552_v33 = vld [vmem:[#allocation2 + $0x1088] sm:$0xff]  ;;  %v553_v34 = vld [vmem:[#allocation2 + $0x1090] sm:$0xff] }
 0x16f   :  { %2596 = vst [vmem:[#allocation5 + $0x1068] sm:$0xff] %v1572_v29  ;;  %2597 = vst [vmem:[#allocation5 + $0x1070] sm:$0xff] %v1573_v30  ;;  %v1575_v35 = vmul.f32 0.23570226, %v551_v32  ;;  %v1576_v36 = vmul.f32 0.23570226, %v552_v33 }
 0x170   :  { %2598 = vst [vmem:[#allocation5 + $0x1078] sm:$0xff] %v1574_v31  ;;  %v1577_v37 = vmul.f32 0.23570226, %v553_v34  ;;  %v554_v38 = vld [vmem:[#allocation2 + $0x1098] sm:$0xff]  ;;  %v555_v39 = vld [vmem:[#allocation2 + $0x10a0] sm:$0xff]  ;;  %v556_v40 = vld [vmem:[#allocation2 + $0x10a8] sm:$0xff] }
 0x171   :  { %2599 = vst [vmem:[#allocation5 + $0x1080] sm:$0xff] %v1575_v35  ;;  %2600 = vst [vmem:[#allocation5 + $0x1088] sm:$0xff] %v1576_v36  ;;  %v1578_v41 = vmul.f32 0.23570226, %v554_v38  ;;  %v1579_v42 = vmul.f32 0.23570226, %v555_v39 }
 0x172   :  { %2601 = vst [vmem:[#allocation5 + $0x1090] sm:$0xff] %v1577_v37  ;;  %v1580_v43 = vmul.f32 0.23570226, %v556_v40  ;;  %v557_v44 = vld [vmem:[#allocation2 + $0x10b0] sm:$0xff]  ;;  %v558_v45 = vld [vmem:[#allocation2 + $0x10b8] sm:$0xff]  ;;  %v559_v46 = vld [vmem:[#allocation2 + $0x10c0] sm:$0xff] }
 0x173   :  { %2602 = vst [vmem:[#allocation5 + $0x1098] sm:$0xff] %v1578_v41  ;;  %2603 = vst [vmem:[#allocation5 + $0x10a0] sm:$0xff] %v1579_v42  ;;  %v1581_v47 = vmul.f32 0.23570226, %v557_v44  ;;  %v1582_v48 = vmul.f32 0.23570226, %v558_v45 }
 0x174   :  { %2604 = vst [vmem:[#allocation5 + $0x10a8] sm:$0xff] %v1580_v43  ;;  %v1583_v49 = vmul.f32 0.23570226, %v559_v46  ;;  %v560_v50 = vld [vmem:[#allocation2 + $0x10c8] sm:$0xff]  ;;  %v561_v51 = vld [vmem:[#allocation2 + $0x10d0] sm:$0xff]  ;;  %v562_v52 = vld [vmem:[#allocation2 + $0x10d8] sm:$0xff] }
 0x175   :  { %2605 = vst [vmem:[#allocation5 + $0x10b0] sm:$0xff] %v1581_v47  ;;  %2606 = vst [vmem:[#allocation5 + $0x10b8] sm:$0xff] %v1582_v48  ;;  %v1584_v53 = vmul.f32 0.23570226, %v560_v50  ;;  %v1585_v54 = vmul.f32 0.23570226, %v561_v51 }
 0x176   :  { %2607 = vst [vmem:[#allocation5 + $0x10c0] sm:$0xff] %v1583_v49  ;;  %v1586_v55 = vmul.f32 0.23570226, %v562_v52  ;;  %v563_v56 = vld [vmem:[#allocation2 + $0x10e0] sm:$0xff]  ;;  %v564_v57 = vld [vmem:[#allocation2 + $0x10e8] sm:$0xff]  ;;  %v565_v58 = vld [vmem:[#allocation2 + $0x10f0] sm:$0xff] }
 0x177   :  { %2608 = vst [vmem:[#allocation5 + $0x10c8] sm:$0xff] %v1584_v53  ;;  %2609 = vst [vmem:[#allocation5 + $0x10d0] sm:$0xff] %v1585_v54  ;;  %v1587_v59 = vmul.f32 0.23570226, %v563_v56  ;;  %v1588_v60 = vmul.f32 0.23570226, %v564_v57 }
 0x178   :  { %2610 = vst [vmem:[#allocation5 + $0x10d8] sm:$0xff] %v1586_v55  ;;  %v1589_v61 = vmul.f32 0.23570226, %v565_v58  ;;  %v566_v62 = vld [vmem:[#allocation2 + $0x10f8] sm:$0xff]  ;;  %v567_v63 = vld [vmem:[#allocation2 + $0x1100] sm:$0xff]  ;;  %v568_v0 = vld [vmem:[#allocation2 + $0x1108] sm:$0xff] }
 0x179   :  { %2611 = vst [vmem:[#allocation5 + $0x10e0] sm:$0xff] %v1587_v59  ;;  %2612 = vst [vmem:[#allocation5 + $0x10e8] sm:$0xff] %v1588_v60  ;;  %v1590_v1 = vmul.f32 0.23570226, %v566_v62  ;;  %v1591_v2 = vmul.f32 0.23570226, %v567_v63 }
 0x17a   :  { %2613 = vst [vmem:[#allocation5 + $0x10f0] sm:$0xff] %v1589_v61  ;;  %v1592_v3 = vmul.f32 0.23570226, %v568_v0  ;;  %v569_v4 = vld [vmem:[#allocation2 + $0x1110] sm:$0xff]  ;;  %v570_v5 = vld [vmem:[#allocation2 + $0x1118] sm:$0xff]  ;;  %v571_v6 = vld [vmem:[#allocation2 + $0x1120] sm:$0xff] }
 0x17b   :  { %2614 = vst [vmem:[#allocation5 + $0x10f8] sm:$0xff] %v1590_v1  ;;  %2615 = vst [vmem:[#allocation5 + $0x1100] sm:$0xff] %v1591_v2  ;;  %v1593_v7 = vmul.f32 0.23570226, %v569_v4  ;;  %v1594_v8 = vmul.f32 0.23570226, %v570_v5 }
 0x17c   :  { %2616 = vst [vmem:[#allocation5 + $0x1108] sm:$0xff] %v1592_v3  ;;  %v1595_v9 = vmul.f32 0.23570226, %v571_v6  ;;  %v572_v10 = vld [vmem:[#allocation2 + $0x1128] sm:$0xff]  ;;  %v573_v11 = vld [vmem:[#allocation2 + $0x1130] sm:$0xff]  ;;  %v574_v12 = vld [vmem:[#allocation2 + $0x1138] sm:$0xff] }
 0x17d   :  { %2617 = vst [vmem:[#allocation5 + $0x1110] sm:$0xff] %v1593_v7  ;;  %2618 = vst [vmem:[#allocation5 + $0x1118] sm:$0xff] %v1594_v8  ;;  %v1596_v13 = vmul.f32 0.23570226, %v572_v10  ;;  %v1597_v14 = vmul.f32 0.23570226, %v573_v11 }
 0x17e   :  { %2619 = vst [vmem:[#allocation5 + $0x1120] sm:$0xff] %v1595_v9  ;;  %v1598_v15 = vmul.f32 0.23570226, %v574_v12  ;;  %v575_v16 = vld [vmem:[#allocation2 + $0x1140] sm:$0xff]  ;;  %v576_v17 = vld [vmem:[#allocation2 + $0x1148] sm:$0xff]  ;;  %v577_v18 = vld [vmem:[#allocation2 + $0x1150] sm:$0xff] }
 0x17f   :  { %2620 = vst [vmem:[#allocation5 + $0x1128] sm:$0xff] %v1596_v13  ;;  %2621 = vst [vmem:[#allocation5 + $0x1130] sm:$0xff] %v1597_v14  ;;  %v1599_v19 = vmul.f32 0.23570226, %v575_v16  ;;  %v1600_v20 = vmul.f32 0.23570226, %v576_v17 }
 0x180   :  { %2622 = vst [vmem:[#allocation5 + $0x1138] sm:$0xff] %v1598_v15  ;;  %v1601_v21 = vmul.f32 0.23570226, %v577_v18  ;;  %v578_v22 = vld [vmem:[#allocation2 + $0x1158] sm:$0xff]  ;;  %v579_v23 = vld [vmem:[#allocation2 + $0x1160] sm:$0xff]  ;;  %v580_v24 = vld [vmem:[#allocation2 + $0x1168] sm:$0xff] }
 0x181   :  { %2623 = vst [vmem:[#allocation5 + $0x1140] sm:$0xff] %v1599_v19  ;;  %2624 = vst [vmem:[#allocation5 + $0x1148] sm:$0xff] %v1600_v20  ;;  %v1602_v25 = vmul.f32 0.23570226, %v578_v22  ;;  %v1603_v26 = vmul.f32 0.23570226, %v579_v23 }
 0x182   :  { %2625 = vst [vmem:[#allocation5 + $0x1150] sm:$0xff] %v1601_v21  ;;  %v1604_v27 = vmul.f32 0.23570226, %v580_v24  ;;  %v581_v28 = vld [vmem:[#allocation2 + $0x1170] sm:$0xff]  ;;  %v582_v29 = vld [vmem:[#allocation2 + $0x1178] sm:$0xff]  ;;  %v583_v30 = vld [vmem:[#allocation2 + $0x1180] sm:$0xff] }
 0x183   :  { %2626 = vst [vmem:[#allocation5 + $0x1158] sm:$0xff] %v1602_v25  ;;  %2627 = vst [vmem:[#allocation5 + $0x1160] sm:$0xff] %v1603_v26  ;;  %v1605_v31 = vmul.f32 0.23570226, %v581_v28  ;;  %v1606_v32 = vmul.f32 0.23570226, %v582_v29 }
 0x184   :  { %2628 = vst [vmem:[#allocation5 + $0x1168] sm:$0xff] %v1604_v27  ;;  %v1607_v33 = vmul.f32 0.23570226, %v583_v30  ;;  %v584_v34 = vld [vmem:[#allocation2 + $0x1188] sm:$0xff]  ;;  %v585_v35 = vld [vmem:[#allocation2 + $0x1190] sm:$0xff]  ;;  %v586_v36 = vld [vmem:[#allocation2 + $0x1198] sm:$0xff] }
 0x185   :  { %2629 = vst [vmem:[#allocation5 + $0x1170] sm:$0xff] %v1605_v31  ;;  %2630 = vst [vmem:[#allocation5 + $0x1178] sm:$0xff] %v1606_v32  ;;  %v1608_v37 = vmul.f32 0.23570226, %v584_v34  ;;  %v1609_v38 = vmul.f32 0.23570226, %v585_v35 }
 0x186   :  { %2631 = vst [vmem:[#allocation5 + $0x1180] sm:$0xff] %v1607_v33  ;;  %v1610_v39 = vmul.f32 0.23570226, %v586_v36  ;;  %v587_v40 = vld [vmem:[#allocation2 + $0x11a0] sm:$0xff]  ;;  %v588_v41 = vld [vmem:[#allocation2 + $0x11a8] sm:$0xff]  ;;  %v589_v42 = vld [vmem:[#allocation2 + $0x11b0] sm:$0xff] }
 0x187   :  { %2632 = vst [vmem:[#allocation5 + $0x1188] sm:$0xff] %v1608_v37  ;;  %2633 = vst [vmem:[#allocation5 + $0x1190] sm:$0xff] %v1609_v38  ;;  %v1611_v43 = vmul.f32 0.23570226, %v587_v40  ;;  %v1612_v44 = vmul.f32 0.23570226, %v588_v41 }
 0x188   :  { %2634 = vst [vmem:[#allocation5 + $0x1198] sm:$0xff] %v1610_v39  ;;  %v1613_v45 = vmul.f32 0.23570226, %v589_v42  ;;  %v590_v46 = vld [vmem:[#allocation2 + $0x11b8] sm:$0xff]  ;;  %v591_v47 = vld [vmem:[#allocation2 + $0x11c0] sm:$0xff]  ;;  %v592_v48 = vld [vmem:[#allocation2 + $0x11c8] sm:$0xff] }
 0x189   :  { %2635 = vst [vmem:[#allocation5 + $0x11a0] sm:$0xff] %v1611_v43  ;;  %2636 = vst [vmem:[#allocation5 + $0x11a8] sm:$0xff] %v1612_v44  ;;  %v1614_v49 = vmul.f32 0.23570226, %v590_v46  ;;  %v1615_v50 = vmul.f32 0.23570226, %v591_v47 }
 0x18a   :  { %2637 = vst [vmem:[#allocation5 + $0x11b0] sm:$0xff] %v1613_v45  ;;  %v1616_v51 = vmul.f32 0.23570226, %v592_v48  ;;  %v593_v52 = vld [vmem:[#allocation2 + $0x11d0] sm:$0xff]  ;;  %v594_v53 = vld [vmem:[#allocation2 + $0x11d8] sm:$0xff]  ;;  %v595_v54 = vld [vmem:[#allocation2 + $0x11e0] sm:$0xff] }
 0x18b   :  { %2638 = vst [vmem:[#allocation5 + $0x11b8] sm:$0xff] %v1614_v49  ;;  %2639 = vst [vmem:[#allocation5 + $0x11c0] sm:$0xff] %v1615_v50  ;;  %v1617_v55 = vmul.f32 0.23570226, %v593_v52  ;;  %v1618_v56 = vmul.f32 0.23570226, %v594_v53 }
 0x18c   :  { %2640 = vst [vmem:[#allocation5 + $0x11c8] sm:$0xff] %v1616_v51  ;;  %v1619_v57 = vmul.f32 0.23570226, %v595_v54  ;;  %v596_v58 = vld [vmem:[#allocation2 + $0x11e8] sm:$0xff]  ;;  %v597_v59 = vld [vmem:[#allocation2 + $0x11f0] sm:$0xff]  ;;  %v598_v60 = vld [vmem:[#allocation2 + $0x11f8] sm:$0xff] }
 0x18d   :  { %2641 = vst [vmem:[#allocation5 + $0x11d0] sm:$0xff] %v1617_v55  ;;  %2642 = vst [vmem:[#allocation5 + $0x11d8] sm:$0xff] %v1618_v56  ;;  %v1620_v61 = vmul.f32 0.23570226, %v596_v58  ;;  %v1621_v62 = vmul.f32 0.23570226, %v597_v59 }
 0x18e   :  { %2643 = vst [vmem:[#allocation5 + $0x11e0] sm:$0xff] %v1619_v57  ;;  %v1622_v63 = vmul.f32 0.23570226, %v598_v60  ;;  %v599_v0 = vld [vmem:[#allocation2 + $0x1200] sm:$0xff]  ;;  %v600_v1 = vld [vmem:[#allocation2 + $0x1208] sm:$0xff]  ;;  %v601_v2 = vld [vmem:[#allocation2 + $0x1210] sm:$0xff] }
 0x18f   :  { %2644 = vst [vmem:[#allocation5 + $0x11e8] sm:$0xff] %v1620_v61  ;;  %2645 = vst [vmem:[#allocation5 + $0x11f0] sm:$0xff] %v1621_v62  ;;  %v1623_v3 = vmul.f32 0.23570226, %v599_v0  ;;  %v1624_v4 = vmul.f32 0.23570226, %v600_v1 }
 0x190   :  { %2646 = vst [vmem:[#allocation5 + $0x11f8] sm:$0xff] %v1622_v63  ;;  %v1625_v5 = vmul.f32 0.23570226, %v601_v2  ;;  %v602_v6 = vld [vmem:[#allocation2 + $0x1218] sm:$0xff]  ;;  %v603_v7 = vld [vmem:[#allocation2 + $0x1220] sm:$0xff]  ;;  %v604_v8 = vld [vmem:[#allocation2 + $0x1228] sm:$0xff] }
 0x191   :  { %2647 = vst [vmem:[#allocation5 + $0x1200] sm:$0xff] %v1623_v3  ;;  %2648 = vst [vmem:[#allocation5 + $0x1208] sm:$0xff] %v1624_v4  ;;  %v1626_v9 = vmul.f32 0.23570226, %v602_v6  ;;  %v1627_v10 = vmul.f32 0.23570226, %v603_v7 }
 0x192   :  { %2649 = vst [vmem:[#allocation5 + $0x1210] sm:$0xff] %v1625_v5  ;;  %v1628_v11 = vmul.f32 0.23570226, %v604_v8  ;;  %v605_v12 = vld [vmem:[#allocation2 + $0x1230] sm:$0xff]  ;;  %v606_v13 = vld [vmem:[#allocation2 + $0x1238] sm:$0xff]  ;;  %v607_v14 = vld [vmem:[#allocation2 + $0x1240] sm:$0xff] }
 0x193   :  { %2650 = vst [vmem:[#allocation5 + $0x1218] sm:$0xff] %v1626_v9  ;;  %2651 = vst [vmem:[#allocation5 + $0x1220] sm:$0xff] %v1627_v10  ;;  %v1629_v15 = vmul.f32 0.23570226, %v605_v12  ;;  %v1630_v16 = vmul.f32 0.23570226, %v606_v13 }
 0x194   :  { %2652 = vst [vmem:[#allocation5 + $0x1228] sm:$0xff] %v1628_v11  ;;  %v1631_v17 = vmul.f32 0.23570226, %v607_v14  ;;  %v608_v18 = vld [vmem:[#allocation2 + $0x1248] sm:$0xff]  ;;  %v609_v19 = vld [vmem:[#allocation2 + $0x1250] sm:$0xff]  ;;  %v610_v20 = vld [vmem:[#allocation2 + $0x1258] sm:$0xff] }
 0x195   :  { %2653 = vst [vmem:[#allocation5 + $0x1230] sm:$0xff] %v1629_v15  ;;  %2654 = vst [vmem:[#allocation5 + $0x1238] sm:$0xff] %v1630_v16  ;;  %v1632_v21 = vmul.f32 0.23570226, %v608_v18  ;;  %v1633_v22 = vmul.f32 0.23570226, %v609_v19 }
 0x196   :  { %2655 = vst [vmem:[#allocation5 + $0x1240] sm:$0xff] %v1631_v17  ;;  %v1634_v23 = vmul.f32 0.23570226, %v610_v20  ;;  %v611_v24 = vld [vmem:[#allocation2 + $0x1260] sm:$0xff]  ;;  %v612_v25 = vld [vmem:[#allocation2 + $0x1268] sm:$0xff]  ;;  %v613_v26 = vld [vmem:[#allocation2 + $0x1270] sm:$0xff] }
 0x197   :  { %2656 = vst [vmem:[#allocation5 + $0x1248] sm:$0xff] %v1632_v21  ;;  %2657 = vst [vmem:[#allocation5 + $0x1250] sm:$0xff] %v1633_v22  ;;  %v1635_v27 = vmul.f32 0.23570226, %v611_v24  ;;  %v1636_v28 = vmul.f32 0.23570226, %v612_v25 }
 0x198   :  { %2658 = vst [vmem:[#allocation5 + $0x1258] sm:$0xff] %v1634_v23  ;;  %v1637_v29 = vmul.f32 0.23570226, %v613_v26  ;;  %v614_v30 = vld [vmem:[#allocation2 + $0x1278] sm:$0xff]  ;;  %v615_v31 = vld [vmem:[#allocation2 + $0x1280] sm:$0xff]  ;;  %v616_v32 = vld [vmem:[#allocation2 + $0x1288] sm:$0xff] }
 0x199   :  { %2659 = vst [vmem:[#allocation5 + $0x1260] sm:$0xff] %v1635_v27  ;;  %2660 = vst [vmem:[#allocation5 + $0x1268] sm:$0xff] %v1636_v28  ;;  %v1638_v33 = vmul.f32 0.23570226, %v614_v30  ;;  %v1639_v34 = vmul.f32 0.23570226, %v615_v31 }
 0x19a   :  { %2661 = vst [vmem:[#allocation5 + $0x1270] sm:$0xff] %v1637_v29  ;;  %v1640_v35 = vmul.f32 0.23570226, %v616_v32  ;;  %v617_v36 = vld [vmem:[#allocation2 + $0x1290] sm:$0xff]  ;;  %v618_v37 = vld [vmem:[#allocation2 + $0x1298] sm:$0xff]  ;;  %v619_v38 = vld [vmem:[#allocation2 + $0x12a0] sm:$0xff] }
 0x19b   :  { %2662 = vst [vmem:[#allocation5 + $0x1278] sm:$0xff] %v1638_v33  ;;  %2663 = vst [vmem:[#allocation5 + $0x1280] sm:$0xff] %v1639_v34  ;;  %v1641_v39 = vmul.f32 0.23570226, %v617_v36  ;;  %v1642_v40 = vmul.f32 0.23570226, %v618_v37 }
 0x19c   :  { %2664 = vst [vmem:[#allocation5 + $0x1288] sm:$0xff] %v1640_v35  ;;  %v1643_v41 = vmul.f32 0.23570226, %v619_v38  ;;  %v620_v42 = vld [vmem:[#allocation2 + $0x12a8] sm:$0xff]  ;;  %v621_v43 = vld [vmem:[#allocation2 + $0x12b0] sm:$0xff]  ;;  %v622_v44 = vld [vmem:[#allocation2 + $0x12b8] sm:$0xff] }
 0x19d   :  { %2665 = vst [vmem:[#allocation5 + $0x1290] sm:$0xff] %v1641_v39  ;;  %2666 = vst [vmem:[#allocation5 + $0x1298] sm:$0xff] %v1642_v40  ;;  %v1644_v45 = vmul.f32 0.23570226, %v620_v42  ;;  %v1645_v46 = vmul.f32 0.23570226, %v621_v43 }
 0x19e   :  { %2667 = vst [vmem:[#allocation5 + $0x12a0] sm:$0xff] %v1643_v41  ;;  %v1646_v47 = vmul.f32 0.23570226, %v622_v44  ;;  %v623_v48 = vld [vmem:[#allocation2 + $0x12c0] sm:$0xff]  ;;  %v624_v49 = vld [vmem:[#allocation2 + $0x12c8] sm:$0xff]  ;;  %v625_v50 = vld [vmem:[#allocation2 + $0x12d0] sm:$0xff] }
 0x19f   :  { %2668 = vst [vmem:[#allocation5 + $0x12a8] sm:$0xff] %v1644_v45  ;;  %2669 = vst [vmem:[#allocation5 + $0x12b0] sm:$0xff] %v1645_v46  ;;  %v1647_v51 = vmul.f32 0.23570226, %v623_v48  ;;  %v1648_v52 = vmul.f32 0.23570226, %v624_v49 }
 0x1a0   :  { %2670 = vst [vmem:[#allocation5 + $0x12b8] sm:$0xff] %v1646_v47  ;;  %v1649_v53 = vmul.f32 0.23570226, %v625_v50  ;;  %v626_v54 = vld [vmem:[#allocation2 + $0x12d8] sm:$0xff]  ;;  %v627_v55 = vld [vmem:[#allocation2 + $0x12e0] sm:$0xff]  ;;  %v628_v56 = vld [vmem:[#allocation2 + $0x12e8] sm:$0xff] }
 0x1a1   :  { %2671 = vst [vmem:[#allocation5 + $0x12c0] sm:$0xff] %v1647_v51  ;;  %2672 = vst [vmem:[#allocation5 + $0x12c8] sm:$0xff] %v1648_v52  ;;  %v1650_v57 = vmul.f32 0.23570226, %v626_v54  ;;  %v1651_v58 = vmul.f32 0.23570226, %v627_v55 }
 0x1a2   :  { %2673 = vst [vmem:[#allocation5 + $0x12d0] sm:$0xff] %v1649_v53  ;;  %v1652_v59 = vmul.f32 0.23570226, %v628_v56  ;;  %v629_v60 = vld [vmem:[#allocation2 + $0x12f0] sm:$0xff]  ;;  %v630_v61 = vld [vmem:[#allocation2 + $0x12f8] sm:$0xff]  ;;  %v631_v62 = vld [vmem:[#allocation2 + $0x1300] sm:$0xff] }
 0x1a3   :  { %2674 = vst [vmem:[#allocation5 + $0x12d8] sm:$0xff] %v1650_v57  ;;  %2675 = vst [vmem:[#allocation5 + $0x12e0] sm:$0xff] %v1651_v58  ;;  %v1653_v63 = vmul.f32 0.23570226, %v629_v60  ;;  %v1654_v0 = vmul.f32 0.23570226, %v630_v61 }
 0x1a4   :  { %2676 = vst [vmem:[#allocation5 + $0x12e8] sm:$0xff] %v1652_v59  ;;  %v1655_v1 = vmul.f32 0.23570226, %v631_v62  ;;  %v632_v2 = vld [vmem:[#allocation2 + $0x1308] sm:$0xff]  ;;  %v633_v3 = vld [vmem:[#allocation2 + $0x1310] sm:$0xff]  ;;  %v634_v4 = vld [vmem:[#allocation2 + $0x1318] sm:$0xff] }
 0x1a5   :  { %2677 = vst [vmem:[#allocation5 + $0x12f0] sm:$0xff] %v1653_v63  ;;  %2678 = vst [vmem:[#allocation5 + $0x12f8] sm:$0xff] %v1654_v0  ;;  %v1656_v5 = vmul.f32 0.23570226, %v632_v2  ;;  %v1657_v6 = vmul.f32 0.23570226, %v633_v3 }
 0x1a6   :  { %2679 = vst [vmem:[#allocation5 + $0x1300] sm:$0xff] %v1655_v1  ;;  %v1658_v7 = vmul.f32 0.23570226, %v634_v4  ;;  %v635_v8 = vld [vmem:[#allocation2 + $0x1320] sm:$0xff]  ;;  %v636_v9 = vld [vmem:[#allocation2 + $0x1328] sm:$0xff]  ;;  %v637_v10 = vld [vmem:[#allocation2 + $0x1330] sm:$0xff] }
 0x1a7   :  { %2680 = vst [vmem:[#allocation5 + $0x1308] sm:$0xff] %v1656_v5  ;;  %2681 = vst [vmem:[#allocation5 + $0x1310] sm:$0xff] %v1657_v6  ;;  %v1659_v11 = vmul.f32 0.23570226, %v635_v8  ;;  %v1660_v12 = vmul.f32 0.23570226, %v636_v9 }
 0x1a8   :  { %2682 = vst [vmem:[#allocation5 + $0x1318] sm:$0xff] %v1658_v7  ;;  %v1661_v13 = vmul.f32 0.23570226, %v637_v10  ;;  %v638_v14 = vld [vmem:[#allocation2 + $0x1338] sm:$0xff]  ;;  %v639_v15 = vld [vmem:[#allocation2 + $0x1340] sm:$0xff]  ;;  %v640_v16 = vld [vmem:[#allocation2 + $0x1348] sm:$0xff] }
 0x1a9   :  { %2683 = vst [vmem:[#allocation5 + $0x1320] sm:$0xff] %v1659_v11  ;;  %2684 = vst [vmem:[#allocation5 + $0x1328] sm:$0xff] %v1660_v12  ;;  %v1662_v17 = vmul.f32 0.23570226, %v638_v14  ;;  %v1663_v18 = vmul.f32 0.23570226, %v639_v15 }
 0x1aa   :  { %2685 = vst [vmem:[#allocation5 + $0x1330] sm:$0xff] %v1661_v13  ;;  %v1664_v19 = vmul.f32 0.23570226, %v640_v16  ;;  %v641_v20 = vld [vmem:[#allocation2 + $0x1350] sm:$0xff]  ;;  %v642_v21 = vld [vmem:[#allocation2 + $0x1358] sm:$0xff]  ;;  %v643_v22 = vld [vmem:[#allocation2 + $0x1360] sm:$0xff] }
 0x1ab   :  { %2686 = vst [vmem:[#allocation5 + $0x1338] sm:$0xff] %v1662_v17  ;;  %2687 = vst [vmem:[#allocation5 + $0x1340] sm:$0xff] %v1663_v18  ;;  %v1665_v23 = vmul.f32 0.23570226, %v641_v20  ;;  %v1666_v24 = vmul.f32 0.23570226, %v642_v21 }
 0x1ac   :  { %2688 = vst [vmem:[#allocation5 + $0x1348] sm:$0xff] %v1664_v19  ;;  %v1667_v25 = vmul.f32 0.23570226, %v643_v22  ;;  %v644_v26 = vld [vmem:[#allocation2 + $0x1368] sm:$0xff]  ;;  %v645_v27 = vld [vmem:[#allocation2 + $0x1370] sm:$0xff]  ;;  %v646_v28 = vld [vmem:[#allocation2 + $0x1378] sm:$0xff] }
 0x1ad   :  { %2689 = vst [vmem:[#allocation5 + $0x1350] sm:$0xff] %v1665_v23  ;;  %2690 = vst [vmem:[#allocation5 + $0x1358] sm:$0xff] %v1666_v24  ;;  %v1668_v29 = vmul.f32 0.23570226, %v644_v26  ;;  %v1669_v30 = vmul.f32 0.23570226, %v645_v27 }
 0x1ae   :  { %2691 = vst [vmem:[#allocation5 + $0x1360] sm:$0xff] %v1667_v25  ;;  %v1670_v31 = vmul.f32 0.23570226, %v646_v28  ;;  %v647_v32 = vld [vmem:[#allocation2 + $0x1380] sm:$0xff]  ;;  %v648_v33 = vld [vmem:[#allocation2 + $0x1388] sm:$0xff]  ;;  %v649_v34 = vld [vmem:[#allocation2 + $0x1390] sm:$0xff] }
 0x1af   :  { %2692 = vst [vmem:[#allocation5 + $0x1368] sm:$0xff] %v1668_v29  ;;  %2693 = vst [vmem:[#allocation5 + $0x1370] sm:$0xff] %v1669_v30  ;;  %v1671_v35 = vmul.f32 0.23570226, %v647_v32  ;;  %v1672_v36 = vmul.f32 0.23570226, %v648_v33 }
 0x1b0   :  { %2694 = vst [vmem:[#allocation5 + $0x1378] sm:$0xff] %v1670_v31  ;;  %v1673_v37 = vmul.f32 0.23570226, %v649_v34  ;;  %v650_v38 = vld [vmem:[#allocation2 + $0x1398] sm:$0xff]  ;;  %v651_v39 = vld [vmem:[#allocation2 + $0x13a0] sm:$0xff]  ;;  %v652_v40 = vld [vmem:[#allocation2 + $0x13a8] sm:$0xff] }
 0x1b1   :  { %2695 = vst [vmem:[#allocation5 + $0x1380] sm:$0xff] %v1671_v35  ;;  %2696 = vst [vmem:[#allocation5 + $0x1388] sm:$0xff] %v1672_v36  ;;  %v1674_v41 = vmul.f32 0.23570226, %v650_v38  ;;  %v1675_v42 = vmul.f32 0.23570226, %v651_v39 }
 0x1b2   :  { %2697 = vst [vmem:[#allocation5 + $0x1390] sm:$0xff] %v1673_v37  ;;  %v1676_v43 = vmul.f32 0.23570226, %v652_v40  ;;  %v653_v44 = vld [vmem:[#allocation2 + $0x13b0] sm:$0xff]  ;;  %v654_v45 = vld [vmem:[#allocation2 + $0x13b8] sm:$0xff]  ;;  %v655_v46 = vld [vmem:[#allocation2 + $0x13c0] sm:$0xff] }
 0x1b3   :  { %2698 = vst [vmem:[#allocation5 + $0x1398] sm:$0xff] %v1674_v41  ;;  %2699 = vst [vmem:[#allocation5 + $0x13a0] sm:$0xff] %v1675_v42  ;;  %v1677_v47 = vmul.f32 0.23570226, %v653_v44  ;;  %v1678_v48 = vmul.f32 0.23570226, %v654_v45 }
 0x1b4   :  { %2700 = vst [vmem:[#allocation5 + $0x13a8] sm:$0xff] %v1676_v43  ;;  %v1679_v49 = vmul.f32 0.23570226, %v655_v46  ;;  %v656_v50 = vld [vmem:[#allocation2 + $0x13c8] sm:$0xff]  ;;  %v657_v51 = vld [vmem:[#allocation2 + $0x13d0] sm:$0xff]  ;;  %v658_v52 = vld [vmem:[#allocation2 + $0x13d8] sm:$0xff] }
 0x1b5   :  { %2701 = vst [vmem:[#allocation5 + $0x13b0] sm:$0xff] %v1677_v47  ;;  %2702 = vst [vmem:[#allocation5 + $0x13b8] sm:$0xff] %v1678_v48  ;;  %v1680_v53 = vmul.f32 0.23570226, %v656_v50  ;;  %v1681_v54 = vmul.f32 0.23570226, %v657_v51 }
 0x1b6   :  { %2703 = vst [vmem:[#allocation5 + $0x13c0] sm:$0xff] %v1679_v49  ;;  %v1682_v55 = vmul.f32 0.23570226, %v658_v52  ;;  %v659_v56 = vld [vmem:[#allocation2 + $0x13e0] sm:$0xff]  ;;  %v660_v57 = vld [vmem:[#allocation2 + $0x13e8] sm:$0xff]  ;;  %v661_v58 = vld [vmem:[#allocation2 + $0x13f0] sm:$0xff] }
 0x1b7   :  { %2704 = vst [vmem:[#allocation5 + $0x13c8] sm:$0xff] %v1680_v53  ;;  %2705 = vst [vmem:[#allocation5 + $0x13d0] sm:$0xff] %v1681_v54  ;;  %v1683_v59 = vmul.f32 0.23570226, %v659_v56  ;;  %v1684_v60 = vmul.f32 0.23570226, %v660_v57 }
 0x1b8   :  { %2706 = vst [vmem:[#allocation5 + $0x13d8] sm:$0xff] %v1682_v55  ;;  %v1685_v61 = vmul.f32 0.23570226, %v661_v58  ;;  %v662_v62 = vld [vmem:[#allocation2 + $0x13f8] sm:$0xff]  ;;  %v663_v63 = vld [vmem:[#allocation2 + $0x1400] sm:$0xff]  ;;  %v664_v0 = vld [vmem:[#allocation2 + $0x1408] sm:$0xff] }
 0x1b9   :  { %2707 = vst [vmem:[#allocation5 + $0x13e0] sm:$0xff] %v1683_v59  ;;  %2708 = vst [vmem:[#allocation5 + $0x13e8] sm:$0xff] %v1684_v60  ;;  %v1686_v1 = vmul.f32 0.23570226, %v662_v62  ;;  %v1687_v2 = vmul.f32 0.23570226, %v663_v63 }
 0x1ba   :  { %2709 = vst [vmem:[#allocation5 + $0x13f0] sm:$0xff] %v1685_v61  ;;  %v1688_v3 = vmul.f32 0.23570226, %v664_v0  ;;  %v665_v4 = vld [vmem:[#allocation2 + $0x1410] sm:$0xff]  ;;  %v666_v5 = vld [vmem:[#allocation2 + $0x1418] sm:$0xff]  ;;  %v667_v6 = vld [vmem:[#allocation2 + $0x1420] sm:$0xff] }
 0x1bb   :  { %2710 = vst [vmem:[#allocation5 + $0x13f8] sm:$0xff] %v1686_v1  ;;  %2711 = vst [vmem:[#allocation5 + $0x1400] sm:$0xff] %v1687_v2  ;;  %v1689_v7 = vmul.f32 0.23570226, %v665_v4  ;;  %v1690_v8 = vmul.f32 0.23570226, %v666_v5 }
 0x1bc   :  { %2712 = vst [vmem:[#allocation5 + $0x1408] sm:$0xff] %v1688_v3  ;;  %v1691_v9 = vmul.f32 0.23570226, %v667_v6  ;;  %v668_v10 = vld [vmem:[#allocation2 + $0x1428] sm:$0xff]  ;;  %v669_v11 = vld [vmem:[#allocation2 + $0x1430] sm:$0xff]  ;;  %v670_v12 = vld [vmem:[#allocation2 + $0x1438] sm:$0xff] }
 0x1bd   :  { %2713 = vst [vmem:[#allocation5 + $0x1410] sm:$0xff] %v1689_v7  ;;  %2714 = vst [vmem:[#allocation5 + $0x1418] sm:$0xff] %v1690_v8  ;;  %v1692_v13 = vmul.f32 0.23570226, %v668_v10  ;;  %v1693_v14 = vmul.f32 0.23570226, %v669_v11 }
 0x1be   :  { %2715 = vst [vmem:[#allocation5 + $0x1420] sm:$0xff] %v1691_v9  ;;  %v1694_v15 = vmul.f32 0.23570226, %v670_v12  ;;  %v671_v16 = vld [vmem:[#allocation2 + $0x1440] sm:$0xff]  ;;  %v672_v17 = vld [vmem:[#allocation2 + $0x1448] sm:$0xff]  ;;  %v673_v18 = vld [vmem:[#allocation2 + $0x1450] sm:$0xff] }
 0x1bf   :  { %2716 = vst [vmem:[#allocation5 + $0x1428] sm:$0xff] %v1692_v13  ;;  %2717 = vst [vmem:[#allocation5 + $0x1430] sm:$0xff] %v1693_v14  ;;  %v1695_v19 = vmul.f32 0.23570226, %v671_v16  ;;  %v1696_v20 = vmul.f32 0.23570226, %v672_v17 }
 0x1c0   :  { %2718 = vst [vmem:[#allocation5 + $0x1438] sm:$0xff] %v1694_v15  ;;  %v1697_v21 = vmul.f32 0.23570226, %v673_v18  ;;  %v674_v22 = vld [vmem:[#allocation2 + $0x1458] sm:$0xff]  ;;  %v675_v23 = vld [vmem:[#allocation2 + $0x1460] sm:$0xff]  ;;  %v676_v24 = vld [vmem:[#allocation2 + $0x1468] sm:$0xff] }
 0x1c1   :  { %2719 = vst [vmem:[#allocation5 + $0x1440] sm:$0xff] %v1695_v19  ;;  %2720 = vst [vmem:[#allocation5 + $0x1448] sm:$0xff] %v1696_v20  ;;  %v1698_v25 = vmul.f32 0.23570226, %v674_v22  ;;  %v1699_v26 = vmul.f32 0.23570226, %v675_v23 }
 0x1c2   :  { %2721 = vst [vmem:[#allocation5 + $0x1450] sm:$0xff] %v1697_v21  ;;  %v1700_v27 = vmul.f32 0.23570226, %v676_v24  ;;  %v677_v28 = vld [vmem:[#allocation2 + $0x1470] sm:$0xff]  ;;  %v678_v29 = vld [vmem:[#allocation2 + $0x1478] sm:$0xff]  ;;  %v679_v30 = vld [vmem:[#allocation2 + $0x1480] sm:$0xff] }
 0x1c3   :  { %2722 = vst [vmem:[#allocation5 + $0x1458] sm:$0xff] %v1698_v25  ;;  %2723 = vst [vmem:[#allocation5 + $0x1460] sm:$0xff] %v1699_v26  ;;  %v1701_v31 = vmul.f32 0.23570226, %v677_v28  ;;  %v1702_v32 = vmul.f32 0.23570226, %v678_v29 }
 0x1c4   :  { %2724 = vst [vmem:[#allocation5 + $0x1468] sm:$0xff] %v1700_v27  ;;  %v1703_v33 = vmul.f32 0.23570226, %v679_v30  ;;  %v680_v34 = vld [vmem:[#allocation2 + $0x1488] sm:$0xff]  ;;  %v681_v35 = vld [vmem:[#allocation2 + $0x1490] sm:$0xff]  ;;  %v682_v36 = vld [vmem:[#allocation2 + $0x1498] sm:$0xff] }
 0x1c5   :  { %2725 = vst [vmem:[#allocation5 + $0x1470] sm:$0xff] %v1701_v31  ;;  %2726 = vst [vmem:[#allocation5 + $0x1478] sm:$0xff] %v1702_v32  ;;  %v1704_v37 = vmul.f32 0.23570226, %v680_v34  ;;  %v1705_v38 = vmul.f32 0.23570226, %v681_v35 }
 0x1c6   :  { %2727 = vst [vmem:[#allocation5 + $0x1480] sm:$0xff] %v1703_v33  ;;  %v1706_v39 = vmul.f32 0.23570226, %v682_v36  ;;  %v683_v40 = vld [vmem:[#allocation2 + $0x14a0] sm:$0xff]  ;;  %v684_v41 = vld [vmem:[#allocation2 + $0x14a8] sm:$0xff]  ;;  %v685_v42 = vld [vmem:[#allocation2 + $0x14b0] sm:$0xff] }
 0x1c7   :  { %2728 = vst [vmem:[#allocation5 + $0x1488] sm:$0xff] %v1704_v37  ;;  %2729 = vst [vmem:[#allocation5 + $0x1490] sm:$0xff] %v1705_v38  ;;  %v1707_v43 = vmul.f32 0.23570226, %v683_v40  ;;  %v1708_v44 = vmul.f32 0.23570226, %v684_v41 }
 0x1c8   :  { %2730 = vst [vmem:[#allocation5 + $0x1498] sm:$0xff] %v1706_v39  ;;  %v1709_v45 = vmul.f32 0.23570226, %v685_v42  ;;  %v686_v46 = vld [vmem:[#allocation2 + $0x14b8] sm:$0xff]  ;;  %v687_v47 = vld [vmem:[#allocation2 + $0x14c0] sm:$0xff]  ;;  %v688_v48 = vld [vmem:[#allocation2 + $0x14c8] sm:$0xff] }
 0x1c9   :  { %2731 = vst [vmem:[#allocation5 + $0x14a0] sm:$0xff] %v1707_v43  ;;  %2732 = vst [vmem:[#allocation5 + $0x14a8] sm:$0xff] %v1708_v44  ;;  %v1710_v49 = vmul.f32 0.23570226, %v686_v46  ;;  %v1711_v50 = vmul.f32 0.23570226, %v687_v47 }
 0x1ca   :  { %2733 = vst [vmem:[#allocation5 + $0x14b0] sm:$0xff] %v1709_v45  ;;  %v1712_v51 = vmul.f32 0.23570226, %v688_v48  ;;  %v689_v52 = vld [vmem:[#allocation2 + $0x14d0] sm:$0xff]  ;;  %v690_v53 = vld [vmem:[#allocation2 + $0x14d8] sm:$0xff]  ;;  %v691_v54 = vld [vmem:[#allocation2 + $0x14e0] sm:$0xff] }
 0x1cb   :  { %2734 = vst [vmem:[#allocation5 + $0x14b8] sm:$0xff] %v1710_v49  ;;  %2735 = vst [vmem:[#allocation5 + $0x14c0] sm:$0xff] %v1711_v50  ;;  %v1713_v55 = vmul.f32 0.23570226, %v689_v52  ;;  %v1714_v56 = vmul.f32 0.23570226, %v690_v53 }
 0x1cc   :  { %2736 = vst [vmem:[#allocation5 + $0x14c8] sm:$0xff] %v1712_v51  ;;  %v1715_v57 = vmul.f32 0.23570226, %v691_v54  ;;  %v692_v58 = vld [vmem:[#allocation2 + $0x14e8] sm:$0xff]  ;;  %v693_v59 = vld [vmem:[#allocation2 + $0x14f0] sm:$0xff]  ;;  %v694_v60 = vld [vmem:[#allocation2 + $0x14f8] sm:$0xff] }
 0x1cd   :  { %2737 = vst [vmem:[#allocation5 + $0x14d0] sm:$0xff] %v1713_v55  ;;  %2738 = vst [vmem:[#allocation5 + $0x14d8] sm:$0xff] %v1714_v56  ;;  %v1716_v61 = vmul.f32 0.23570226, %v692_v58  ;;  %v1717_v62 = vmul.f32 0.23570226, %v693_v59 }
 0x1ce   :  { %2739 = vst [vmem:[#allocation5 + $0x14e0] sm:$0xff] %v1715_v57  ;;  %v1718_v63 = vmul.f32 0.23570226, %v694_v60  ;;  %v695_v0 = vld [vmem:[#allocation2 + $0x1500] sm:$0xff]  ;;  %v696_v1 = vld [vmem:[#allocation2 + $0x1508] sm:$0xff]  ;;  %v697_v2 = vld [vmem:[#allocation2 + $0x1510] sm:$0xff] }
 0x1cf   :  { %2740 = vst [vmem:[#allocation5 + $0x14e8] sm:$0xff] %v1716_v61  ;;  %2741 = vst [vmem:[#allocation5 + $0x14f0] sm:$0xff] %v1717_v62  ;;  %v1719_v3 = vmul.f32 0.23570226, %v695_v0  ;;  %v1720_v4 = vmul.f32 0.23570226, %v696_v1 }
 0x1d0   :  { %2742 = vst [vmem:[#allocation5 + $0x14f8] sm:$0xff] %v1718_v63  ;;  %v1721_v5 = vmul.f32 0.23570226, %v697_v2  ;;  %v698_v6 = vld [vmem:[#allocation2 + $0x1518] sm:$0xff]  ;;  %v699_v7 = vld [vmem:[#allocation2 + $0x1520] sm:$0xff]  ;;  %v700_v8 = vld [vmem:[#allocation2 + $0x1528] sm:$0xff] }
 0x1d1   :  { %2743 = vst [vmem:[#allocation5 + $0x1500] sm:$0xff] %v1719_v3  ;;  %2744 = vst [vmem:[#allocation5 + $0x1508] sm:$0xff] %v1720_v4  ;;  %v1722_v9 = vmul.f32 0.23570226, %v698_v6  ;;  %v1723_v10 = vmul.f32 0.23570226, %v699_v7 }
 0x1d2   :  { %2745 = vst [vmem:[#allocation5 + $0x1510] sm:$0xff] %v1721_v5  ;;  %v1724_v11 = vmul.f32 0.23570226, %v700_v8  ;;  %v701_v12 = vld [vmem:[#allocation2 + $0x1530] sm:$0xff]  ;;  %v702_v13 = vld [vmem:[#allocation2 + $0x1538] sm:$0xff]  ;;  %v703_v14 = vld [vmem:[#allocation2 + $0x1540] sm:$0xff] }
 0x1d3   :  { %2746 = vst [vmem:[#allocation5 + $0x1518] sm:$0xff] %v1722_v9  ;;  %2747 = vst [vmem:[#allocation5 + $0x1520] sm:$0xff] %v1723_v10  ;;  %v1725_v15 = vmul.f32 0.23570226, %v701_v12  ;;  %v1726_v16 = vmul.f32 0.23570226, %v702_v13 }
 0x1d4   :  { %2748 = vst [vmem:[#allocation5 + $0x1528] sm:$0xff] %v1724_v11  ;;  %v1727_v17 = vmul.f32 0.23570226, %v703_v14  ;;  %v704_v18 = vld [vmem:[#allocation2 + $0x1548] sm:$0xff]  ;;  %v705_v19 = vld [vmem:[#allocation2 + $0x1550] sm:$0xff]  ;;  %v706_v20 = vld [vmem:[#allocation2 + $0x1558] sm:$0xff] }
 0x1d5   :  { %2749 = vst [vmem:[#allocation5 + $0x1530] sm:$0xff] %v1725_v15  ;;  %2750 = vst [vmem:[#allocation5 + $0x1538] sm:$0xff] %v1726_v16  ;;  %v1728_v21 = vmul.f32 0.23570226, %v704_v18  ;;  %v1729_v22 = vmul.f32 0.23570226, %v705_v19 }
 0x1d6   :  { %2751 = vst [vmem:[#allocation5 + $0x1540] sm:$0xff] %v1727_v17  ;;  %v1730_v23 = vmul.f32 0.23570226, %v706_v20  ;;  %v707_v24 = vld [vmem:[#allocation2 + $0x1560] sm:$0xff]  ;;  %v708_v25 = vld [vmem:[#allocation2 + $0x1568] sm:$0xff]  ;;  %v709_v26 = vld [vmem:[#allocation2 + $0x1570] sm:$0xff] }
 0x1d7   :  { %2752 = vst [vmem:[#allocation5 + $0x1548] sm:$0xff] %v1728_v21  ;;  %2753 = vst [vmem:[#allocation5 + $0x1550] sm:$0xff] %v1729_v22  ;;  %v1731_v27 = vmul.f32 0.23570226, %v707_v24  ;;  %v1732_v28 = vmul.f32 0.23570226, %v708_v25 }
 0x1d8   :  { %2754 = vst [vmem:[#allocation5 + $0x1558] sm:$0xff] %v1730_v23  ;;  %v1733_v29 = vmul.f32 0.23570226, %v709_v26  ;;  %v710_v30 = vld [vmem:[#allocation2 + $0x1578] sm:$0xff]  ;;  %v711_v31 = vld [vmem:[#allocation2 + $0x1580] sm:$0xff]  ;;  %v712_v32 = vld [vmem:[#allocation2 + $0x1588] sm:$0xff] }
 0x1d9   :  { %2755 = vst [vmem:[#allocation5 + $0x1560] sm:$0xff] %v1731_v27  ;;  %2756 = vst [vmem:[#allocation5 + $0x1568] sm:$0xff] %v1732_v28  ;;  %v1734_v33 = vmul.f32 0.23570226, %v710_v30  ;;  %v1735_v34 = vmul.f32 0.23570226, %v711_v31 }
 0x1da   :  { %2757 = vst [vmem:[#allocation5 + $0x1570] sm:$0xff] %v1733_v29  ;;  %v1736_v35 = vmul.f32 0.23570226, %v712_v32  ;;  %v713_v36 = vld [vmem:[#allocation2 + $0x1590] sm:$0xff]  ;;  %v714_v37 = vld [vmem:[#allocation2 + $0x1598] sm:$0xff]  ;;  %v715_v38 = vld [vmem:[#allocation2 + $0x15a0] sm:$0xff] }
 0x1db   :  { %2758 = vst [vmem:[#allocation5 + $0x1578] sm:$0xff] %v1734_v33  ;;  %2759 = vst [vmem:[#allocation5 + $0x1580] sm:$0xff] %v1735_v34  ;;  %v1737_v39 = vmul.f32 0.23570226, %v713_v36  ;;  %v1738_v40 = vmul.f32 0.23570226, %v714_v37 }
 0x1dc   :  { %2760 = vst [vmem:[#allocation5 + $0x1588] sm:$0xff] %v1736_v35  ;;  %v1739_v41 = vmul.f32 0.23570226, %v715_v38  ;;  %v716_v42 = vld [vmem:[#allocation2 + $0x15a8] sm:$0xff]  ;;  %v717_v43 = vld [vmem:[#allocation2 + $0x15b0] sm:$0xff]  ;;  %v718_v44 = vld [vmem:[#allocation2 + $0x15b8] sm:$0xff] }
 0x1dd   :  { %2761 = vst [vmem:[#allocation5 + $0x1590] sm:$0xff] %v1737_v39  ;;  %2762 = vst [vmem:[#allocation5 + $0x1598] sm:$0xff] %v1738_v40  ;;  %v1740_v45 = vmul.f32 0.23570226, %v716_v42  ;;  %v1741_v46 = vmul.f32 0.23570226, %v717_v43 }
 0x1de   :  { %2763 = vst [vmem:[#allocation5 + $0x15a0] sm:$0xff] %v1739_v41  ;;  %v1742_v47 = vmul.f32 0.23570226, %v718_v44  ;;  %v719_v48 = vld [vmem:[#allocation2 + $0x15c0] sm:$0xff]  ;;  %v720_v49 = vld [vmem:[#allocation2 + $0x15c8] sm:$0xff]  ;;  %v721_v50 = vld [vmem:[#allocation2 + $0x15d0] sm:$0xff] }
 0x1df   :  { %2764 = vst [vmem:[#allocation5 + $0x15a8] sm:$0xff] %v1740_v45  ;;  %2765 = vst [vmem:[#allocation5 + $0x15b0] sm:$0xff] %v1741_v46  ;;  %v1743_v51 = vmul.f32 0.23570226, %v719_v48  ;;  %v1744_v52 = vmul.f32 0.23570226, %v720_v49 }
 0x1e0   :  { %2766 = vst [vmem:[#allocation5 + $0x15b8] sm:$0xff] %v1742_v47  ;;  %v1745_v53 = vmul.f32 0.23570226, %v721_v50  ;;  %v722_v54 = vld [vmem:[#allocation2 + $0x15d8] sm:$0xff]  ;;  %v723_v55 = vld [vmem:[#allocation2 + $0x15e0] sm:$0xff]  ;;  %v724_v56 = vld [vmem:[#allocation2 + $0x15e8] sm:$0xff] }
 0x1e1   :  { %2767 = vst [vmem:[#allocation5 + $0x15c0] sm:$0xff] %v1743_v51  ;;  %2768 = vst [vmem:[#allocation5 + $0x15c8] sm:$0xff] %v1744_v52  ;;  %v1746_v57 = vmul.f32 0.23570226, %v722_v54  ;;  %v1747_v58 = vmul.f32 0.23570226, %v723_v55 }
 0x1e2   :  { %2769 = vst [vmem:[#allocation5 + $0x15d0] sm:$0xff] %v1745_v53  ;;  %v1748_v59 = vmul.f32 0.23570226, %v724_v56  ;;  %v725_v60 = vld [vmem:[#allocation2 + $0x15f0] sm:$0xff]  ;;  %v726_v61 = vld [vmem:[#allocation2 + $0x15f8] sm:$0xff]  ;;  %v727_v62 = vld [vmem:[#allocation2 + $0x1600] sm:$0xff] }
 0x1e3   :  { %2770 = vst [vmem:[#allocation5 + $0x15d8] sm:$0xff] %v1746_v57  ;;  %2771 = vst [vmem:[#allocation5 + $0x15e0] sm:$0xff] %v1747_v58  ;;  %v1749_v63 = vmul.f32 0.23570226, %v725_v60  ;;  %v1750_v0 = vmul.f32 0.23570226, %v726_v61 }
 0x1e4   :  { %2772 = vst [vmem:[#allocation5 + $0x15e8] sm:$0xff] %v1748_v59  ;;  %v1751_v1 = vmul.f32 0.23570226, %v727_v62  ;;  %v728_v2 = vld [vmem:[#allocation2 + $0x1608] sm:$0xff]  ;;  %v729_v3 = vld [vmem:[#allocation2 + $0x1610] sm:$0xff]  ;;  %v730_v4 = vld [vmem:[#allocation2 + $0x1618] sm:$0xff] }
 0x1e5   :  { %2773 = vst [vmem:[#allocation5 + $0x15f0] sm:$0xff] %v1749_v63  ;;  %2774 = vst [vmem:[#allocation5 + $0x15f8] sm:$0xff] %v1750_v0  ;;  %v1752_v5 = vmul.f32 0.23570226, %v728_v2  ;;  %v1753_v6 = vmul.f32 0.23570226, %v729_v3 }
 0x1e6   :  { %2775 = vst [vmem:[#allocation5 + $0x1600] sm:$0xff] %v1751_v1  ;;  %v1754_v7 = vmul.f32 0.23570226, %v730_v4  ;;  %v731_v8 = vld [vmem:[#allocation2 + $0x1620] sm:$0xff]  ;;  %v732_v9 = vld [vmem:[#allocation2 + $0x1628] sm:$0xff]  ;;  %v733_v10 = vld [vmem:[#allocation2 + $0x1630] sm:$0xff] }
 0x1e7   :  { %2776 = vst [vmem:[#allocation5 + $0x1608] sm:$0xff] %v1752_v5  ;;  %2777 = vst [vmem:[#allocation5 + $0x1610] sm:$0xff] %v1753_v6  ;;  %v1755_v11 = vmul.f32 0.23570226, %v731_v8  ;;  %v1756_v12 = vmul.f32 0.23570226, %v732_v9 }
 0x1e8   :  { %2778 = vst [vmem:[#allocation5 + $0x1618] sm:$0xff] %v1754_v7  ;;  %v1757_v13 = vmul.f32 0.23570226, %v733_v10  ;;  %v734_v14 = vld [vmem:[#allocation2 + $0x1638] sm:$0xff]  ;;  %v735_v15 = vld [vmem:[#allocation2 + $0x1640] sm:$0xff]  ;;  %v736_v16 = vld [vmem:[#allocation2 + $0x1648] sm:$0xff] }
 0x1e9   :  { %2779 = vst [vmem:[#allocation5 + $0x1620] sm:$0xff] %v1755_v11  ;;  %2780 = vst [vmem:[#allocation5 + $0x1628] sm:$0xff] %v1756_v12  ;;  %v1758_v17 = vmul.f32 0.23570226, %v734_v14  ;;  %v1759_v18 = vmul.f32 0.23570226, %v735_v15 }
 0x1ea   :  { %2781 = vst [vmem:[#allocation5 + $0x1630] sm:$0xff] %v1757_v13  ;;  %v1760_v19 = vmul.f32 0.23570226, %v736_v16  ;;  %v737_v20 = vld [vmem:[#allocation2 + $0x1650] sm:$0xff]  ;;  %v738_v21 = vld [vmem:[#allocation2 + $0x1658] sm:$0xff]  ;;  %v739_v22 = vld [vmem:[#allocation2 + $0x1660] sm:$0xff] }
 0x1eb   :  { %2782 = vst [vmem:[#allocation5 + $0x1638] sm:$0xff] %v1758_v17  ;;  %2783 = vst [vmem:[#allocation5 + $0x1640] sm:$0xff] %v1759_v18  ;;  %v1761_v23 = vmul.f32 0.23570226, %v737_v20  ;;  %v1762_v24 = vmul.f32 0.23570226, %v738_v21 }
 0x1ec   :  { %2784 = vst [vmem:[#allocation5 + $0x1648] sm:$0xff] %v1760_v19  ;;  %v1763_v25 = vmul.f32 0.23570226, %v739_v22  ;;  %v740_v26 = vld [vmem:[#allocation2 + $0x1668] sm:$0xff]  ;;  %v741_v27 = vld [vmem:[#allocation2 + $0x1670] sm:$0xff]  ;;  %v742_v28 = vld [vmem:[#allocation2 + $0x1678] sm:$0xff] }
 0x1ed   :  { %2785 = vst [vmem:[#allocation5 + $0x1650] sm:$0xff] %v1761_v23  ;;  %2786 = vst [vmem:[#allocation5 + $0x1658] sm:$0xff] %v1762_v24  ;;  %v1764_v29 = vmul.f32 0.23570226, %v740_v26  ;;  %v1765_v30 = vmul.f32 0.23570226, %v741_v27 }
 0x1ee   :  { %2787 = vst [vmem:[#allocation5 + $0x1660] sm:$0xff] %v1763_v25  ;;  %v1766_v31 = vmul.f32 0.23570226, %v742_v28  ;;  %v743_v32 = vld [vmem:[#allocation2 + $0x1680] sm:$0xff]  ;;  %v744_v33 = vld [vmem:[#allocation2 + $0x1688] sm:$0xff]  ;;  %v745_v34 = vld [vmem:[#allocation2 + $0x1690] sm:$0xff] }
 0x1ef   :  { %2788 = vst [vmem:[#allocation5 + $0x1668] sm:$0xff] %v1764_v29  ;;  %2789 = vst [vmem:[#allocation5 + $0x1670] sm:$0xff] %v1765_v30  ;;  %v1767_v35 = vmul.f32 0.23570226, %v743_v32  ;;  %v1768_v36 = vmul.f32 0.23570226, %v744_v33 }
 0x1f0   :  { %2790 = vst [vmem:[#allocation5 + $0x1678] sm:$0xff] %v1766_v31  ;;  %v1769_v37 = vmul.f32 0.23570226, %v745_v34  ;;  %v746_v38 = vld [vmem:[#allocation2 + $0x1698] sm:$0xff]  ;;  %v747_v39 = vld [vmem:[#allocation2 + $0x16a0] sm:$0xff]  ;;  %v748_v40 = vld [vmem:[#allocation2 + $0x16a8] sm:$0xff] }
 0x1f1   :  { %2791 = vst [vmem:[#allocation5 + $0x1680] sm:$0xff] %v1767_v35  ;;  %2792 = vst [vmem:[#allocation5 + $0x1688] sm:$0xff] %v1768_v36  ;;  %v1770_v41 = vmul.f32 0.23570226, %v746_v38  ;;  %v1771_v42 = vmul.f32 0.23570226, %v747_v39 }
 0x1f2   :  { %2793 = vst [vmem:[#allocation5 + $0x1690] sm:$0xff] %v1769_v37  ;;  %v1772_v43 = vmul.f32 0.23570226, %v748_v40  ;;  %v749_v44 = vld [vmem:[#allocation2 + $0x16b0] sm:$0xff]  ;;  %v750_v45 = vld [vmem:[#allocation2 + $0x16b8] sm:$0xff]  ;;  %v751_v46 = vld [vmem:[#allocation2 + $0x16c0] sm:$0xff] }
 0x1f3   :  { %2794 = vst [vmem:[#allocation5 + $0x1698] sm:$0xff] %v1770_v41  ;;  %2795 = vst [vmem:[#allocation5 + $0x16a0] sm:$0xff] %v1771_v42  ;;  %v1773_v47 = vmul.f32 0.23570226, %v749_v44  ;;  %v1774_v48 = vmul.f32 0.23570226, %v750_v45 }
 0x1f4   :  { %2796 = vst [vmem:[#allocation5 + $0x16a8] sm:$0xff] %v1772_v43  ;;  %v1775_v49 = vmul.f32 0.23570226, %v751_v46  ;;  %v752_v50 = vld [vmem:[#allocation2 + $0x16c8] sm:$0xff]  ;;  %v753_v51 = vld [vmem:[#allocation2 + $0x16d0] sm:$0xff]  ;;  %v754_v52 = vld [vmem:[#allocation2 + $0x16d8] sm:$0xff] }
 0x1f5   :  { %2797 = vst [vmem:[#allocation5 + $0x16b0] sm:$0xff] %v1773_v47  ;;  %2798 = vst [vmem:[#allocation5 + $0x16b8] sm:$0xff] %v1774_v48  ;;  %v1776_v53 = vmul.f32 0.23570226, %v752_v50  ;;  %v1777_v54 = vmul.f32 0.23570226, %v753_v51 }
 0x1f6   :  { %2799 = vst [vmem:[#allocation5 + $0x16c0] sm:$0xff] %v1775_v49  ;;  %v1778_v55 = vmul.f32 0.23570226, %v754_v52  ;;  %v755_v56 = vld [vmem:[#allocation2 + $0x16e0] sm:$0xff]  ;;  %v756_v57 = vld [vmem:[#allocation2 + $0x16e8] sm:$0xff]  ;;  %v757_v58 = vld [vmem:[#allocation2 + $0x16f0] sm:$0xff] }
 0x1f7   :  { %2800 = vst [vmem:[#allocation5 + $0x16c8] sm:$0xff] %v1776_v53  ;;  %2801 = vst [vmem:[#allocation5 + $0x16d0] sm:$0xff] %v1777_v54  ;;  %v1779_v59 = vmul.f32 0.23570226, %v755_v56  ;;  %v1780_v60 = vmul.f32 0.23570226, %v756_v57 }
 0x1f8   :  { %2802 = vst [vmem:[#allocation5 + $0x16d8] sm:$0xff] %v1778_v55  ;;  %v1781_v61 = vmul.f32 0.23570226, %v757_v58  ;;  %v758_v62 = vld [vmem:[#allocation2 + $0x16f8] sm:$0xff]  ;;  %v759_v63 = vld [vmem:[#allocation2 + $0x1700] sm:$0xff]  ;;  %v760_v0 = vld [vmem:[#allocation2 + $0x1708] sm:$0xff] }
 0x1f9   :  { %2803 = vst [vmem:[#allocation5 + $0x16e0] sm:$0xff] %v1779_v59  ;;  %2804 = vst [vmem:[#allocation5 + $0x16e8] sm:$0xff] %v1780_v60  ;;  %v1782_v1 = vmul.f32 0.23570226, %v758_v62  ;;  %v1783_v2 = vmul.f32 0.23570226, %v759_v63 }
 0x1fa   :  { %2805 = vst [vmem:[#allocation5 + $0x16f0] sm:$0xff] %v1781_v61  ;;  %v1784_v3 = vmul.f32 0.23570226, %v760_v0  ;;  %v761_v4 = vld [vmem:[#allocation2 + $0x1710] sm:$0xff]  ;;  %v762_v5 = vld [vmem:[#allocation2 + $0x1718] sm:$0xff]  ;;  %v763_v6 = vld [vmem:[#allocation2 + $0x1720] sm:$0xff] }
 0x1fb   :  { %2806 = vst [vmem:[#allocation5 + $0x16f8] sm:$0xff] %v1782_v1  ;;  %2807 = vst [vmem:[#allocation5 + $0x1700] sm:$0xff] %v1783_v2  ;;  %v1785_v7 = vmul.f32 0.23570226, %v761_v4  ;;  %v1786_v8 = vmul.f32 0.23570226, %v762_v5 }
 0x1fc   :  { %2808 = vst [vmem:[#allocation5 + $0x1708] sm:$0xff] %v1784_v3  ;;  %v1787_v9 = vmul.f32 0.23570226, %v763_v6  ;;  %v764_v10 = vld [vmem:[#allocation2 + $0x1728] sm:$0xff]  ;;  %v765_v11 = vld [vmem:[#allocation2 + $0x1730] sm:$0xff]  ;;  %v766_v12 = vld [vmem:[#allocation2 + $0x1738] sm:$0xff] }
 0x1fd   :  { %2809 = vst [vmem:[#allocation5 + $0x1710] sm:$0xff] %v1785_v7  ;;  %2810 = vst [vmem:[#allocation5 + $0x1718] sm:$0xff] %v1786_v8  ;;  %v1788_v13 = vmul.f32 0.23570226, %v764_v10  ;;  %v1789_v14 = vmul.f32 0.23570226, %v765_v11 }
 0x1fe   :  { %2811 = vst [vmem:[#allocation5 + $0x1720] sm:$0xff] %v1787_v9  ;;  %v1790_v15 = vmul.f32 0.23570226, %v766_v12  ;;  %v767_v16 = vld [vmem:[#allocation2 + $0x1740] sm:$0xff]  ;;  %v768_v17 = vld [vmem:[#allocation2 + $0x1748] sm:$0xff]  ;;  %v769_v18 = vld [vmem:[#allocation2 + $0x1750] sm:$0xff] }
 0x1ff   :  { %2812 = vst [vmem:[#allocation5 + $0x1728] sm:$0xff] %v1788_v13  ;;  %2813 = vst [vmem:[#allocation5 + $0x1730] sm:$0xff] %v1789_v14  ;;  %v1791_v19 = vmul.f32 0.23570226, %v767_v16  ;;  %v1792_v20 = vmul.f32 0.23570226, %v768_v17 }
 0x200   :  { %2814 = vst [vmem:[#allocation5 + $0x1738] sm:$0xff] %v1790_v15  ;;  %v1793_v21 = vmul.f32 0.23570226, %v769_v18  ;;  %v770_v22 = vld [vmem:[#allocation2 + $0x1758] sm:$0xff]  ;;  %v771_v23 = vld [vmem:[#allocation2 + $0x1760] sm:$0xff]  ;;  %v772_v24 = vld [vmem:[#allocation2 + $0x1768] sm:$0xff] }
 0x201   :  { %2815 = vst [vmem:[#allocation5 + $0x1740] sm:$0xff] %v1791_v19  ;;  %2816 = vst [vmem:[#allocation5 + $0x1748] sm:$0xff] %v1792_v20  ;;  %v1794_v25 = vmul.f32 0.23570226, %v770_v22  ;;  %v1795_v26 = vmul.f32 0.23570226, %v771_v23 }
 0x202   :  { %2817 = vst [vmem:[#allocation5 + $0x1750] sm:$0xff] %v1793_v21  ;;  %v1796_v27 = vmul.f32 0.23570226, %v772_v24  ;;  %v773_v28 = vld [vmem:[#allocation2 + $0x1770] sm:$0xff]  ;;  %v774_v29 = vld [vmem:[#allocation2 + $0x1778] sm:$0xff]  ;;  %v775_v30 = vld [vmem:[#allocation2 + $0x1780] sm:$0xff] }
 0x203   :  { %2818 = vst [vmem:[#allocation5 + $0x1758] sm:$0xff] %v1794_v25  ;;  %2819 = vst [vmem:[#allocation5 + $0x1760] sm:$0xff] %v1795_v26  ;;  %v1797_v31 = vmul.f32 0.23570226, %v773_v28  ;;  %v1798_v32 = vmul.f32 0.23570226, %v774_v29 }
 0x204   :  { %2820 = vst [vmem:[#allocation5 + $0x1768] sm:$0xff] %v1796_v27  ;;  %v1799_v33 = vmul.f32 0.23570226, %v775_v30  ;;  %v776_v34 = vld [vmem:[#allocation2 + $0x1788] sm:$0xff]  ;;  %v777_v35 = vld [vmem:[#allocation2 + $0x1790] sm:$0xff]  ;;  %v778_v36 = vld [vmem:[#allocation2 + $0x1798] sm:$0xff] }
 0x205   :  { %2821 = vst [vmem:[#allocation5 + $0x1770] sm:$0xff] %v1797_v31  ;;  %2822 = vst [vmem:[#allocation5 + $0x1778] sm:$0xff] %v1798_v32  ;;  %v1800_v37 = vmul.f32 0.23570226, %v776_v34  ;;  %v1801_v38 = vmul.f32 0.23570226, %v777_v35 }
 0x206   :  { %2823 = vst [vmem:[#allocation5 + $0x1780] sm:$0xff] %v1799_v33  ;;  %v1802_v39 = vmul.f32 0.23570226, %v778_v36  ;;  %v779_v40 = vld [vmem:[#allocation2 + $0x17a0] sm:$0xff]  ;;  %v780_v41 = vld [vmem:[#allocation2 + $0x17a8] sm:$0xff]  ;;  %v781_v42 = vld [vmem:[#allocation2 + $0x17b0] sm:$0xff] }
 0x207   :  { %2824 = vst [vmem:[#allocation5 + $0x1788] sm:$0xff] %v1800_v37  ;;  %2825 = vst [vmem:[#allocation5 + $0x1790] sm:$0xff] %v1801_v38  ;;  %v1803_v43 = vmul.f32 0.23570226, %v779_v40  ;;  %v1804_v44 = vmul.f32 0.23570226, %v780_v41 }
 0x208   :  { %2826 = vst [vmem:[#allocation5 + $0x1798] sm:$0xff] %v1802_v39  ;;  %v1805_v45 = vmul.f32 0.23570226, %v781_v42  ;;  %v782_v46 = vld [vmem:[#allocation2 + $0x17b8] sm:$0xff]  ;;  %v783_v47 = vld [vmem:[#allocation2 + $0x17c0] sm:$0xff]  ;;  %v784_v48 = vld [vmem:[#allocation2 + $0x17c8] sm:$0xff] }
 0x209   :  { %2827 = vst [vmem:[#allocation5 + $0x17a0] sm:$0xff] %v1803_v43  ;;  %2828 = vst [vmem:[#allocation5 + $0x17a8] sm:$0xff] %v1804_v44  ;;  %v1806_v49 = vmul.f32 0.23570226, %v782_v46  ;;  %v1807_v50 = vmul.f32 0.23570226, %v783_v47 }
 0x20a   :  { %2829 = vst [vmem:[#allocation5 + $0x17b0] sm:$0xff] %v1805_v45  ;;  %v1808_v51 = vmul.f32 0.23570226, %v784_v48  ;;  %v785_v52 = vld [vmem:[#allocation2 + $0x17d0] sm:$0xff]  ;;  %v786_v53 = vld [vmem:[#allocation2 + $0x17d8] sm:$0xff]  ;;  %v787_v54 = vld [vmem:[#allocation2 + $0x17e0] sm:$0xff] }
 0x20b   :  { %2830 = vst [vmem:[#allocation5 + $0x17b8] sm:$0xff] %v1806_v49  ;;  %2831 = vst [vmem:[#allocation5 + $0x17c0] sm:$0xff] %v1807_v50  ;;  %v1809_v55 = vmul.f32 0.23570226, %v785_v52  ;;  %v1810_v56 = vmul.f32 0.23570226, %v786_v53 }
 0x20c   :  { %2832 = vst [vmem:[#allocation5 + $0x17c8] sm:$0xff] %v1808_v51  ;;  %v1811_v57 = vmul.f32 0.23570226, %v787_v54  ;;  %v788_v58 = vld [vmem:[#allocation2 + $0x17e8] sm:$0xff]  ;;  %v789_v59 = vld [vmem:[#allocation2 + $0x17f0] sm:$0xff]  ;;  %v790_v60 = vld [vmem:[#allocation2 + $0x17f8] sm:$0xff] }
 0x20d   :  { %2833 = vst [vmem:[#allocation5 + $0x17d0] sm:$0xff] %v1809_v55  ;;  %2834 = vst [vmem:[#allocation5 + $0x17d8] sm:$0xff] %v1810_v56  ;;  %v1812_v61 = vmul.f32 0.23570226, %v788_v58  ;;  %v1813_v62 = vmul.f32 0.23570226, %v789_v59 }
 0x20e   :  { %2835 = vst [vmem:[#allocation5 + $0x17e0] sm:$0xff] %v1811_v57  ;;  %v1814_v63 = vmul.f32 0.23570226, %v790_v60  ;;  %v791_v0 = vld [vmem:[#allocation2 + $0x1800] sm:$0xff]  ;;  %v792_v1 = vld [vmem:[#allocation2 + $0x1808] sm:$0xff]  ;;  %v793_v2 = vld [vmem:[#allocation2 + $0x1810] sm:$0xff] }
 0x20f   :  { %2836 = vst [vmem:[#allocation5 + $0x17e8] sm:$0xff] %v1812_v61  ;;  %2837 = vst [vmem:[#allocation5 + $0x17f0] sm:$0xff] %v1813_v62  ;;  %v1815_v3 = vmul.f32 0.23570226, %v791_v0  ;;  %v1816_v4 = vmul.f32 0.23570226, %v792_v1 }
 0x210   :  { %2838 = vst [vmem:[#allocation5 + $0x17f8] sm:$0xff] %v1814_v63  ;;  %v1817_v5 = vmul.f32 0.23570226, %v793_v2  ;;  %v794_v6 = vld [vmem:[#allocation2 + $0x1818] sm:$0xff]  ;;  %v795_v7 = vld [vmem:[#allocation2 + $0x1820] sm:$0xff]  ;;  %v796_v8 = vld [vmem:[#allocation2 + $0x1828] sm:$0xff] }
 0x211   :  { %2839 = vst [vmem:[#allocation5 + $0x1800] sm:$0xff] %v1815_v3  ;;  %2840 = vst [vmem:[#allocation5 + $0x1808] sm:$0xff] %v1816_v4  ;;  %v1818_v9 = vmul.f32 0.23570226, %v794_v6  ;;  %v1819_v10 = vmul.f32 0.23570226, %v795_v7 }
 0x212   :  { %2841 = vst [vmem:[#allocation5 + $0x1810] sm:$0xff] %v1817_v5  ;;  %v1820_v11 = vmul.f32 0.23570226, %v796_v8  ;;  %v797_v12 = vld [vmem:[#allocation2 + $0x1830] sm:$0xff]  ;;  %v798_v13 = vld [vmem:[#allocation2 + $0x1838] sm:$0xff]  ;;  %v799_v14 = vld [vmem:[#allocation2 + $0x1840] sm:$0xff] }
 0x213   :  { %2842 = vst [vmem:[#allocation5 + $0x1818] sm:$0xff] %v1818_v9  ;;  %2843 = vst [vmem:[#allocation5 + $0x1820] sm:$0xff] %v1819_v10  ;;  %v1821_v15 = vmul.f32 0.23570226, %v797_v12  ;;  %v1822_v16 = vmul.f32 0.23570226, %v798_v13 }
 0x214   :  { %2844 = vst [vmem:[#allocation5 + $0x1828] sm:$0xff] %v1820_v11  ;;  %v1823_v17 = vmul.f32 0.23570226, %v799_v14  ;;  %v800_v18 = vld [vmem:[#allocation2 + $0x1848] sm:$0xff]  ;;  %v801_v19 = vld [vmem:[#allocation2 + $0x1850] sm:$0xff]  ;;  %v802_v20 = vld [vmem:[#allocation2 + $0x1858] sm:$0xff] }
 0x215   :  { %2845 = vst [vmem:[#allocation5 + $0x1830] sm:$0xff] %v1821_v15  ;;  %2846 = vst [vmem:[#allocation5 + $0x1838] sm:$0xff] %v1822_v16  ;;  %v1824_v21 = vmul.f32 0.23570226, %v800_v18  ;;  %v1825_v22 = vmul.f32 0.23570226, %v801_v19 }
 0x216   :  { %2847 = vst [vmem:[#allocation5 + $0x1840] sm:$0xff] %v1823_v17  ;;  %v1826_v23 = vmul.f32 0.23570226, %v802_v20  ;;  %v803_v24 = vld [vmem:[#allocation2 + $0x1860] sm:$0xff]  ;;  %v804_v25 = vld [vmem:[#allocation2 + $0x1868] sm:$0xff]  ;;  %v805_v26 = vld [vmem:[#allocation2 + $0x1870] sm:$0xff] }
 0x217   :  { %2848 = vst [vmem:[#allocation5 + $0x1848] sm:$0xff] %v1824_v21  ;;  %2849 = vst [vmem:[#allocation5 + $0x1850] sm:$0xff] %v1825_v22  ;;  %v1827_v27 = vmul.f32 0.23570226, %v803_v24  ;;  %v1828_v28 = vmul.f32 0.23570226, %v804_v25 }
 0x218   :  { %2850 = vst [vmem:[#allocation5 + $0x1858] sm:$0xff] %v1826_v23  ;;  %v1829_v29 = vmul.f32 0.23570226, %v805_v26  ;;  %v806_v30 = vld [vmem:[#allocation2 + $0x1878] sm:$0xff]  ;;  %v807_v31 = vld [vmem:[#allocation2 + $0x1880] sm:$0xff]  ;;  %v808_v32 = vld [vmem:[#allocation2 + $0x1888] sm:$0xff] }
 0x219   :  { %2851 = vst [vmem:[#allocation5 + $0x1860] sm:$0xff] %v1827_v27  ;;  %2852 = vst [vmem:[#allocation5 + $0x1868] sm:$0xff] %v1828_v28  ;;  %v1830_v33 = vmul.f32 0.23570226, %v806_v30  ;;  %v1831_v34 = vmul.f32 0.23570226, %v807_v31 }
 0x21a   :  { %2853 = vst [vmem:[#allocation5 + $0x1870] sm:$0xff] %v1829_v29  ;;  %v1832_v35 = vmul.f32 0.23570226, %v808_v32  ;;  %v809_v36 = vld [vmem:[#allocation2 + $0x1890] sm:$0xff]  ;;  %v810_v37 = vld [vmem:[#allocation2 + $0x1898] sm:$0xff]  ;;  %v811_v38 = vld [vmem:[#allocation2 + $0x18a0] sm:$0xff] }
 0x21b   :  { %2854 = vst [vmem:[#allocation5 + $0x1878] sm:$0xff] %v1830_v33  ;;  %2855 = vst [vmem:[#allocation5 + $0x1880] sm:$0xff] %v1831_v34  ;;  %v1833_v39 = vmul.f32 0.23570226, %v809_v36  ;;  %v1834_v40 = vmul.f32 0.23570226, %v810_v37 }
 0x21c   :  { %2856 = vst [vmem:[#allocation5 + $0x1888] sm:$0xff] %v1832_v35  ;;  %v1835_v41 = vmul.f32 0.23570226, %v811_v38  ;;  %v812_v42 = vld [vmem:[#allocation2 + $0x18a8] sm:$0xff]  ;;  %v813_v43 = vld [vmem:[#allocation2 + $0x18b0] sm:$0xff]  ;;  %v814_v44 = vld [vmem:[#allocation2 + $0x18b8] sm:$0xff] }
 0x21d   :  { %2857 = vst [vmem:[#allocation5 + $0x1890] sm:$0xff] %v1833_v39  ;;  %2858 = vst [vmem:[#allocation5 + $0x1898] sm:$0xff] %v1834_v40  ;;  %v1836_v45 = vmul.f32 0.23570226, %v812_v42  ;;  %v1837_v46 = vmul.f32 0.23570226, %v813_v43 }
 0x21e   :  { %2859 = vst [vmem:[#allocation5 + $0x18a0] sm:$0xff] %v1835_v41  ;;  %v1838_v47 = vmul.f32 0.23570226, %v814_v44  ;;  %v815_v48 = vld [vmem:[#allocation2 + $0x18c0] sm:$0xff]  ;;  %v816_v49 = vld [vmem:[#allocation2 + $0x18c8] sm:$0xff]  ;;  %v817_v50 = vld [vmem:[#allocation2 + $0x18d0] sm:$0xff] }
 0x21f   :  { %2860 = vst [vmem:[#allocation5 + $0x18a8] sm:$0xff] %v1836_v45  ;;  %2861 = vst [vmem:[#allocation5 + $0x18b0] sm:$0xff] %v1837_v46  ;;  %v1839_v51 = vmul.f32 0.23570226, %v815_v48  ;;  %v1840_v52 = vmul.f32 0.23570226, %v816_v49 }
 0x220   :  { %2862 = vst [vmem:[#allocation5 + $0x18b8] sm:$0xff] %v1838_v47  ;;  %v1841_v53 = vmul.f32 0.23570226, %v817_v50  ;;  %v818_v54 = vld [vmem:[#allocation2 + $0x18d8] sm:$0xff]  ;;  %v819_v55 = vld [vmem:[#allocation2 + $0x18e0] sm:$0xff]  ;;  %v820_v56 = vld [vmem:[#allocation2 + $0x18e8] sm:$0xff] }
 0x221   :  { %2863 = vst [vmem:[#allocation5 + $0x18c0] sm:$0xff] %v1839_v51  ;;  %2864 = vst [vmem:[#allocation5 + $0x18c8] sm:$0xff] %v1840_v52  ;;  %v1842_v57 = vmul.f32 0.23570226, %v818_v54  ;;  %v1843_v58 = vmul.f32 0.23570226, %v819_v55 }
 0x222   :  { %2865 = vst [vmem:[#allocation5 + $0x18d0] sm:$0xff] %v1841_v53  ;;  %v1844_v59 = vmul.f32 0.23570226, %v820_v56  ;;  %v821_v60 = vld [vmem:[#allocation2 + $0x18f0] sm:$0xff]  ;;  %v822_v61 = vld [vmem:[#allocation2 + $0x18f8] sm:$0xff]  ;;  %v823_v62 = vld [vmem:[#allocation2 + $0x1900] sm:$0xff] }
 0x223   :  { %2866 = vst [vmem:[#allocation5 + $0x18d8] sm:$0xff] %v1842_v57  ;;  %2867 = vst [vmem:[#allocation5 + $0x18e0] sm:$0xff] %v1843_v58  ;;  %v1845_v63 = vmul.f32 0.23570226, %v821_v60  ;;  %v1846_v0 = vmul.f32 0.23570226, %v822_v61 }
 0x224   :  { %2868 = vst [vmem:[#allocation5 + $0x18e8] sm:$0xff] %v1844_v59  ;;  %v1847_v1 = vmul.f32 0.23570226, %v823_v62  ;;  %v824_v2 = vld [vmem:[#allocation2 + $0x1908] sm:$0xff]  ;;  %v825_v3 = vld [vmem:[#allocation2 + $0x1910] sm:$0xff]  ;;  %v826_v4 = vld [vmem:[#allocation2 + $0x1918] sm:$0xff] }
 0x225   :  { %2869 = vst [vmem:[#allocation5 + $0x18f0] sm:$0xff] %v1845_v63  ;;  %2870 = vst [vmem:[#allocation5 + $0x18f8] sm:$0xff] %v1846_v0  ;;  %v1848_v5 = vmul.f32 0.23570226, %v824_v2  ;;  %v1849_v6 = vmul.f32 0.23570226, %v825_v3 }
 0x226   :  { %2871 = vst [vmem:[#allocation5 + $0x1900] sm:$0xff] %v1847_v1  ;;  %v1850_v7 = vmul.f32 0.23570226, %v826_v4  ;;  %v827_v8 = vld [vmem:[#allocation2 + $0x1920] sm:$0xff]  ;;  %v828_v9 = vld [vmem:[#allocation2 + $0x1928] sm:$0xff]  ;;  %v829_v10 = vld [vmem:[#allocation2 + $0x1930] sm:$0xff] }
 0x227   :  { %2872 = vst [vmem:[#allocation5 + $0x1908] sm:$0xff] %v1848_v5  ;;  %2873 = vst [vmem:[#allocation5 + $0x1910] sm:$0xff] %v1849_v6  ;;  %v1851_v11 = vmul.f32 0.23570226, %v827_v8  ;;  %v1852_v12 = vmul.f32 0.23570226, %v828_v9 }
 0x228   :  { %2874 = vst [vmem:[#allocation5 + $0x1918] sm:$0xff] %v1850_v7  ;;  %v1853_v13 = vmul.f32 0.23570226, %v829_v10  ;;  %v830_v14 = vld [vmem:[#allocation2 + $0x1938] sm:$0xff]  ;;  %v831_v15 = vld [vmem:[#allocation2 + $0x1940] sm:$0xff]  ;;  %v832_v16 = vld [vmem:[#allocation2 + $0x1948] sm:$0xff] }
 0x229   :  { %2875 = vst [vmem:[#allocation5 + $0x1920] sm:$0xff] %v1851_v11  ;;  %2876 = vst [vmem:[#allocation5 + $0x1928] sm:$0xff] %v1852_v12  ;;  %v1854_v17 = vmul.f32 0.23570226, %v830_v14  ;;  %v1855_v18 = vmul.f32 0.23570226, %v831_v15 }
 0x22a   :  { %2877 = vst [vmem:[#allocation5 + $0x1930] sm:$0xff] %v1853_v13  ;;  %v1856_v19 = vmul.f32 0.23570226, %v832_v16  ;;  %v833_v20 = vld [vmem:[#allocation2 + $0x1950] sm:$0xff]  ;;  %v834_v21 = vld [vmem:[#allocation2 + $0x1958] sm:$0xff]  ;;  %v835_v22 = vld [vmem:[#allocation2 + $0x1960] sm:$0xff] }
 0x22b   :  { %2878 = vst [vmem:[#allocation5 + $0x1938] sm:$0xff] %v1854_v17  ;;  %2879 = vst [vmem:[#allocation5 + $0x1940] sm:$0xff] %v1855_v18  ;;  %v1857_v23 = vmul.f32 0.23570226, %v833_v20  ;;  %v1858_v24 = vmul.f32 0.23570226, %v834_v21 }
 0x22c   :  { %2880 = vst [vmem:[#allocation5 + $0x1948] sm:$0xff] %v1856_v19  ;;  %v1859_v25 = vmul.f32 0.23570226, %v835_v22  ;;  %v836_v26 = vld [vmem:[#allocation2 + $0x1968] sm:$0xff]  ;;  %v837_v27 = vld [vmem:[#allocation2 + $0x1970] sm:$0xff]  ;;  %v838_v28 = vld [vmem:[#allocation2 + $0x1978] sm:$0xff] }
 0x22d   :  { %2881 = vst [vmem:[#allocation5 + $0x1950] sm:$0xff] %v1857_v23  ;;  %2882 = vst [vmem:[#allocation5 + $0x1958] sm:$0xff] %v1858_v24  ;;  %v1860_v29 = vmul.f32 0.23570226, %v836_v26  ;;  %v1861_v30 = vmul.f32 0.23570226, %v837_v27 }
 0x22e   :  { %2883 = vst [vmem:[#allocation5 + $0x1960] sm:$0xff] %v1859_v25  ;;  %v1862_v31 = vmul.f32 0.23570226, %v838_v28  ;;  %v839_v32 = vld [vmem:[#allocation2 + $0x1980] sm:$0xff]  ;;  %v840_v33 = vld [vmem:[#allocation2 + $0x1988] sm:$0xff]  ;;  %v841_v34 = vld [vmem:[#allocation2 + $0x1990] sm:$0xff] }
 0x22f   :  { %2884 = vst [vmem:[#allocation5 + $0x1968] sm:$0xff] %v1860_v29  ;;  %2885 = vst [vmem:[#allocation5 + $0x1970] sm:$0xff] %v1861_v30  ;;  %v1863_v35 = vmul.f32 0.23570226, %v839_v32  ;;  %v1864_v36 = vmul.f32 0.23570226, %v840_v33 }
 0x230   :  { %2886 = vst [vmem:[#allocation5 + $0x1978] sm:$0xff] %v1862_v31  ;;  %v1865_v37 = vmul.f32 0.23570226, %v841_v34  ;;  %v842_v38 = vld [vmem:[#allocation2 + $0x1998] sm:$0xff]  ;;  %v843_v39 = vld [vmem:[#allocation2 + $0x19a0] sm:$0xff]  ;;  %v844_v40 = vld [vmem:[#allocation2 + $0x19a8] sm:$0xff] }
 0x231   :  { %2887 = vst [vmem:[#allocation5 + $0x1980] sm:$0xff] %v1863_v35  ;;  %2888 = vst [vmem:[#allocation5 + $0x1988] sm:$0xff] %v1864_v36  ;;  %v1866_v41 = vmul.f32 0.23570226, %v842_v38  ;;  %v1867_v42 = vmul.f32 0.23570226, %v843_v39 }
 0x232   :  { %2889 = vst [vmem:[#allocation5 + $0x1990] sm:$0xff] %v1865_v37  ;;  %v1868_v43 = vmul.f32 0.23570226, %v844_v40  ;;  %v845_v44 = vld [vmem:[#allocation2 + $0x19b0] sm:$0xff]  ;;  %v846_v45 = vld [vmem:[#allocation2 + $0x19b8] sm:$0xff]  ;;  %v847_v46 = vld [vmem:[#allocation2 + $0x19c0] sm:$0xff] }
 0x233   :  { %2890 = vst [vmem:[#allocation5 + $0x1998] sm:$0xff] %v1866_v41  ;;  %2891 = vst [vmem:[#allocation5 + $0x19a0] sm:$0xff] %v1867_v42  ;;  %v1869_v47 = vmul.f32 0.23570226, %v845_v44  ;;  %v1870_v48 = vmul.f32 0.23570226, %v846_v45 }
 0x234   :  { %2892 = vst [vmem:[#allocation5 + $0x19a8] sm:$0xff] %v1868_v43  ;;  %v1871_v49 = vmul.f32 0.23570226, %v847_v46  ;;  %v848_v50 = vld [vmem:[#allocation2 + $0x19c8] sm:$0xff]  ;;  %v849_v51 = vld [vmem:[#allocation2 + $0x19d0] sm:$0xff]  ;;  %v850_v52 = vld [vmem:[#allocation2 + $0x19d8] sm:$0xff] }
 0x235   :  { %2893 = vst [vmem:[#allocation5 + $0x19b0] sm:$0xff] %v1869_v47  ;;  %2894 = vst [vmem:[#allocation5 + $0x19b8] sm:$0xff] %v1870_v48  ;;  %v1872_v53 = vmul.f32 0.23570226, %v848_v50  ;;  %v1873_v54 = vmul.f32 0.23570226, %v849_v51 }
 0x236   :  { %2895 = vst [vmem:[#allocation5 + $0x19c0] sm:$0xff] %v1871_v49  ;;  %v1874_v55 = vmul.f32 0.23570226, %v850_v52  ;;  %v851_v56 = vld [vmem:[#allocation2 + $0x19e0] sm:$0xff]  ;;  %v852_v57 = vld [vmem:[#allocation2 + $0x19e8] sm:$0xff]  ;;  %v853_v58 = vld [vmem:[#allocation2 + $0x19f0] sm:$0xff] }
 0x237   :  { %2896 = vst [vmem:[#allocation5 + $0x19c8] sm:$0xff] %v1872_v53  ;;  %2897 = vst [vmem:[#allocation5 + $0x19d0] sm:$0xff] %v1873_v54  ;;  %v1875_v59 = vmul.f32 0.23570226, %v851_v56  ;;  %v1876_v60 = vmul.f32 0.23570226, %v852_v57 }
 0x238   :  { %2898 = vst [vmem:[#allocation5 + $0x19d8] sm:$0xff] %v1874_v55  ;;  %v1877_v61 = vmul.f32 0.23570226, %v853_v58  ;;  %v854_v62 = vld [vmem:[#allocation2 + $0x19f8] sm:$0xff]  ;;  %v855_v63 = vld [vmem:[#allocation2 + $0x1a00] sm:$0xff]  ;;  %v856_v0 = vld [vmem:[#allocation2 + $0x1a08] sm:$0xff] }
 0x239   :  { %2899 = vst [vmem:[#allocation5 + $0x19e0] sm:$0xff] %v1875_v59  ;;  %2900 = vst [vmem:[#allocation5 + $0x19e8] sm:$0xff] %v1876_v60  ;;  %v1878_v1 = vmul.f32 0.23570226, %v854_v62  ;;  %v1879_v2 = vmul.f32 0.23570226, %v855_v63 }
 0x23a   :  { %2901 = vst [vmem:[#allocation5 + $0x19f0] sm:$0xff] %v1877_v61  ;;  %v1880_v3 = vmul.f32 0.23570226, %v856_v0  ;;  %v857_v4 = vld [vmem:[#allocation2 + $0x1a10] sm:$0xff]  ;;  %v858_v5 = vld [vmem:[#allocation2 + $0x1a18] sm:$0xff]  ;;  %v859_v6 = vld [vmem:[#allocation2 + $0x1a20] sm:$0xff] }
 0x23b   :  { %2902 = vst [vmem:[#allocation5 + $0x19f8] sm:$0xff] %v1878_v1  ;;  %2903 = vst [vmem:[#allocation5 + $0x1a00] sm:$0xff] %v1879_v2  ;;  %v1881_v7 = vmul.f32 0.23570226, %v857_v4  ;;  %v1882_v8 = vmul.f32 0.23570226, %v858_v5 }
 0x23c   :  { %2904 = vst [vmem:[#allocation5 + $0x1a08] sm:$0xff] %v1880_v3  ;;  %v1883_v9 = vmul.f32 0.23570226, %v859_v6  ;;  %v860_v10 = vld [vmem:[#allocation2 + $0x1a28] sm:$0xff]  ;;  %v861_v11 = vld [vmem:[#allocation2 + $0x1a30] sm:$0xff]  ;;  %v862_v12 = vld [vmem:[#allocation2 + $0x1a38] sm:$0xff] }
 0x23d   :  { %2905 = vst [vmem:[#allocation5 + $0x1a10] sm:$0xff] %v1881_v7  ;;  %2906 = vst [vmem:[#allocation5 + $0x1a18] sm:$0xff] %v1882_v8  ;;  %v1884_v13 = vmul.f32 0.23570226, %v860_v10  ;;  %v1885_v14 = vmul.f32 0.23570226, %v861_v11 }
 0x23e   :  { %2907 = vst [vmem:[#allocation5 + $0x1a20] sm:$0xff] %v1883_v9  ;;  %v1886_v15 = vmul.f32 0.23570226, %v862_v12  ;;  %v863_v16 = vld [vmem:[#allocation2 + $0x1a40] sm:$0xff]  ;;  %v864_v17 = vld [vmem:[#allocation2 + $0x1a48] sm:$0xff]  ;;  %v865_v18 = vld [vmem:[#allocation2 + $0x1a50] sm:$0xff] }
 0x23f   :  { %2908 = vst [vmem:[#allocation5 + $0x1a28] sm:$0xff] %v1884_v13  ;;  %2909 = vst [vmem:[#allocation5 + $0x1a30] sm:$0xff] %v1885_v14  ;;  %v1887_v19 = vmul.f32 0.23570226, %v863_v16  ;;  %v1888_v20 = vmul.f32 0.23570226, %v864_v17 }
 0x240   :  { %2910 = vst [vmem:[#allocation5 + $0x1a38] sm:$0xff] %v1886_v15  ;;  %v1889_v21 = vmul.f32 0.23570226, %v865_v18  ;;  %v866_v22 = vld [vmem:[#allocation2 + $0x1a58] sm:$0xff]  ;;  %v867_v23 = vld [vmem:[#allocation2 + $0x1a60] sm:$0xff]  ;;  %v868_v24 = vld [vmem:[#allocation2 + $0x1a68] sm:$0xff] }
 0x241   :  { %2911 = vst [vmem:[#allocation5 + $0x1a40] sm:$0xff] %v1887_v19  ;;  %2912 = vst [vmem:[#allocation5 + $0x1a48] sm:$0xff] %v1888_v20  ;;  %v1890_v25 = vmul.f32 0.23570226, %v866_v22  ;;  %v1891_v26 = vmul.f32 0.23570226, %v867_v23 }
 0x242   :  { %2913 = vst [vmem:[#allocation5 + $0x1a50] sm:$0xff] %v1889_v21  ;;  %v1892_v27 = vmul.f32 0.23570226, %v868_v24  ;;  %v869_v28 = vld [vmem:[#allocation2 + $0x1a70] sm:$0xff]  ;;  %v870_v29 = vld [vmem:[#allocation2 + $0x1a78] sm:$0xff]  ;;  %v871_v30 = vld [vmem:[#allocation2 + $0x1a80] sm:$0xff] }
 0x243   :  { %2914 = vst [vmem:[#allocation5 + $0x1a58] sm:$0xff] %v1890_v25  ;;  %2915 = vst [vmem:[#allocation5 + $0x1a60] sm:$0xff] %v1891_v26  ;;  %v1893_v31 = vmul.f32 0.23570226, %v869_v28  ;;  %v1894_v32 = vmul.f32 0.23570226, %v870_v29 }
 0x244   :  { %2916 = vst [vmem:[#allocation5 + $0x1a68] sm:$0xff] %v1892_v27  ;;  %v1895_v33 = vmul.f32 0.23570226, %v871_v30  ;;  %v872_v34 = vld [vmem:[#allocation2 + $0x1a88] sm:$0xff]  ;;  %v873_v35 = vld [vmem:[#allocation2 + $0x1a90] sm:$0xff]  ;;  %v874_v36 = vld [vmem:[#allocation2 + $0x1a98] sm:$0xff] }
 0x245   :  { %2917 = vst [vmem:[#allocation5 + $0x1a70] sm:$0xff] %v1893_v31  ;;  %2918 = vst [vmem:[#allocation5 + $0x1a78] sm:$0xff] %v1894_v32  ;;  %v1896_v37 = vmul.f32 0.23570226, %v872_v34  ;;  %v1897_v38 = vmul.f32 0.23570226, %v873_v35 }
 0x246   :  { %2919 = vst [vmem:[#allocation5 + $0x1a80] sm:$0xff] %v1895_v33  ;;  %v1898_v39 = vmul.f32 0.23570226, %v874_v36  ;;  %v875_v40 = vld [vmem:[#allocation2 + $0x1aa0] sm:$0xff]  ;;  %v876_v41 = vld [vmem:[#allocation2 + $0x1aa8] sm:$0xff]  ;;  %v877_v42 = vld [vmem:[#allocation2 + $0x1ab0] sm:$0xff] }
 0x247   :  { %2920 = vst [vmem:[#allocation5 + $0x1a88] sm:$0xff] %v1896_v37  ;;  %2921 = vst [vmem:[#allocation5 + $0x1a90] sm:$0xff] %v1897_v38  ;;  %v1899_v43 = vmul.f32 0.23570226, %v875_v40  ;;  %v1900_v44 = vmul.f32 0.23570226, %v876_v41 }
 0x248   :  { %2922 = vst [vmem:[#allocation5 + $0x1a98] sm:$0xff] %v1898_v39  ;;  %v1901_v45 = vmul.f32 0.23570226, %v877_v42  ;;  %v878_v46 = vld [vmem:[#allocation2 + $0x1ab8] sm:$0xff]  ;;  %v879_v47 = vld [vmem:[#allocation2 + $0x1ac0] sm:$0xff]  ;;  %v880_v48 = vld [vmem:[#allocation2 + $0x1ac8] sm:$0xff] }
 0x249   :  { %2923 = vst [vmem:[#allocation5 + $0x1aa0] sm:$0xff] %v1899_v43  ;;  %2924 = vst [vmem:[#allocation5 + $0x1aa8] sm:$0xff] %v1900_v44  ;;  %v1902_v49 = vmul.f32 0.23570226, %v878_v46  ;;  %v1903_v50 = vmul.f32 0.23570226, %v879_v47 }
 0x24a   :  { %2925 = vst [vmem:[#allocation5 + $0x1ab0] sm:$0xff] %v1901_v45  ;;  %v1904_v51 = vmul.f32 0.23570226, %v880_v48  ;;  %v881_v52 = vld [vmem:[#allocation2 + $0x1ad0] sm:$0xff]  ;;  %v882_v53 = vld [vmem:[#allocation2 + $0x1ad8] sm:$0xff]  ;;  %v883_v54 = vld [vmem:[#allocation2 + $0x1ae0] sm:$0xff] }
 0x24b   :  { %2926 = vst [vmem:[#allocation5 + $0x1ab8] sm:$0xff] %v1902_v49  ;;  %2927 = vst [vmem:[#allocation5 + $0x1ac0] sm:$0xff] %v1903_v50  ;;  %v1905_v55 = vmul.f32 0.23570226, %v881_v52  ;;  %v1906_v56 = vmul.f32 0.23570226, %v882_v53 }
 0x24c   :  { %2928 = vst [vmem:[#allocation5 + $0x1ac8] sm:$0xff] %v1904_v51  ;;  %v1907_v57 = vmul.f32 0.23570226, %v883_v54  ;;  %v884_v58 = vld [vmem:[#allocation2 + $0x1ae8] sm:$0xff]  ;;  %v885_v59 = vld [vmem:[#allocation2 + $0x1af0] sm:$0xff]  ;;  %v886_v60 = vld [vmem:[#allocation2 + $0x1af8] sm:$0xff] }
 0x24d   :  { %2929 = vst [vmem:[#allocation5 + $0x1ad0] sm:$0xff] %v1905_v55  ;;  %2930 = vst [vmem:[#allocation5 + $0x1ad8] sm:$0xff] %v1906_v56  ;;  %v1908_v61 = vmul.f32 0.23570226, %v884_v58  ;;  %v1909_v62 = vmul.f32 0.23570226, %v885_v59 }
 0x24e   :  { %2931 = vst [vmem:[#allocation5 + $0x1ae0] sm:$0xff] %v1907_v57  ;;  %v1910_v63 = vmul.f32 0.23570226, %v886_v60  ;;  %v887_v0 = vld [vmem:[#allocation2 + $0x1b00] sm:$0xff]  ;;  %v888_v1 = vld [vmem:[#allocation2 + $0x1b08] sm:$0xff]  ;;  %v889_v2 = vld [vmem:[#allocation2 + $0x1b10] sm:$0xff] }
 0x24f   :  { %2932 = vst [vmem:[#allocation5 + $0x1ae8] sm:$0xff] %v1908_v61  ;;  %2933 = vst [vmem:[#allocation5 + $0x1af0] sm:$0xff] %v1909_v62  ;;  %v1911_v3 = vmul.f32 0.23570226, %v887_v0  ;;  %v1912_v4 = vmul.f32 0.23570226, %v888_v1 }
 0x250   :  { %2934 = vst [vmem:[#allocation5 + $0x1af8] sm:$0xff] %v1910_v63  ;;  %v1913_v5 = vmul.f32 0.23570226, %v889_v2  ;;  %v890_v6 = vld [vmem:[#allocation2 + $0x1b18] sm:$0xff]  ;;  %v891_v7 = vld [vmem:[#allocation2 + $0x1b20] sm:$0xff]  ;;  %v892_v8 = vld [vmem:[#allocation2 + $0x1b28] sm:$0xff] }
 0x251   :  { %2935 = vst [vmem:[#allocation5 + $0x1b00] sm:$0xff] %v1911_v3  ;;  %2936 = vst [vmem:[#allocation5 + $0x1b08] sm:$0xff] %v1912_v4  ;;  %v1914_v9 = vmul.f32 0.23570226, %v890_v6  ;;  %v1915_v10 = vmul.f32 0.23570226, %v891_v7 }
 0x252   :  { %2937 = vst [vmem:[#allocation5 + $0x1b10] sm:$0xff] %v1913_v5  ;;  %v1916_v11 = vmul.f32 0.23570226, %v892_v8  ;;  %v893_v12 = vld [vmem:[#allocation2 + $0x1b30] sm:$0xff]  ;;  %v894_v13 = vld [vmem:[#allocation2 + $0x1b38] sm:$0xff]  ;;  %v895_v14 = vld [vmem:[#allocation2 + $0x1b40] sm:$0xff] }
 0x253   :  { %2938 = vst [vmem:[#allocation5 + $0x1b18] sm:$0xff] %v1914_v9  ;;  %2939 = vst [vmem:[#allocation5 + $0x1b20] sm:$0xff] %v1915_v10  ;;  %v1917_v15 = vmul.f32 0.23570226, %v893_v12  ;;  %v1918_v16 = vmul.f32 0.23570226, %v894_v13 }
 0x254   :  { %2940 = vst [vmem:[#allocation5 + $0x1b28] sm:$0xff] %v1916_v11  ;;  %v1919_v17 = vmul.f32 0.23570226, %v895_v14  ;;  %v896_v18 = vld [vmem:[#allocation2 + $0x1b48] sm:$0xff]  ;;  %v897_v19 = vld [vmem:[#allocation2 + $0x1b50] sm:$0xff]  ;;  %v898_v20 = vld [vmem:[#allocation2 + $0x1b58] sm:$0xff] }
 0x255   :  { %2941 = vst [vmem:[#allocation5 + $0x1b30] sm:$0xff] %v1917_v15  ;;  %2942 = vst [vmem:[#allocation5 + $0x1b38] sm:$0xff] %v1918_v16  ;;  %v1920_v21 = vmul.f32 0.23570226, %v896_v18  ;;  %v1921_v22 = vmul.f32 0.23570226, %v897_v19 }
 0x256   :  { %2943 = vst [vmem:[#allocation5 + $0x1b40] sm:$0xff] %v1919_v17  ;;  %v1922_v23 = vmul.f32 0.23570226, %v898_v20  ;;  %v899_v24 = vld [vmem:[#allocation2 + $0x1b60] sm:$0xff]  ;;  %v900_v25 = vld [vmem:[#allocation2 + $0x1b68] sm:$0xff]  ;;  %v901_v26 = vld [vmem:[#allocation2 + $0x1b70] sm:$0xff] }
 0x257   :  { %2944 = vst [vmem:[#allocation5 + $0x1b48] sm:$0xff] %v1920_v21  ;;  %2945 = vst [vmem:[#allocation5 + $0x1b50] sm:$0xff] %v1921_v22  ;;  %v1923_v27 = vmul.f32 0.23570226, %v899_v24  ;;  %v1924_v28 = vmul.f32 0.23570226, %v900_v25 }
 0x258   :  { %2946 = vst [vmem:[#allocation5 + $0x1b58] sm:$0xff] %v1922_v23  ;;  %v1925_v29 = vmul.f32 0.23570226, %v901_v26  ;;  %v902_v30 = vld [vmem:[#allocation2 + $0x1b78] sm:$0xff]  ;;  %v903_v31 = vld [vmem:[#allocation2 + $0x1b80] sm:$0xff]  ;;  %v904_v32 = vld [vmem:[#allocation2 + $0x1b88] sm:$0xff] }
 0x259   :  { %2947 = vst [vmem:[#allocation5 + $0x1b60] sm:$0xff] %v1923_v27  ;;  %2948 = vst [vmem:[#allocation5 + $0x1b68] sm:$0xff] %v1924_v28  ;;  %v1926_v33 = vmul.f32 0.23570226, %v902_v30  ;;  %v1927_v34 = vmul.f32 0.23570226, %v903_v31 }
 0x25a   :  { %2949 = vst [vmem:[#allocation5 + $0x1b70] sm:$0xff] %v1925_v29  ;;  %v1928_v35 = vmul.f32 0.23570226, %v904_v32  ;;  %v905_v36 = vld [vmem:[#allocation2 + $0x1b90] sm:$0xff]  ;;  %v906_v37 = vld [vmem:[#allocation2 + $0x1b98] sm:$0xff]  ;;  %v907_v38 = vld [vmem:[#allocation2 + $0x1ba0] sm:$0xff] }
 0x25b   :  { %2950 = vst [vmem:[#allocation5 + $0x1b78] sm:$0xff] %v1926_v33  ;;  %2951 = vst [vmem:[#allocation5 + $0x1b80] sm:$0xff] %v1927_v34  ;;  %v1929_v39 = vmul.f32 0.23570226, %v905_v36  ;;  %v1930_v40 = vmul.f32 0.23570226, %v906_v37 }
 0x25c   :  { %2952 = vst [vmem:[#allocation5 + $0x1b88] sm:$0xff] %v1928_v35  ;;  %v1931_v41 = vmul.f32 0.23570226, %v907_v38  ;;  %v908_v42 = vld [vmem:[#allocation2 + $0x1ba8] sm:$0xff]  ;;  %v909_v43 = vld [vmem:[#allocation2 + $0x1bb0] sm:$0xff]  ;;  %v910_v44 = vld [vmem:[#allocation2 + $0x1bb8] sm:$0xff] }
 0x25d   :  { %2953 = vst [vmem:[#allocation5 + $0x1b90] sm:$0xff] %v1929_v39  ;;  %2954 = vst [vmem:[#allocation5 + $0x1b98] sm:$0xff] %v1930_v40  ;;  %v1932_v45 = vmul.f32 0.23570226, %v908_v42  ;;  %v1933_v46 = vmul.f32 0.23570226, %v909_v43 }
 0x25e   :  { %2955 = vst [vmem:[#allocation5 + $0x1ba0] sm:$0xff] %v1931_v41  ;;  %v1934_v47 = vmul.f32 0.23570226, %v910_v44  ;;  %v911_v48 = vld [vmem:[#allocation2 + $0x1bc0] sm:$0xff]  ;;  %v912_v49 = vld [vmem:[#allocation2 + $0x1bc8] sm:$0xff]  ;;  %v913_v50 = vld [vmem:[#allocation2 + $0x1bd0] sm:$0xff] }
 0x25f   :  { %2956 = vst [vmem:[#allocation5 + $0x1ba8] sm:$0xff] %v1932_v45  ;;  %2957 = vst [vmem:[#allocation5 + $0x1bb0] sm:$0xff] %v1933_v46  ;;  %v1935_v51 = vmul.f32 0.23570226, %v911_v48  ;;  %v1936_v52 = vmul.f32 0.23570226, %v912_v49 }
 0x260   :  { %2958 = vst [vmem:[#allocation5 + $0x1bb8] sm:$0xff] %v1934_v47  ;;  %v1937_v53 = vmul.f32 0.23570226, %v913_v50  ;;  %v914_v54 = vld [vmem:[#allocation2 + $0x1bd8] sm:$0xff]  ;;  %v915_v55 = vld [vmem:[#allocation2 + $0x1be0] sm:$0xff]  ;;  %v916_v56 = vld [vmem:[#allocation2 + $0x1be8] sm:$0xff] }
 0x261   :  { %2959 = vst [vmem:[#allocation5 + $0x1bc0] sm:$0xff] %v1935_v51  ;;  %2960 = vst [vmem:[#allocation5 + $0x1bc8] sm:$0xff] %v1936_v52  ;;  %v1938_v57 = vmul.f32 0.23570226, %v914_v54  ;;  %v1939_v58 = vmul.f32 0.23570226, %v915_v55 }
 0x262   :  { %2961 = vst [vmem:[#allocation5 + $0x1bd0] sm:$0xff] %v1937_v53  ;;  %v1940_v59 = vmul.f32 0.23570226, %v916_v56  ;;  %v917_v60 = vld [vmem:[#allocation2 + $0x1bf0] sm:$0xff]  ;;  %v918_v61 = vld [vmem:[#allocation2 + $0x1bf8] sm:$0xff]  ;;  %v919_v62 = vld [vmem:[#allocation2 + $0x1c00] sm:$0xff] }
 0x263   :  { %2962 = vst [vmem:[#allocation5 + $0x1bd8] sm:$0xff] %v1938_v57  ;;  %2963 = vst [vmem:[#allocation5 + $0x1be0] sm:$0xff] %v1939_v58  ;;  %v1941_v63 = vmul.f32 0.23570226, %v917_v60  ;;  %v1942_v0 = vmul.f32 0.23570226, %v918_v61 }
 0x264   :  { %2964 = vst [vmem:[#allocation5 + $0x1be8] sm:$0xff] %v1940_v59  ;;  %v1943_v1 = vmul.f32 0.23570226, %v919_v62  ;;  %v920_v2 = vld [vmem:[#allocation2 + $0x1c08] sm:$0xff]  ;;  %v921_v3 = vld [vmem:[#allocation2 + $0x1c10] sm:$0xff]  ;;  %v922_v4 = vld [vmem:[#allocation2 + $0x1c18] sm:$0xff] }
 0x265   :  { %2965 = vst [vmem:[#allocation5 + $0x1bf0] sm:$0xff] %v1941_v63  ;;  %2966 = vst [vmem:[#allocation5 + $0x1bf8] sm:$0xff] %v1942_v0  ;;  %v1944_v5 = vmul.f32 0.23570226, %v920_v2  ;;  %v1945_v6 = vmul.f32 0.23570226, %v921_v3 }
 0x266   :  { %2967 = vst [vmem:[#allocation5 + $0x1c00] sm:$0xff] %v1943_v1  ;;  %v1946_v7 = vmul.f32 0.23570226, %v922_v4  ;;  %v923_v8 = vld [vmem:[#allocation2 + $0x1c20] sm:$0xff]  ;;  %v924_v9 = vld [vmem:[#allocation2 + $0x1c28] sm:$0xff]  ;;  %v925_v10 = vld [vmem:[#allocation2 + $0x1c30] sm:$0xff] }
 0x267   :  { %2968 = vst [vmem:[#allocation5 + $0x1c08] sm:$0xff] %v1944_v5  ;;  %2969 = vst [vmem:[#allocation5 + $0x1c10] sm:$0xff] %v1945_v6  ;;  %v1947_v11 = vmul.f32 0.23570226, %v923_v8  ;;  %v1948_v12 = vmul.f32 0.23570226, %v924_v9 }
 0x268   :  { %2970 = vst [vmem:[#allocation5 + $0x1c18] sm:$0xff] %v1946_v7  ;;  %v1949_v13 = vmul.f32 0.23570226, %v925_v10  ;;  %v926_v14 = vld [vmem:[#allocation2 + $0x1c38] sm:$0xff]  ;;  %v927_v15 = vld [vmem:[#allocation2 + $0x1c40] sm:$0xff]  ;;  %v928_v16 = vld [vmem:[#allocation2 + $0x1c48] sm:$0xff] }
 0x269   :  { %2971 = vst [vmem:[#allocation5 + $0x1c20] sm:$0xff] %v1947_v11  ;;  %2972 = vst [vmem:[#allocation5 + $0x1c28] sm:$0xff] %v1948_v12  ;;  %v1950_v17 = vmul.f32 0.23570226, %v926_v14  ;;  %v1951_v18 = vmul.f32 0.23570226, %v927_v15 }
 0x26a   :  { %2973 = vst [vmem:[#allocation5 + $0x1c30] sm:$0xff] %v1949_v13  ;;  %v1952_v19 = vmul.f32 0.23570226, %v928_v16  ;;  %v929_v20 = vld [vmem:[#allocation2 + $0x1c50] sm:$0xff]  ;;  %v930_v21 = vld [vmem:[#allocation2 + $0x1c58] sm:$0xff]  ;;  %v931_v22 = vld [vmem:[#allocation2 + $0x1c60] sm:$0xff] }
 0x26b   :  { %2974 = vst [vmem:[#allocation5 + $0x1c38] sm:$0xff] %v1950_v17  ;;  %2975 = vst [vmem:[#allocation5 + $0x1c40] sm:$0xff] %v1951_v18  ;;  %v1953_v23 = vmul.f32 0.23570226, %v929_v20  ;;  %v1954_v24 = vmul.f32 0.23570226, %v930_v21 }
 0x26c   :  { %2976 = vst [vmem:[#allocation5 + $0x1c48] sm:$0xff] %v1952_v19  ;;  %v1955_v25 = vmul.f32 0.23570226, %v931_v22  ;;  %v932_v26 = vld [vmem:[#allocation2 + $0x1c68] sm:$0xff]  ;;  %v933_v27 = vld [vmem:[#allocation2 + $0x1c70] sm:$0xff]  ;;  %v934_v28 = vld [vmem:[#allocation2 + $0x1c78] sm:$0xff] }
 0x26d   :  { %2977 = vst [vmem:[#allocation5 + $0x1c50] sm:$0xff] %v1953_v23  ;;  %2978 = vst [vmem:[#allocation5 + $0x1c58] sm:$0xff] %v1954_v24  ;;  %v1956_v29 = vmul.f32 0.23570226, %v932_v26  ;;  %v1957_v30 = vmul.f32 0.23570226, %v933_v27 }
 0x26e   :  { %2979 = vst [vmem:[#allocation5 + $0x1c60] sm:$0xff] %v1955_v25  ;;  %v1958_v31 = vmul.f32 0.23570226, %v934_v28  ;;  %v935_v32 = vld [vmem:[#allocation2 + $0x1c80] sm:$0xff]  ;;  %v936_v33 = vld [vmem:[#allocation2 + $0x1c88] sm:$0xff]  ;;  %v937_v34 = vld [vmem:[#allocation2 + $0x1c90] sm:$0xff] }
 0x26f   :  { %2980 = vst [vmem:[#allocation5 + $0x1c68] sm:$0xff] %v1956_v29  ;;  %2981 = vst [vmem:[#allocation5 + $0x1c70] sm:$0xff] %v1957_v30  ;;  %v1959_v35 = vmul.f32 0.23570226, %v935_v32  ;;  %v1960_v36 = vmul.f32 0.23570226, %v936_v33 }
 0x270   :  { %2982 = vst [vmem:[#allocation5 + $0x1c78] sm:$0xff] %v1958_v31  ;;  %v1961_v37 = vmul.f32 0.23570226, %v937_v34  ;;  %v938_v38 = vld [vmem:[#allocation2 + $0x1c98] sm:$0xff]  ;;  %v939_v39 = vld [vmem:[#allocation2 + $0x1ca0] sm:$0xff]  ;;  %v940_v40 = vld [vmem:[#allocation2 + $0x1ca8] sm:$0xff] }
 0x271   :  { %2983 = vst [vmem:[#allocation5 + $0x1c80] sm:$0xff] %v1959_v35  ;;  %2984 = vst [vmem:[#allocation5 + $0x1c88] sm:$0xff] %v1960_v36  ;;  %v1962_v41 = vmul.f32 0.23570226, %v938_v38  ;;  %v1963_v42 = vmul.f32 0.23570226, %v939_v39 }
 0x272   :  { %2985 = vst [vmem:[#allocation5 + $0x1c90] sm:$0xff] %v1961_v37  ;;  %v1964_v43 = vmul.f32 0.23570226, %v940_v40  ;;  %v941_v44 = vld [vmem:[#allocation2 + $0x1cb0] sm:$0xff]  ;;  %v942_v45 = vld [vmem:[#allocation2 + $0x1cb8] sm:$0xff]  ;;  %v943_v46 = vld [vmem:[#allocation2 + $0x1cc0] sm:$0xff] }
 0x273   :  { %2986 = vst [vmem:[#allocation5 + $0x1c98] sm:$0xff] %v1962_v41  ;;  %2987 = vst [vmem:[#allocation5 + $0x1ca0] sm:$0xff] %v1963_v42  ;;  %v1965_v47 = vmul.f32 0.23570226, %v941_v44  ;;  %v1966_v48 = vmul.f32 0.23570226, %v942_v45 }
 0x274   :  { %2988 = vst [vmem:[#allocation5 + $0x1ca8] sm:$0xff] %v1964_v43  ;;  %v1967_v49 = vmul.f32 0.23570226, %v943_v46  ;;  %v944_v50 = vld [vmem:[#allocation2 + $0x1cc8] sm:$0xff]  ;;  %v945_v51 = vld [vmem:[#allocation2 + $0x1cd0] sm:$0xff]  ;;  %v946_v52 = vld [vmem:[#allocation2 + $0x1cd8] sm:$0xff] }
 0x275   :  { %2989 = vst [vmem:[#allocation5 + $0x1cb0] sm:$0xff] %v1965_v47  ;;  %2990 = vst [vmem:[#allocation5 + $0x1cb8] sm:$0xff] %v1966_v48  ;;  %v1968_v53 = vmul.f32 0.23570226, %v944_v50  ;;  %v1969_v54 = vmul.f32 0.23570226, %v945_v51 }
 0x276   :  { %2991 = vst [vmem:[#allocation5 + $0x1cc0] sm:$0xff] %v1967_v49  ;;  %v1970_v55 = vmul.f32 0.23570226, %v946_v52  ;;  %v947_v56 = vld [vmem:[#allocation2 + $0x1ce0] sm:$0xff]  ;;  %v948_v57 = vld [vmem:[#allocation2 + $0x1ce8] sm:$0xff]  ;;  %v949_v58 = vld [vmem:[#allocation2 + $0x1cf0] sm:$0xff] }
 0x277   :  { %2992 = vst [vmem:[#allocation5 + $0x1cc8] sm:$0xff] %v1968_v53  ;;  %2993 = vst [vmem:[#allocation5 + $0x1cd0] sm:$0xff] %v1969_v54  ;;  %v1971_v59 = vmul.f32 0.23570226, %v947_v56  ;;  %v1972_v60 = vmul.f32 0.23570226, %v948_v57 }
 0x278   :  { %2994 = vst [vmem:[#allocation5 + $0x1cd8] sm:$0xff] %v1970_v55  ;;  %v1973_v61 = vmul.f32 0.23570226, %v949_v58  ;;  %v950_v62 = vld [vmem:[#allocation2 + $0x1cf8] sm:$0xff]  ;;  %v951_v63 = vld [vmem:[#allocation2 + $0x1d00] sm:$0xff]  ;;  %v952_v0 = vld [vmem:[#allocation2 + $0x1d08] sm:$0xff] }
 0x279   :  { %2995 = vst [vmem:[#allocation5 + $0x1ce0] sm:$0xff] %v1971_v59  ;;  %2996 = vst [vmem:[#allocation5 + $0x1ce8] sm:$0xff] %v1972_v60  ;;  %v1974_v1 = vmul.f32 0.23570226, %v950_v62  ;;  %v1975_v2 = vmul.f32 0.23570226, %v951_v63 }
 0x27a   :  { %2997 = vst [vmem:[#allocation5 + $0x1cf0] sm:$0xff] %v1973_v61  ;;  %v1976_v3 = vmul.f32 0.23570226, %v952_v0  ;;  %v953_v4 = vld [vmem:[#allocation2 + $0x1d10] sm:$0xff]  ;;  %v954_v5 = vld [vmem:[#allocation2 + $0x1d18] sm:$0xff]  ;;  %v955_v6 = vld [vmem:[#allocation2 + $0x1d20] sm:$0xff] }
 0x27b   :  { %2998 = vst [vmem:[#allocation5 + $0x1cf8] sm:$0xff] %v1974_v1  ;;  %2999 = vst [vmem:[#allocation5 + $0x1d00] sm:$0xff] %v1975_v2  ;;  %v1977_v7 = vmul.f32 0.23570226, %v953_v4  ;;  %v1978_v8 = vmul.f32 0.23570226, %v954_v5 }
 0x27c   :  { %3000 = vst [vmem:[#allocation5 + $0x1d08] sm:$0xff] %v1976_v3  ;;  %v1979_v9 = vmul.f32 0.23570226, %v955_v6  ;;  %v956_v10 = vld [vmem:[#allocation2 + $0x1d28] sm:$0xff]  ;;  %v957_v11 = vld [vmem:[#allocation2 + $0x1d30] sm:$0xff]  ;;  %v958_v12 = vld [vmem:[#allocation2 + $0x1d38] sm:$0xff] }
 0x27d   :  { %3001 = vst [vmem:[#allocation5 + $0x1d10] sm:$0xff] %v1977_v7  ;;  %3002 = vst [vmem:[#allocation5 + $0x1d18] sm:$0xff] %v1978_v8  ;;  %v1980_v13 = vmul.f32 0.23570226, %v956_v10  ;;  %v1981_v14 = vmul.f32 0.23570226, %v957_v11 }
 0x27e   :  { %3003 = vst [vmem:[#allocation5 + $0x1d20] sm:$0xff] %v1979_v9  ;;  %v1982_v15 = vmul.f32 0.23570226, %v958_v12  ;;  %v959_v16 = vld [vmem:[#allocation2 + $0x1d40] sm:$0xff]  ;;  %v960_v17 = vld [vmem:[#allocation2 + $0x1d48] sm:$0xff]  ;;  %v961_v18 = vld [vmem:[#allocation2 + $0x1d50] sm:$0xff] }
 0x27f   :  { %3004 = vst [vmem:[#allocation5 + $0x1d28] sm:$0xff] %v1980_v13  ;;  %3005 = vst [vmem:[#allocation5 + $0x1d30] sm:$0xff] %v1981_v14  ;;  %v1983_v19 = vmul.f32 0.23570226, %v959_v16  ;;  %v1984_v20 = vmul.f32 0.23570226, %v960_v17 }
 0x280   :  { %3006 = vst [vmem:[#allocation5 + $0x1d38] sm:$0xff] %v1982_v15  ;;  %v1985_v21 = vmul.f32 0.23570226, %v961_v18  ;;  %v962_v22 = vld [vmem:[#allocation2 + $0x1d58] sm:$0xff]  ;;  %v963_v23 = vld [vmem:[#allocation2 + $0x1d60] sm:$0xff]  ;;  %v964_v24 = vld [vmem:[#allocation2 + $0x1d68] sm:$0xff] }
 0x281   :  { %3007 = vst [vmem:[#allocation5 + $0x1d40] sm:$0xff] %v1983_v19  ;;  %3008 = vst [vmem:[#allocation5 + $0x1d48] sm:$0xff] %v1984_v20  ;;  %v1986_v25 = vmul.f32 0.23570226, %v962_v22  ;;  %v1987_v26 = vmul.f32 0.23570226, %v963_v23 }
 0x282   :  { %3009 = vst [vmem:[#allocation5 + $0x1d50] sm:$0xff] %v1985_v21  ;;  %v1988_v27 = vmul.f32 0.23570226, %v964_v24  ;;  %v965_v28 = vld [vmem:[#allocation2 + $0x1d70] sm:$0xff]  ;;  %v966_v29 = vld [vmem:[#allocation2 + $0x1d78] sm:$0xff]  ;;  %v967_v30 = vld [vmem:[#allocation2 + $0x1d80] sm:$0xff] }
 0x283   :  { %3010 = vst [vmem:[#allocation5 + $0x1d58] sm:$0xff] %v1986_v25  ;;  %3011 = vst [vmem:[#allocation5 + $0x1d60] sm:$0xff] %v1987_v26  ;;  %v1989_v31 = vmul.f32 0.23570226, %v965_v28  ;;  %v1990_v32 = vmul.f32 0.23570226, %v966_v29 }
 0x284   :  { %3012 = vst [vmem:[#allocation5 + $0x1d68] sm:$0xff] %v1988_v27  ;;  %v1991_v33 = vmul.f32 0.23570226, %v967_v30  ;;  %v968_v34 = vld [vmem:[#allocation2 + $0x1d88] sm:$0xff]  ;;  %v969_v35 = vld [vmem:[#allocation2 + $0x1d90] sm:$0xff]  ;;  %v970_v36 = vld [vmem:[#allocation2 + $0x1d98] sm:$0xff] }
 0x285   :  { %3013 = vst [vmem:[#allocation5 + $0x1d70] sm:$0xff] %v1989_v31  ;;  %3014 = vst [vmem:[#allocation5 + $0x1d78] sm:$0xff] %v1990_v32  ;;  %v1992_v37 = vmul.f32 0.23570226, %v968_v34  ;;  %v1993_v38 = vmul.f32 0.23570226, %v969_v35 }
 0x286   :  { %3015 = vst [vmem:[#allocation5 + $0x1d80] sm:$0xff] %v1991_v33  ;;  %v1994_v39 = vmul.f32 0.23570226, %v970_v36  ;;  %v971_v40 = vld [vmem:[#allocation2 + $0x1da0] sm:$0xff]  ;;  %v972_v41 = vld [vmem:[#allocation2 + $0x1da8] sm:$0xff]  ;;  %v973_v42 = vld [vmem:[#allocation2 + $0x1db0] sm:$0xff] }
 0x287   :  { %3016 = vst [vmem:[#allocation5 + $0x1d88] sm:$0xff] %v1992_v37  ;;  %3017 = vst [vmem:[#allocation5 + $0x1d90] sm:$0xff] %v1993_v38  ;;  %v1995_v43 = vmul.f32 0.23570226, %v971_v40  ;;  %v1996_v44 = vmul.f32 0.23570226, %v972_v41 }
 0x288   :  { %3018 = vst [vmem:[#allocation5 + $0x1d98] sm:$0xff] %v1994_v39  ;;  %v1997_v45 = vmul.f32 0.23570226, %v973_v42  ;;  %v974_v46 = vld [vmem:[#allocation2 + $0x1db8] sm:$0xff]  ;;  %v975_v47 = vld [vmem:[#allocation2 + $0x1dc0] sm:$0xff]  ;;  %v976_v48 = vld [vmem:[#allocation2 + $0x1dc8] sm:$0xff] }
 0x289   :  { %3019 = vst [vmem:[#allocation5 + $0x1da0] sm:$0xff] %v1995_v43  ;;  %3020 = vst [vmem:[#allocation5 + $0x1da8] sm:$0xff] %v1996_v44  ;;  %v1998_v49 = vmul.f32 0.23570226, %v974_v46  ;;  %v1999_v50 = vmul.f32 0.23570226, %v975_v47 }
 0x28a   :  { %3021 = vst [vmem:[#allocation5 + $0x1db0] sm:$0xff] %v1997_v45  ;;  %v2000_v51 = vmul.f32 0.23570226, %v976_v48  ;;  %v977_v52 = vld [vmem:[#allocation2 + $0x1dd0] sm:$0xff]  ;;  %v978_v53 = vld [vmem:[#allocation2 + $0x1dd8] sm:$0xff]  ;;  %v979_v54 = vld [vmem:[#allocation2 + $0x1de0] sm:$0xff] }
 0x28b   :  { %3022 = vst [vmem:[#allocation5 + $0x1db8] sm:$0xff] %v1998_v49  ;;  %3023 = vst [vmem:[#allocation5 + $0x1dc0] sm:$0xff] %v1999_v50  ;;  %v2001_v55 = vmul.f32 0.23570226, %v977_v52  ;;  %v2002_v56 = vmul.f32 0.23570226, %v978_v53 }
 0x28c   :  { %3024 = vst [vmem:[#allocation5 + $0x1dc8] sm:$0xff] %v2000_v51  ;;  %v2003_v57 = vmul.f32 0.23570226, %v979_v54  ;;  %v980_v58 = vld [vmem:[#allocation2 + $0x1de8] sm:$0xff]  ;;  %v981_v59 = vld [vmem:[#allocation2 + $0x1df0] sm:$0xff]  ;;  %v982_v60 = vld [vmem:[#allocation2 + $0x1df8] sm:$0xff] }
 0x28d   :  { %3025 = vst [vmem:[#allocation5 + $0x1dd0] sm:$0xff] %v2001_v55  ;;  %3026 = vst [vmem:[#allocation5 + $0x1dd8] sm:$0xff] %v2002_v56  ;;  %v2004_v61 = vmul.f32 0.23570226, %v980_v58  ;;  %v2005_v62 = vmul.f32 0.23570226, %v981_v59 }
 0x28e   :  { %3027 = vst [vmem:[#allocation5 + $0x1de0] sm:$0xff] %v2003_v57  ;;  %v2006_v63 = vmul.f32 0.23570226, %v982_v60  ;;  %v983_v0 = vld [vmem:[#allocation2 + $0x1e00] sm:$0xff]  ;;  %v984_v1 = vld [vmem:[#allocation2 + $0x1e08] sm:$0xff]  ;;  %v985_v2 = vld [vmem:[#allocation2 + $0x1e10] sm:$0xff] }
 0x28f   :  { %3028 = vst [vmem:[#allocation5 + $0x1de8] sm:$0xff] %v2004_v61  ;;  %3029 = vst [vmem:[#allocation5 + $0x1df0] sm:$0xff] %v2005_v62  ;;  %v2007_v3 = vmul.f32 0.23570226, %v983_v0  ;;  %v2008_v4 = vmul.f32 0.23570226, %v984_v1 }
 0x290   :  { %3030 = vst [vmem:[#allocation5 + $0x1df8] sm:$0xff] %v2006_v63  ;;  %v2009_v5 = vmul.f32 0.23570226, %v985_v2  ;;  %v986_v6 = vld [vmem:[#allocation2 + $0x1e18] sm:$0xff]  ;;  %v987_v7 = vld [vmem:[#allocation2 + $0x1e20] sm:$0xff]  ;;  %v988_v8 = vld [vmem:[#allocation2 + $0x1e28] sm:$0xff] }
 0x291   :  { %3031 = vst [vmem:[#allocation5 + $0x1e00] sm:$0xff] %v2007_v3  ;;  %3032 = vst [vmem:[#allocation5 + $0x1e08] sm:$0xff] %v2008_v4  ;;  %v2010_v9 = vmul.f32 0.23570226, %v986_v6  ;;  %v2011_v10 = vmul.f32 0.23570226, %v987_v7 }
 0x292   :  { %3033 = vst [vmem:[#allocation5 + $0x1e10] sm:$0xff] %v2009_v5  ;;  %v2012_v11 = vmul.f32 0.23570226, %v988_v8  ;;  %v989_v12 = vld [vmem:[#allocation2 + $0x1e30] sm:$0xff]  ;;  %v990_v13 = vld [vmem:[#allocation2 + $0x1e38] sm:$0xff]  ;;  %v991_v14 = vld [vmem:[#allocation2 + $0x1e40] sm:$0xff] }
 0x293   :  { %3034 = vst [vmem:[#allocation5 + $0x1e18] sm:$0xff] %v2010_v9  ;;  %3035 = vst [vmem:[#allocation5 + $0x1e20] sm:$0xff] %v2011_v10  ;;  %v2013_v15 = vmul.f32 0.23570226, %v989_v12  ;;  %v2014_v16 = vmul.f32 0.23570226, %v990_v13 }
 0x294   :  { %3036 = vst [vmem:[#allocation5 + $0x1e28] sm:$0xff] %v2012_v11  ;;  %v2015_v17 = vmul.f32 0.23570226, %v991_v14  ;;  %v992_v18 = vld [vmem:[#allocation2 + $0x1e48] sm:$0xff]  ;;  %v993_v19 = vld [vmem:[#allocation2 + $0x1e50] sm:$0xff]  ;;  %v994_v20 = vld [vmem:[#allocation2 + $0x1e58] sm:$0xff] }
 0x295   :  { %3037 = vst [vmem:[#allocation5 + $0x1e30] sm:$0xff] %v2013_v15  ;;  %3038 = vst [vmem:[#allocation5 + $0x1e38] sm:$0xff] %v2014_v16  ;;  %v2016_v21 = vmul.f32 0.23570226, %v992_v18  ;;  %v2017_v22 = vmul.f32 0.23570226, %v993_v19 }
 0x296   :  { %3039 = vst [vmem:[#allocation5 + $0x1e40] sm:$0xff] %v2015_v17  ;;  %v2018_v23 = vmul.f32 0.23570226, %v994_v20  ;;  %v995_v24 = vld [vmem:[#allocation2 + $0x1e60] sm:$0xff]  ;;  %v996_v25 = vld [vmem:[#allocation2 + $0x1e68] sm:$0xff]  ;;  %v997_v26 = vld [vmem:[#allocation2 + $0x1e70] sm:$0xff] }
 0x297   :  { %3040 = vst [vmem:[#allocation5 + $0x1e48] sm:$0xff] %v2016_v21  ;;  %3041 = vst [vmem:[#allocation5 + $0x1e50] sm:$0xff] %v2017_v22  ;;  %v2019_v27 = vmul.f32 0.23570226, %v995_v24  ;;  %v2020_v28 = vmul.f32 0.23570226, %v996_v25 }
 0x298   :  { %3042 = vst [vmem:[#allocation5 + $0x1e58] sm:$0xff] %v2018_v23  ;;  %v2021_v29 = vmul.f32 0.23570226, %v997_v26  ;;  %v998_v30 = vld [vmem:[#allocation2 + $0x1e78] sm:$0xff]  ;;  %v999_v31 = vld [vmem:[#allocation2 + $0x1e80] sm:$0xff]  ;;  %v1000_v32 = vld [vmem:[#allocation2 + $0x1e88] sm:$0xff] }
 0x299   :  { %3043 = vst [vmem:[#allocation5 + $0x1e60] sm:$0xff] %v2019_v27  ;;  %3044 = vst [vmem:[#allocation5 + $0x1e68] sm:$0xff] %v2020_v28  ;;  %v2022_v33 = vmul.f32 0.23570226, %v998_v30  ;;  %v2023_v34 = vmul.f32 0.23570226, %v999_v31 }
 0x29a   :  { %3045 = vst [vmem:[#allocation5 + $0x1e70] sm:$0xff] %v2021_v29  ;;  %v2024_v35 = vmul.f32 0.23570226, %v1000_v32  ;;  %v1001_v36 = vld [vmem:[#allocation2 + $0x1e90] sm:$0xff]  ;;  %v1002_v37 = vld [vmem:[#allocation2 + $0x1e98] sm:$0xff]  ;;  %v1003_v38 = vld [vmem:[#allocation2 + $0x1ea0] sm:$0xff] }
 0x29b   :  { %3046 = vst [vmem:[#allocation5 + $0x1e78] sm:$0xff] %v2022_v33  ;;  %3047 = vst [vmem:[#allocation5 + $0x1e80] sm:$0xff] %v2023_v34  ;;  %v2025_v39 = vmul.f32 0.23570226, %v1001_v36  ;;  %v2026_v40 = vmul.f32 0.23570226, %v1002_v37 }
 0x29c   :  { %3048 = vst [vmem:[#allocation5 + $0x1e88] sm:$0xff] %v2024_v35  ;;  %v2027_v41 = vmul.f32 0.23570226, %v1003_v38  ;;  %v1004_v42 = vld [vmem:[#allocation2 + $0x1ea8] sm:$0xff]  ;;  %v1005_v43 = vld [vmem:[#allocation2 + $0x1eb0] sm:$0xff]  ;;  %v1006_v44 = vld [vmem:[#allocation2 + $0x1eb8] sm:$0xff] }
 0x29d   :  { %3049 = vst [vmem:[#allocation5 + $0x1e90] sm:$0xff] %v2025_v39  ;;  %3050 = vst [vmem:[#allocation5 + $0x1e98] sm:$0xff] %v2026_v40  ;;  %v2028_v45 = vmul.f32 0.23570226, %v1004_v42  ;;  %v2029_v46 = vmul.f32 0.23570226, %v1005_v43 }
 0x29e   :  { %3051 = vst [vmem:[#allocation5 + $0x1ea0] sm:$0xff] %v2027_v41  ;;  %v2030_v47 = vmul.f32 0.23570226, %v1006_v44  ;;  %v1007_v48 = vld [vmem:[#allocation2 + $0x1ec0] sm:$0xff]  ;;  %v1008_v49 = vld [vmem:[#allocation2 + $0x1ec8] sm:$0xff]  ;;  %v1009_v50 = vld [vmem:[#allocation2 + $0x1ed0] sm:$0xff] }
 0x29f   :  { %3052 = vst [vmem:[#allocation5 + $0x1ea8] sm:$0xff] %v2028_v45  ;;  %3053 = vst [vmem:[#allocation5 + $0x1eb0] sm:$0xff] %v2029_v46  ;;  %v2031_v51 = vmul.f32 0.23570226, %v1007_v48  ;;  %v2032_v52 = vmul.f32 0.23570226, %v1008_v49 }
 0x2a0   :  { %3054 = vst [vmem:[#allocation5 + $0x1eb8] sm:$0xff] %v2030_v47  ;;  %v2033_v53 = vmul.f32 0.23570226, %v1009_v50  ;;  %v1010_v54 = vld [vmem:[#allocation2 + $0x1ed8] sm:$0xff]  ;;  %v1011_v55 = vld [vmem:[#allocation2 + $0x1ee0] sm:$0xff]  ;;  %v1012_v56 = vld [vmem:[#allocation2 + $0x1ee8] sm:$0xff] }
 0x2a1   :  { %3055 = vst [vmem:[#allocation5 + $0x1ec0] sm:$0xff] %v2031_v51  ;;  %3056 = vst [vmem:[#allocation5 + $0x1ec8] sm:$0xff] %v2032_v52  ;;  %v2034_v57 = vmul.f32 0.23570226, %v1010_v54  ;;  %v2035_v58 = vmul.f32 0.23570226, %v1011_v55 }
 0x2a2   :  { %3057 = vst [vmem:[#allocation5 + $0x1ed0] sm:$0xff] %v2033_v53  ;;  %v2036_v59 = vmul.f32 0.23570226, %v1012_v56  ;;  %v1013_v60 = vld [vmem:[#allocation2 + $0x1ef0] sm:$0xff]  ;;  %v1014_v61 = vld [vmem:[#allocation2 + $0x1ef8] sm:$0xff]  ;;  %v1015_v62 = vld [vmem:[#allocation2 + $0x1f00] sm:$0xff] }
 0x2a3   :  { %3058 = vst [vmem:[#allocation5 + $0x1ed8] sm:$0xff] %v2034_v57  ;;  %3059 = vst [vmem:[#allocation5 + $0x1ee0] sm:$0xff] %v2035_v58  ;;  %v2037_v63 = vmul.f32 0.23570226, %v1013_v60  ;;  %v2038_v0 = vmul.f32 0.23570226, %v1014_v61 }
 0x2a4   :  { %3060 = vst [vmem:[#allocation5 + $0x1ee8] sm:$0xff] %v2036_v59  ;;  %v2039_v1 = vmul.f32 0.23570226, %v1015_v62  ;;  %v1016_v2 = vld [vmem:[#allocation2 + $0x1f08] sm:$0xff]  ;;  %v1017_v3 = vld [vmem:[#allocation2 + $0x1f10] sm:$0xff]  ;;  %v1018_v4 = vld [vmem:[#allocation2 + $0x1f18] sm:$0xff] }
 0x2a5   :  { %3061 = vst [vmem:[#allocation5 + $0x1ef0] sm:$0xff] %v2037_v63  ;;  %3062 = vst [vmem:[#allocation5 + $0x1ef8] sm:$0xff] %v2038_v0  ;;  %v2040_v5 = vmul.f32 0.23570226, %v1016_v2  ;;  %v2041_v6 = vmul.f32 0.23570226, %v1017_v3 }
 0x2a6   :  { %3063 = vst [vmem:[#allocation5 + $0x1f00] sm:$0xff] %v2039_v1  ;;  %v2042_v7 = vmul.f32 0.23570226, %v1018_v4  ;;  %v1019_v8 = vld [vmem:[#allocation2 + $0x1f20] sm:$0xff]  ;;  %v1020_v9 = vld [vmem:[#allocation2 + $0x1f28] sm:$0xff]  ;;  %v1021_v10 = vld [vmem:[#allocation2 + $0x1f30] sm:$0xff] }
 0x2a7   :  { %3064 = vst [vmem:[#allocation5 + $0x1f08] sm:$0xff] %v2040_v5  ;;  %3065 = vst [vmem:[#allocation5 + $0x1f10] sm:$0xff] %v2041_v6  ;;  %v2043_v11 = vmul.f32 0.23570226, %v1019_v8  ;;  %v2044_v12 = vmul.f32 0.23570226, %v1020_v9 }
 0x2a8   :  { %3066 = vst [vmem:[#allocation5 + $0x1f18] sm:$0xff] %v2042_v7  ;;  %v2045_v13 = vmul.f32 0.23570226, %v1021_v10  ;;  %v1022_v14 = vld [vmem:[#allocation2 + $0x1f38] sm:$0xff]  ;;  %v1023_v15 = vld [vmem:[#allocation2 + $0x1f40] sm:$0xff]  ;;  %v1024_v16 = vld [vmem:[#allocation2 + $0x1f48] sm:$0xff] }
 0x2a9   :  { %3067 = vst [vmem:[#allocation5 + $0x1f20] sm:$0xff] %v2043_v11  ;;  %3068 = vst [vmem:[#allocation5 + $0x1f28] sm:$0xff] %v2044_v12  ;;  %v2046_v17 = vmul.f32 0.23570226, %v1022_v14  ;;  %v2047_v18 = vmul.f32 0.23570226, %v1023_v15 }
 0x2aa   :  { %3069 = vst [vmem:[#allocation5 + $0x1f30] sm:$0xff] %v2045_v13  ;;  %v2048_v19 = vmul.f32 0.23570226, %v1024_v16  ;;  %v1025_v20 = vld [vmem:[#allocation2 + $0x1f50] sm:$0xff]  ;;  %v1026_v21 = vld [vmem:[#allocation2 + $0x1f58] sm:$0xff]  ;;  %v1027_v22 = vld [vmem:[#allocation2 + $0x1f60] sm:$0xff] }
 0x2ab   :  { %3070 = vst [vmem:[#allocation5 + $0x1f38] sm:$0xff] %v2046_v17  ;;  %3071 = vst [vmem:[#allocation5 + $0x1f40] sm:$0xff] %v2047_v18  ;;  %v2049_v23 = vmul.f32 0.23570226, %v1025_v20  ;;  %v2050_v24 = vmul.f32 0.23570226, %v1026_v21 }
 0x2ac   :  { %3072 = vst [vmem:[#allocation5 + $0x1f48] sm:$0xff] %v2048_v19  ;;  %v2051_v25 = vmul.f32 0.23570226, %v1027_v22  ;;  %v1028_v26 = vld [vmem:[#allocation2 + $0x1f68] sm:$0xff]  ;;  %v1029_v27 = vld [vmem:[#allocation2 + $0x1f70] sm:$0xff]  ;;  %v1030_v28 = vld [vmem:[#allocation2 + $0x1f78] sm:$0xff] }
 0x2ad   :  { %3073 = vst [vmem:[#allocation5 + $0x1f50] sm:$0xff] %v2049_v23  ;;  %3074 = vst [vmem:[#allocation5 + $0x1f58] sm:$0xff] %v2050_v24  ;;  %v2052_v29 = vmul.f32 0.23570226, %v1028_v26  ;;  %v2053_v30 = vmul.f32 0.23570226, %v1029_v27 }
 0x2ae   :  { %3075 = vst [vmem:[#allocation5 + $0x1f60] sm:$0xff] %v2051_v25  ;;  %v2054_v31 = vmul.f32 0.23570226, %v1030_v28  ;;  %v1031_v32 = vld [vmem:[#allocation2 + $0x1f80] sm:$0xff]  ;;  %v1032_v33 = vld [vmem:[#allocation2 + $0x1f88] sm:$0xff]  ;;  %v1033_v34 = vld [vmem:[#allocation2 + $0x1f90] sm:$0xff] }
 0x2af   :  { %3076 = vst [vmem:[#allocation5 + $0x1f68] sm:$0xff] %v2052_v29  ;;  %3077 = vst [vmem:[#allocation5 + $0x1f70] sm:$0xff] %v2053_v30  ;;  %v2055_v35 = vmul.f32 0.23570226, %v1031_v32  ;;  %v2056_v36 = vmul.f32 0.23570226, %v1032_v33 }
 0x2b0   :  { %3078 = vst [vmem:[#allocation5 + $0x1f78] sm:$0xff] %v2054_v31  ;;  %v2057_v37 = vmul.f32 0.23570226, %v1033_v34  ;;  %v1034_v38 = vld [vmem:[#allocation2 + $0x1f98] sm:$0xff]  ;;  %v1035_v39 = vld [vmem:[#allocation2 + $0x1fa0] sm:$0xff]  ;;  %v1036_v40 = vld [vmem:[#allocation2 + $0x1fa8] sm:$0xff] }
 0x2b1   :  { %3079 = vst [vmem:[#allocation5 + $0x1f80] sm:$0xff] %v2055_v35  ;;  %3080 = vst [vmem:[#allocation5 + $0x1f88] sm:$0xff] %v2056_v36  ;;  %v2058_v41 = vmul.f32 0.23570226, %v1034_v38  ;;  %v2059_v42 = vmul.f32 0.23570226, %v1035_v39 }
 0x2b2   :  { %3081 = vst [vmem:[#allocation5 + $0x1f90] sm:$0xff] %v2057_v37  ;;  %v2060_v43 = vmul.f32 0.23570226, %v1036_v40  ;;  %v1037_v44 = vld [vmem:[#allocation2 + $0x1fb0] sm:$0xff]  ;;  %v1038_v45 = vld [vmem:[#allocation2 + $0x1fb8] sm:$0xff]  ;;  %v1039_v46 = vld [vmem:[#allocation2 + $0x1fc0] sm:$0xff] }
 0x2b3   :  { %3082 = vst [vmem:[#allocation5 + $0x1f98] sm:$0xff] %v2058_v41  ;;  %3083 = vst [vmem:[#allocation5 + $0x1fa0] sm:$0xff] %v2059_v42  ;;  %v2061_v47 = vmul.f32 0.23570226, %v1037_v44  ;;  %v2062_v48 = vmul.f32 0.23570226, %v1038_v45 }
 0x2b4   :  { %3084 = vst [vmem:[#allocation5 + $0x1fa8] sm:$0xff] %v2060_v43  ;;  %v2063_v49 = vmul.f32 0.23570226, %v1039_v46  ;;  %v1040_v50 = vld [vmem:[#allocation2 + $0x1fc8] sm:$0xff]  ;;  %v1041_v51 = vld [vmem:[#allocation2 + $0x1fd0] sm:$0xff]  ;;  %v1042_v52 = vld [vmem:[#allocation2 + $0x1fd8] sm:$0xff] }
 0x2b5   :  { %3085 = vst [vmem:[#allocation5 + $0x1fb0] sm:$0xff] %v2061_v47  ;;  %3086 = vst [vmem:[#allocation5 + $0x1fb8] sm:$0xff] %v2062_v48  ;;  %v2064_v53 = vmul.f32 0.23570226, %v1040_v50  ;;  %v2065_v54 = vmul.f32 0.23570226, %v1041_v51 }
 0x2b6   :  { %3087 = vst [vmem:[#allocation5 + $0x1fc0] sm:$0xff] %v2063_v49  ;;  %v2066_v55 = vmul.f32 0.23570226, %v1042_v52  ;;  %v1043_v56 = vld [vmem:[#allocation2 + $0x1fe0] sm:$0xff]  ;;  %v1044_v57 = vld [vmem:[#allocation2 + $0x1fe8] sm:$0xff]  ;;  %v1045_v58 = vld [vmem:[#allocation2 + $0x1ff0] sm:$0xff] }
 0x2b7   :  { %3088 = vst [vmem:[#allocation5 + $0x1fc8] sm:$0xff] %v2064_v53  ;;  %3089 = vst [vmem:[#allocation5 + $0x1fd0] sm:$0xff] %v2065_v54  ;;  %v2067_v59 = vmul.f32 0.23570226, %v1043_v56  ;;  %v2068_v60 = vmul.f32 0.23570226, %v1044_v57 }
 0x2b8   :  { %3090 = vst [vmem:[#allocation5 + $0x1fd8] sm:$0xff] %v2066_v55  ;;  %v2069_v61 = vmul.f32 0.23570226, %v1045_v58  ;;  %v1046_v62 = vld [vmem:[#allocation2 + $0x1ff8] sm:$0xff]  ;;  %s3136_s14 = scalar_lea.vmem %s3101_s13, 131072 }
 0x2b9   :  { %3091 = vst [vmem:[#allocation5 + $0x1fe0] sm:$0xff] %v2067_v59  ;;  %3092 = vst [vmem:[#allocation5 + $0x1fe8] sm:$0xff] %v2068_v60  ;;  %v2070_v63 = vmul.f32 0.23570226, %v1046_v62  ;;  %p3137_p5 = scmp.ne.s32.totalorder %s3101_s13, %s3136_s14  ;;  %p3142_p7 = scmp.lt.s32.totalorder %s3136_s14, %s3136_s14 }
 0x2ba   :  { %3093 = vst [vmem:[#allocation5 + $0x1ff0] sm:$0xff] %v2069_v61 }
 0x2bb   :  { %3094 = vst [vmem:[#allocation5 + $0x1ff8] sm:$0xff] %v2070_v63  ;;  %p3143_p8 = por %p3142_p7, %p3141_p6 }
 0x2bd   :  { %p3144_p9 = pnand %p3143_p8, %p3137_p5 }
 0x2bf   :  { %3147 = shalt.err (!%p3144_p9)
}
 0x2c0   :  { %3106 = dma.vmem_to_hbm [thread:$0]  %s3101_s13, 131072, %s3187_s1, [#allocation4], %s3161_s9, %s3161_s9, %s3162_s10  }
 0x2c1   :  { %3158 = dma.done.wait [#allocation4], 131072  }
 0x2c2   :  { %3159 = vsyncadd [#allocation4], 4294836224 }
 0x2c3   :  { %3110 = vsyncpa [#allocation3], 1 }
 0x2c4   :  { %3111 = vsyncpa [#allocation4], 1 }

</bundles_post_ra>
